<compile_context>
chip_gen: v7x
topology: tpu7x:2x2x1
jax: 0.10.0
libtpu: 0.0.40
codegen_flags: <defaults>
</compile_context>

<pallas_src>
import numpy as np
import jax
import jax.numpy as jnp
from jax.experimental import pallas as pl
from jax.experimental.pallas import tpu as pltpu


# ----------------------------------------------------------------------------
# Trace-time helpers (pure numpy, baked in as constants)
# ----------------------------------------------------------------------------

def _interp_matrix_np(n_out, n_in):
    """PyTorch Upsample(mode='bilinear', align_corners=True) weights as a matrix."""
    m = np.zeros((n_out, n_in), np.float32)
    if n_in == 1:
        m[:, 0] = 1.0
        return m
    pos = np.arange(n_out, dtype=np.float64) * (n_in - 1) / (n_out - 1)
    i0 = np.clip(np.floor(pos).astype(np.int64), 0, n_in - 2)
    frac = (pos - i0).astype(np.float32)
    rows = np.arange(n_out)
    m[rows, i0] += 1.0 - frac
    m[rows, i0 + 1] += frac
    return m


def _interp_pad_matrix_np(n_skip, n_in, extra=0):
    """2x bilinear (align_corners=True) interpolation matrix with the F.pad
    centering to the skip size AND `extra` zero rows of conv halo folded in."""
    n_up = 2 * n_in
    diff = n_skip - n_up
    assert diff >= 0, "skip connection must be >= 2x the upsampled input"
    base = _interp_matrix_np(n_up, n_in)
    full = np.zeros((n_skip + 2 * extra, n_in), np.float32)
    off = extra + diff // 2
    full[off: off + n_up, :] = base
    return full


def _fold_bn(conv_bias, gamma, beta, running_mean, running_var, eps=1e-5):
    scale = gamma / jnp.sqrt(running_var + eps)
    bias = beta + (conv_bias - running_mean) * scale
    return scale, bias


def _pick_row_tile(H2, row_tile=None, target=32):
    if row_tile is not None:
        assert H2 % row_tile == 0 and row_tile % 4 == 0, (H2, row_tile)
        return row_tile
    for t in range(min(target, H2), 3, -1):
        if H2 % t == 0 and t % 4 == 0:
            return t
    raise ValueError(f"cannot pick a row tile for H2={H2}")


# ----------------------------------------------------------------------------
# Fused Pallas kernel (one row-block of one batch element per grid step)
# ----------------------------------------------------------------------------

def _make_kernel(*, TH, H2, W2, C1, C2, Cmid, Cout, cdt, lane_dense_out):
    Hs = TH + 4          # x-slab rows: TH output rows + 2-row halo each side
    W2p = W2 + 2         # pre-padded width (conv1 column halo)
    f32 = jnp.float32

    def kernel(x1_ref, x2a_ref, x2b_ref, ry_ref, rx_ref,
               w1a_ref, w1b_ref, s1_ref, b1_ref,
               w2_ref, s2_ref, b2_ref, o_ref, y1pad_ref):
        j = pl.program_id(1)
        row0 = j * TH
        if TH % 8 == 0:
            row0 = pl.multiple_of(row0, 8)

        # ---- bilinear upsample + centering pad (folded into ry/rx) for the
        #      slab rows; kept in f32 (tiny FLOP fraction), result stays in VMEM.
        x1 = x1_ref[0].astype(f32)                                  # (H1, W1, C1)
        ry = ry_ref[pl.ds(row0, Hs), :]                             # (Hs, H1)
        t = jnp.einsum("ph,hwc->pwc", ry, x1,
                       preferred_element_type=f32)                  # (Hs, W1, C1)
        up = jnp.einsum("qw,pwc->pqc", rx_ref[...], t,
                        preferred_element_type=f32)                 # (Hs, W2p, C1)
        up = up.astype(cdt)

        # ---- assemble the x2 slab: TH-row main block + 4-row halo block
        #      (both auto-pipelined); columns already carry the conv1 halo.
        x2s = jnp.concatenate([x2a_ref[0], x2b_ref[0]], axis=0)     # (Hs, W2p, C2)

        # ---- conv1 (3x3, pad=1) over TH+2 rows (incl. conv2's row halo):
        #      9 taps x 2 sources, MXU matmuls with f32 accumulation; no im2col
        #      buffer and no channel concat (w1 split per source).
        acc1 = jnp.zeros((TH + 2, W2, Cmid), f32)
        for dy in range(3):
            for dx in range(3):
                xs = x2s[dy:dy + TH + 2, dx:dx + W2, :]
                us = up[dy:dy + TH + 2, dx:dx + W2, :]
                acc1 = acc1 + jnp.einsum("hwc,cm->hwm", xs, w1a_ref[dy, dx],
                                         preferred_element_type=f32)
                acc1 = acc1 + jnp.einsum("hwc,cm->hwm", us, w1b_ref[dy, dx],
                                         preferred_element_type=f32)
        y1 = jnp.maximum(acc1 * s1_ref[...].reshape(1, 1, Cmid)
                         + b1_ref[...].reshape(1, 1, Cmid), 0.0)

        # Rows of y1 outside the image are conv2's zero padding -> mask them.
        img_row = (jax.lax.broadcasted_iota(jnp.int32, (TH + 2, 1, 1), 0)
                   + (j * TH - 1))
        y1 = jnp.where((img_row >= 0) & (img_row < H2), y1, 0.0)

        # ---- persistent padded scratch for conv2's input: zero border columns
        #      every step (scratch is per-core, so no one-time init), write the
        #      interior once. No zero-pad concatenates.
        y1pad_ref[:, 0:1, :] = jnp.zeros((TH + 2, 1, Cmid), cdt)
        y1pad_ref[:, W2 + 1:W2 + 2, :] = jnp.zeros((TH + 2, 1, Cmid), cdt)
        y1pad_ref[:, 1:W2 + 1, :] = y1.astype(cdt)

        # ---- conv2 (3x3, pad=1): 9 tap matmuls, f32 accumulation.
        acc2 = jnp.zeros((TH, W2, Cout), f32)
        for dy in range(3):
            for dx in range(3):
                ys = y1pad_ref[dy:dy + TH, dx:dx + W2, :]
                acc2 = acc2 + jnp.einsum("hwc,cm->hwm", ys, w2_ref[dy, dx],
                                         preferred_element_type=f32)
        y2 = jnp.maximum(acc2 * s2_ref[...].reshape(1, 1, Cout)
                         + b2_ref[...].reshape(1, 1, Cout), 0.0)

        if lane_dense_out:
            # small Cout: store (Cout, TH*W2) so the lane dim is wide/unmasked.
            o_ref[0] = jnp.transpose(y2.reshape(TH * W2, Cout)).astype(o_ref.dtype)
        else:
            # Cout % 128 == 0: NHWC store is already lane-dense, no transpose.
            o_ref[0] = y2.astype(o_ref.dtype)

    return kernel


# ----------------------------------------------------------------------------
# Wrapper
# ----------------------------------------------------------------------------

def up_forward(params, x1_nchw, x2_nchw, *, row_tile=None,
               compute_dtype=jnp.bfloat16):
    """Pallas forward for Up.forward(x1, x2). Inputs/outputs are NCHW like PyTorch."""
    N, C1, H1, W1 = x1_nchw.shape
    N2, C2, H2, W2 = x2_nchw.shape
    assert N2 == N
    assert H2 % 4 == 0, "row tiling assumes H2 % 4 == 0"
    w1, w2 = params["w1"], params["w2"]
    Cin = C2 + C1
    Cmid, Cout = w1.shape[-1], w2.shape[-1]
    assert w1.shape == (3, 3, Cin, Cmid) and w2.shape == (3, 3, Cmid, Cout)

    cdt = jnp.dtype(compute_dtype)
    TH = _pick_row_tile(H2, row_tile)
    nH = H2 // TH
    W2p = W2 + 2

    # NCHW -> NHWC so channels live on the TPU lane axis inside the kernel.
    # TODO(synk): skip these transposes if the surrounding model is channels-last.
    x1 = jnp.transpose(x1_nchw, (0, 2, 3, 1)).astype(jnp.float32)
    x2 = jnp.transpose(x2_nchw, (0, 2, 3, 1)).astype(cdt)
    # Pre-pad x2 with the fused-conv halo (2 rows top/bottom: conv1+conv2 row
    # halo; 1 col left/right: conv1 column pad). Zero pad == conv zero padding.
    x2p = jnp.pad(x2, ((0, 0), (2, 2), (1, 1), (0, 0)))

    # Static interpolation matrices with the F.pad centering and the conv halo
    # zero rows folded in (numpy, trace time).
    ry = jnp.asarray(_interp_pad_matrix_np(H2, H1, extra=2))        # (H2+4, H1)
    rx = jnp.asarray(_interp_pad_matrix_np(W2, W1, extra=1))        # (W2+2, W1)

    # Fold inference-mode BatchNorm (+ conv bias) into per-channel scale/bias.
    s1, b1 = _fold_bn(params["b1"], params["g1"], params["beta1"],
                      params["m1"], params["v1"])
    s2, b2 = _fold_bn(params["b2"], params["g2"], params["beta2"],
                      params["m2"], params["v2"])

    # Split conv1 weights per source (x2 channels first in torch.cat order).
    w1a = w1[:, :, :C2, :].astype(cdt)
    w1b = w1[:, :, C2:, :].astype(cdt)
    w2c = w2.astype(cdt)
    s1 = s1.reshape(1, Cmid).astype(jnp.float32)
    b1 = b1.reshape(1, Cmid).astype(jnp.float32)
    s2 = s2.reshape(1, Cout).astype(jnp.float32)
    b2 = b2.reshape(1, Cout).astype(jnp.float32)

    out_dtype = x2_nchw.dtype
    lane_dense_out = (Cout % 128 != 0) and ((TH * W2) % 128 == 0 or nH == 1)
    if lane_dense_out:
        out_shape = jax.ShapeDtypeStruct((N, Cout, H2 * W2), out_dtype)
        out_spec = pl.BlockSpec((1, Cout, TH * W2), lambda n, j: (n, 0, j))
    else:
        out_shape = jax.ShapeDtypeStruct((N, H2, W2, Cout), out_dtype)
        out_spec = pl.BlockSpec((1, TH, W2, Cout), lambda n, j: (n, j, 0, 0))

    kernel = _make_kernel(TH=TH, H2=H2, W2=W2, C1=C1, C2=C2, Cmid=Cmid,
                          Cout=Cout, cdt=cdt, lane_dense_out=lane_dense_out)

    # Explicit scoped-VMEM budget: double-buffered inputs/outputs + scratch +
    # transient values, with headroom; capped for v7x's 64 MiB physical VMEM.
    cs = cdt.itemsize
    osz = jnp.dtype(out_dtype).itemsize
    live = (2 * (TH + 4) * W2p * C2 * cs          # x2 slab blocks (double-buf)
            + 2 * H1 * W1 * C1 * 4                # x1 block
            + (TH + 4) * W2p * C1 * (4 + cs)      # upsampled slab (f32 + cast)
            + (TH + 2) * W2p * Cmid * cs          # y1pad scratch
            + (TH + 2) * W2 * Cmid * 4            # conv1 accumulator
            + TH * W2 * Cout * 4                  # conv2 accumulator
            + 2 * TH * W2 * Cout * osz            # output block (double-buf)
            + 2 * 9 * (Cin * Cmid + Cmid * Cout) * cs)   # weights
    vmem_limit = int(min(max(3 * live, 32 * 1024 * 1024), 64 * 1024 * 1024))

    out = pl.pallas_call(
        kernel,
        out_shape=out_shape,
        grid=(N, nH),
        in_specs=[
            pl.BlockSpec((1, H1, W1, C1), lambda n, j: (n, 0, 0, 0)),
            # main TH-row block of the padded x2 ...
            pl.BlockSpec((1, TH, W2p, C2), lambda n, j: (n, j, 0, 0)),
            # ... plus the 4-row bottom-halo block of the same array.
            pl.BlockSpec((1, 4, W2p, C2), lambda n, j: (n, (j + 1) * (TH // 4), 0, 0)),
            pl.BlockSpec((H2 + 4, H1), lambda n, j: (0, 0)),
            pl.BlockSpec((W2p, W1), lambda n, j: (0, 0)),
            pl.BlockSpec((3, 3, C2, Cmid), lambda n, j: (0, 0, 0, 0)),
            pl.BlockSpec((3, 3, C1, Cmid), lambda n, j: (0, 0, 0, 0)),
            pl.BlockSpec((1, Cmid), lambda n, j: (0, 0)),
            pl.BlockSpec((1, Cmid), lambda n, j: (0, 0)),
            pl.BlockSpec((3, 3, Cmid, Cout), lambda n, j: (0, 0, 0, 0)),
            pl.BlockSpec((1, Cout), lambda n, j: (0, 0)),
            pl.BlockSpec((1, Cout), lambda n, j: (0, 0)),
        ],
        out_specs=out_spec,
        scratch_shapes=[pltpu.VMEM((TH + 2, W2p, Cmid), cdt)],
        compiler_params=pltpu.CompilerParams(
            dimension_semantics=("parallel", "parallel"),
            vmem_limit_bytes=vmem_limit),
    )(x1, x2p, x2p, ry, rx, w1a, w1b, s1, b1, w2c, s2, b2)

    if lane_dense_out:
        return out.reshape(N, Cout, H2, W2)            # free reshape -> NCHW
    return jnp.transpose(out, (0, 3, 1, 2))            # single XLA transpose


# ----------------------------------------------------------------------------
# Synthetic parameters + pure-JAX reference (for correctness check)
# ----------------------------------------------------------------------------

def init_up_params(key, in_channels, out_channels):
    """Deterministic synthetic parameters for Up(in_channels, out_channels, bilinear=True)."""
    mid = in_channels // 2
    ks = jax.random.split(key, 8)
    return {
        # conv weights stored HWIO (3, 3, Cin, Cout)
        "w1": 0.1 * jax.random.normal(ks[0], (3, 3, in_channels, mid), jnp.float32),
        "b1": 0.1 * jax.random.normal(ks[1], (mid,), jnp.float32),
        "g1": 1.0 + 0.1 * jax.random.normal(ks[2], (mid,), jnp.float32),
        "beta1": 0.1 * jax.random.normal(ks[3], (mid,), jnp.float32),
        "m1": jnp.zeros((mid,), jnp.float32),
        "v1": jnp.ones((mid,), jnp.float32),
        "w2": 0.1 * jax.random.normal(ks[4], (3, 3, mid, out_channels), jnp.float32),
        "b2": 0.1 * jax.random.normal(ks[5], (out_channels,), jnp.float32),
        "g2": 1.0 + 0.1 * jax.random.normal(ks[6], (out_channels,), jnp.float32),
        "beta2": 0.1 * jax.random.normal(ks[7], (out_channels,), jnp.float32),
        "m2": jnp.zeros((out_channels,), jnp.float32),
        "v2": jnp.ones((out_channels,), jnp.float32),
    }


def up_forward_ref(params, x1_nchw, x2_nchw, eps=1e-5):
    x1 = jnp.transpose(x1_nchw, (0, 2, 3, 1))
    x2 = jnp.transpose(x2_nchw, (0, 2, 3, 1))
    N, H1, W1, C1 = x1.shape
    ry = jnp.asarray(_interp_matrix_np(2 * H1, H1))
    rx = jnp.asarray(_interp_matrix_np(2 * W1, W1))
    x1 = jnp.einsum("ph,nhwc->npwc", ry, x1)
    x1 = jnp.einsum("qw,npwc->npqc", rx, x1)
    diffY = x2.shape[1] - x1.shape[1]
    diffX = x2.shape[2] - x1.shape[2]
    x1 = jnp.pad(x1, ((0, 0),
                      (diffY // 2, diffY - diffY // 2),
                      (diffX // 2, diffX - diffX // 2),
                      (0, 0)))
    x = jnp.concatenate([x2, x1], axis=-1)

    def cbr(x, w, b, g, beta, m, v):
        y = jax.lax.conv_general_dilated(
            x, w, (1, 1), "SAME",
            dimension_numbers=("NHWC", "HWIO", "NHWC")) + b
        y = (y - m) / jnp.sqrt(v + eps) * g + beta
        return jnp.maximum(y, 0.0)

    y = cbr(x, params["w1"], params["b1"], params["g1"], params["beta1"],
            params["m1"], params["v1"])
    y = cbr(y, params["w2"], params["b2"], params["g2"], params["beta2"],
            params["m2"], params["v2"])
    return jnp.transpose(y, (0, 3, 1, 2))


# ----------------------------------------------------------------------------

if __name__ == "__main__":
    key = jax.random.PRNGKey(0)

    # ---- config A: Up(8, 4, bilinear=True); N=2, 16x16 skip, 8x8 deep -------
    in_ch, out_ch = 8, 4
    N, H2, W2 = 2, 16, 16
    H1, W1 = H2 // 2, W2 // 2
    k0, k1, k2, k3 = jax.random.split(key, 4)
    x1 = jax.random.normal(k0, (N, in_ch // 2, H1, W1), jnp.float32)
    x2 = jax.random.normal(k1, (N, in_ch // 2, H2, W2), jnp.float32)
    params = init_up_params(k2, in_ch, out_ch)

    ref = up_forward_ref(params, x1, x2)

    # strict numerical check with the f32 compute path (same tiling/halos).
    out_f32 = jax.block_until_ready(
        up_forward(params, x1, x2, row_tile=8, compute_dtype=jnp.float32))
    assert out_f32.shape == (N, out_ch, H2, W2), out_f32.shape
    err = float(jnp.max(jnp.abs(out_f32 - ref)))
    assert err < 5e-4, f"f32 path max err {err}"

    # fast path: bf16 MXU operands, f32 accumulation (looser tolerance).
    out_bf16 = jax.block_until_ready(
        up_forward(params, x1, x2, row_tile=8, compute_dtype=jnp.bfloat16))
    err = float(jnp.max(jnp.abs(out_bf16 - ref)))
    tol = 7.5e-2 + 2.5e-2 * float(jnp.max(jnp.abs(ref)))
    assert err < tol, f"bf16 path max err {err} (tol {tol})"

    # ---- config B: Up(32, 128), N=1 -- exercises the Cout%128==0 (NHWC,
    #      no-transpose) output path and the 2-parallel-axis grid at N=1 ------
    in_ch_b, out_ch_b = 32, 128
    x1b = jax.random.normal(k3, (1, in_ch_b // 2, H1, W1), jnp.float32)
    x2b = jax.random.normal(k0, (1, in_ch_b // 2, H2, W2), jnp.float32)
    params_b = init_up_params(k1, in_ch_b, out_ch_b)
    ref_b = up_forward_ref(params_b, x1b, x2b)
    out_b = jax.block_until_ready(
        up_forward(params_b, x1b, x2b, row_tile=8, compute_dtype=jnp.bfloat16))
    assert out_b.shape == (1, out_ch_b, H2, W2), out_b.shape
    err_b = float(jnp.max(jnp.abs(out_b - ref_b)))
    tol_b = 7.5e-2 + 2.5e-2 * float(jnp.max(jnp.abs(ref_b)))
    assert err_b < tol_b, f"bf16/NHWC path max err {err_b} (tol {tol_b})"

    print("KERNEL_OK")
</pallas_src>

<mosaic_0001>
module attributes {stable_mosaic.version = 11 : i64} {
  func.func @kernel(%arg0: i32, %arg1: i32, %arg2: memref<1x8x8x4xf32, #tpu.memory_space<vmem>>, %arg3: memref<1x8x18x4xf32, #tpu.memory_space<vmem>>, %arg4: memref<1x4x18x4xf32, #tpu.memory_space<vmem>>, %arg5: memref<20x8xf32, #tpu.memory_space<vmem>>, %arg6: memref<18x8xf32, #tpu.memory_space<vmem>>, %arg7: memref<3x3x4x4xf32, #tpu.memory_space<vmem>>, %arg8: memref<3x3x4x4xf32, #tpu.memory_space<vmem>>, %arg9: memref<1x4xf32, #tpu.memory_space<vmem>>, %arg10: memref<1x4xf32, #tpu.memory_space<vmem>>, %arg11: memref<3x3x4x4xf32, #tpu.memory_space<vmem>>, %arg12: memref<1x4xf32, #tpu.memory_space<vmem>>, %arg13: memref<1x4xf32, #tpu.memory_space<vmem>>, %arg14: memref<1x4x128xf32, #tpu.memory_space<vmem>>, %arg15: memref<10x18x4xf32, #tpu.memory_space<vmem>>) attributes {dimension_semantics = [#tpu.dimension_semantics<parallel>, #tpu.dimension_semantics<parallel>], iteration_bounds = array<i64: 2, 2>, scalar_prefetch = 0 : i64, scratch_operands = 1 : i64, tpu.core_type = #tpu.core_type<tc>, window_params = [{transform_indices = @transform_0, window_bounds = array<i64: 1, 8, 8, 4>}, {transform_indices = @transform_1, window_bounds = array<i64: 1, 8, 18, 4>}, {transform_indices = @transform_2, window_bounds = array<i64: 1, 4, 18, 4>}, {pipeline_mode = #tpu.pipeline_mode<synchronous>, transform_indices = @transform_3, window_bounds = array<i64: 20, 8>}, {pipeline_mode = #tpu.pipeline_mode<synchronous>, transform_indices = @transform_4, window_bounds = array<i64: 18, 8>}, {pipeline_mode = #tpu.pipeline_mode<synchronous>, transform_indices = @transform_5, window_bounds = array<i64: 3, 3, 4, 4>}, {pipeline_mode = #tpu.pipeline_mode<synchronous>, transform_indices = @transform_6, window_bounds = array<i64: 3, 3, 4, 4>}, {pipeline_mode = #tpu.pipeline_mode<synchronous>, transform_indices = @transform_7, window_bounds = array<i64: 1, 4>}, {pipeline_mode = #tpu.pipeline_mode<synchronous>, transform_indices = @transform_8, window_bounds = array<i64: 1, 4>}, {pipeline_mode = #tpu.pipeline_mode<synchronous>, transform_indices = @transform_9, window_bounds = array<i64: 3, 3, 4, 4>}, {pipeline_mode = #tpu.pipeline_mode<synchronous>, transform_indices = @transform_10, window_bounds = array<i64: 1, 4>}, {pipeline_mode = #tpu.pipeline_mode<synchronous>, transform_indices = @transform_11, window_bounds = array<i64: 1, 4>}, {transform_indices = @transform_12, window_bounds = array<i64: 1, 4, 128>}]} {
    %c8_i32 = arith.constant 8 : i32
    %0 = arith.muli %arg1, %c8_i32 : i32
    %1 = tpu.assume_multiple %0, 8 : i32
    %c0 = arith.constant 0 : index
    %c0_0 = arith.constant 0 : index
    %c0_1 = arith.constant 0 : index
    %c0_2 = arith.constant 0 : index
    %2 = vector.load %arg2[%c0, %c0_0, %c0_1, %c0_2] : memref<1x8x8x4xf32, #tpu.memory_space<vmem>>, vector<1x8x8x4xf32>
    %3 = vector.shape_cast %2 : vector<1x8x8x4xf32> to vector<8x8x4xf32>
    %4 = arith.index_cast %1 : i32 to index
    %c0_3 = arith.constant 0 : index
    %5 = vector.load %arg5[%4, %c0_3] : memref<20x8xf32, #tpu.memory_space<vmem>>, vector<12x8xf32>
    "tpu.trace_start"() <{level = 10 : i32, message = "ph,hwc->pwc"}> : () -> ()
    %cst = arith.constant dense<0.000000e+00> : vector<12x8x4xf32>
    %6 = tpu.matmul %5, %3, %cst {dimension_numbers = #tpu.dot_dimension_numbers<[1], [0], [0], [1, 2], [0, 0, 1, 1, 1, 2], [], []>} : vector<12x8xf32>, vector<8x8x4xf32>, vector<12x8x4xf32> -> vector<12x8x4xf32>
    "tpu.trace_stop"() : () -> ()
    %c0_4 = arith.constant 0 : index
    %c0_5 = arith.constant 0 : index
    %7 = vector.load %arg6[%c0_4, %c0_5] : memref<18x8xf32, #tpu.memory_space<vmem>>, vector<18x8xf32>
    "tpu.trace_start"() <{level = 10 : i32, message = "qw,pwc->pqc"}> : () -> ()
    %cst_6 = arith.constant dense<0.000000e+00> : vector<12x4x18xf32>
    %8 = tpu.matmul %6, %7, %cst_6 {dimension_numbers = #tpu.dot_dimension_numbers<[1], [1], [0, 2], [0], [0, 0, 0, 2, 1, 0], [], []>} : vector<12x8x4xf32>, vector<18x8xf32>, vector<12x4x18xf32> -> vector<12x4x18xf32>
    %9 = tpu.transpose %8, [0, 2, 1] : vector<12x4x18xf32> -> vector<12x18x4xf32>
    "tpu.trace_stop"() : () -> ()
    %c0_7 = arith.constant 0 : index
    %c0_8 = arith.constant 0 : index
    %c0_9 = arith.constant 0 : index
    %c0_10 = arith.constant 0 : index
    %10 = vector.load %arg3[%c0_7, %c0_8, %c0_9, %c0_10] : memref<1x8x18x4xf32, #tpu.memory_space<vmem>>, vector<1x8x18x4xf32>
    %11 = vector.shape_cast %10 : vector<1x8x18x4xf32> to vector<8x18x4xf32>
    %c0_11 = arith.constant 0 : index
    %c0_12 = arith.constant 0 : index
    %c0_13 = arith.constant 0 : index
    %c0_14 = arith.constant 0 : index
    %12 = vector.load %arg4[%c0_11, %c0_12, %c0_13, %c0_14] : memref<1x4x18x4xf32, #tpu.memory_space<vmem>>, vector<1x4x18x4xf32>
    %13 = vector.shape_cast %12 : vector<1x4x18x4xf32> to vector<4x18x4xf32>
    %14 = tpu.concatenate %11, %13 in 0 : vector<8x18x4xf32>, vector<4x18x4xf32> -> vector<12x18x4xf32>
    %cst_15 = arith.constant 0.000000e+00 : f32
    %15 = vector.broadcast %cst_15 : f32 to vector<10x16x4xf32>
    %16 = vector.extract_strided_slice %14 {offsets = [0, 0, 0], sizes = [10, 16, 4], strides = [1, 1, 1]} : vector<12x18x4xf32> to vector<10x16x4xf32>
    %17 = vector.extract_strided_slice %9 {offsets = [0, 0, 0], sizes = [10, 16, 4], strides = [1, 1, 1]} : vector<12x18x4xf32> to vector<10x16x4xf32>
    %c0_16 = arith.constant 0 : index
    %c0_17 = arith.constant 0 : index
    %c0_18 = arith.constant 0 : index
    %c0_19 = arith.constant 0 : index
    %18 = vector.load %arg7[%c0_16, %c0_17, %c0_18, %c0_19] : memref<3x3x4x4xf32, #tpu.memory_space<vmem>>, vector<1x1x4x4xf32>
    %19 = vector.shape_cast %18 : vector<1x1x4x4xf32> to vector<4x4xf32>
    "tpu.trace_start"() <{level = 10 : i32, message = "hwc,cm->hwm"}> : () -> ()
    %cst_20 = arith.constant dense<0.000000e+00> : vector<10x16x4xf32>
    %20 = tpu.matmul %16, %19, %cst_20 {dimension_numbers = #tpu.dot_dimension_numbers<[2], [0], [0, 1], [1], [0, 0, 0, 1, 1, 1], [], []>} : vector<10x16x4xf32>, vector<4x4xf32>, vector<10x16x4xf32> -> vector<10x16x4xf32>
    "tpu.trace_stop"() : () -> ()
    %21 = arith.addf %15, %20 : vector<10x16x4xf32>
    %c0_21 = arith.constant 0 : index
    %c0_22 = arith.constant 0 : index
    %c0_23 = arith.constant 0 : index
    %c0_24 = arith.constant 0 : index
    %22 = vector.load %arg8[%c0_21, %c0_22, %c0_23, %c0_24] : memref<3x3x4x4xf32, #tpu.memory_space<vmem>>, vector<1x1x4x4xf32>
    %23 = vector.shape_cast %22 : vector<1x1x4x4xf32> to vector<4x4xf32>
    "tpu.trace_start"() <{level = 10 : i32, message = "hwc,cm->hwm"}> : () -> ()
    %cst_25 = arith.constant dense<0.000000e+00> : vector<10x16x4xf32>
    %24 = tpu.matmul %17, %23, %cst_25 {dimension_numbers = #tpu.dot_dimension_numbers<[2], [0], [0, 1], [1], [0, 0, 0, 1, 1, 1], [], []>} : vector<10x16x4xf32>, vector<4x4xf32>, vector<10x16x4xf32> -> vector<10x16x4xf32>
    "tpu.trace_stop"() : () -> ()
    %25 = arith.addf %21, %24 : vector<10x16x4xf32>
    %26 = vector.extract_strided_slice %14 {offsets = [0, 1, 0], sizes = [10, 16, 4], strides = [1, 1, 1]} : vector<12x18x4xf32> to vector<10x16x4xf32>
    %27 = vector.extract_strided_slice %9 {offsets = [0, 1, 0], sizes = [10, 16, 4], strides = [1, 1, 1]} : vector<12x18x4xf32> to vector<10x16x4xf32>
    %c0_26 = arith.constant 0 : index
    %c1 = arith.constant 1 : index
    %c0_27 = arith.constant 0 : index
    %c0_28 = arith.constant 0 : index
    %28 = vector.load %arg7[%c0_26, %c1, %c0_27, %c0_28] : memref<3x3x4x4xf32, #tpu.memory_space<vmem>>, vector<1x1x4x4xf32>
    %29 = vector.shape_cast %28 : vector<1x1x4x4xf32> to vector<4x4xf32>
    "tpu.trace_start"() <{level = 10 : i32, message = "hwc,cm->hwm"}> : () -> ()
    %cst_29 = arith.constant dense<0.000000e+00> : vector<10x16x4xf32>
    %30 = tpu.matmul %26, %29, %cst_29 {dimension_numbers = #tpu.dot_dimension_numbers<[2], [0], [0, 1], [1], [0, 0, 0, 1, 1, 1], [], []>} : vector<10x16x4xf32>, vector<4x4xf32>, vector<10x16x4xf32> -> vector<10x16x4xf32>
    "tpu.trace_stop"() : () -> ()
    %31 = arith.addf %25, %30 : vector<10x16x4xf32>
    %c0_30 = arith.constant 0 : index
    %c1_31 = arith.constant 1 : index
    %c0_32 = arith.constant 0 : index
    %c0_33 = arith.constant 0 : index
    %32 = vector.load %arg8[%c0_30, %c1_31, %c0_32, %c0_33] : memref<3x3x4x4xf32, #tpu.memory_space<vmem>>, vector<1x1x4x4xf32>
    %33 = vector.shape_cast %32 : vector<1x1x4x4xf32> to vector<4x4xf32>
    "tpu.trace_start"() <{level = 10 : i32, message = "hwc,cm->hwm"}> : () -> ()
    %cst_34 = arith.constant dense<0.000000e+00> : vector<10x16x4xf32>
    %34 = tpu.matmul %27, %33, %cst_34 {dimension_numbers = #tpu.dot_dimension_numbers<[2], [0], [0, 1], [1], [0, 0, 0, 1, 1, 1], [], []>} : vector<10x16x4xf32>, vector<4x4xf32>, vector<10x16x4xf32> -> vector<10x16x4xf32>
    "tpu.trace_stop"() : () -> ()
    %35 = arith.addf %31, %34 : vector<10x16x4xf32>
    %36 = vector.extract_strided_slice %14 {offsets = [0, 2, 0], sizes = [10, 16, 4], strides = [1, 1, 1]} : vector<12x18x4xf32> to vector<10x16x4xf32>
    %37 = vector.extract_strided_slice %9 {offsets = [0, 2, 0], sizes = [10, 16, 4], strides = [1, 1, 1]} : vector<12x18x4xf32> to vector<10x16x4xf32>
    %c0_35 = arith.constant 0 : index
    %c2 = arith.constant 2 : index
    %c0_36 = arith.constant 0 : index
    %c0_37 = arith.constant 0 : index
    %38 = vector.load %arg7[%c0_35, %c2, %c0_36, %c0_37] : memref<3x3x4x4xf32, #tpu.memory_space<vmem>>, vector<1x1x4x4xf32>
    %39 = vector.shape_cast %38 : vector<1x1x4x4xf32> to vector<4x4xf32>
    "tpu.trace_start"() <{level = 10 : i32, message = "hwc,cm->hwm"}> : () -> ()
    %cst_38 = arith.constant dense<0.000000e+00> : vector<10x16x4xf32>
    %40 = tpu.matmul %36, %39, %cst_38 {dimension_numbers = #tpu.dot_dimension_numbers<[2], [0], [0, 1], [1], [0, 0, 0, 1, 1, 1], [], []>} : vector<10x16x4xf32>, vector<4x4xf32>, vector<10x16x4xf32> -> vector<10x16x4xf32>
    "tpu.trace_stop"() : () -> ()
    %41 = arith.addf %35, %40 : vector<10x16x4xf32>
    %c0_39 = arith.constant 0 : index
    %c2_40 = arith.constant 2 : index
    %c0_41 = arith.constant 0 : index
    %c0_42 = arith.constant 0 : index
    %42 = vector.load %arg8[%c0_39, %c2_40, %c0_41, %c0_42] : memref<3x3x4x4xf32, #tpu.memory_space<vmem>>, vector<1x1x4x4xf32>
    %43 = vector.shape_cast %42 : vector<1x1x4x4xf32> to vector<4x4xf32>
    "tpu.trace_start"() <{level = 10 : i32, message = "hwc,cm->hwm"}> : () -> ()
    %cst_43 = arith.constant dense<0.000000e+00> : vector<10x16x4xf32>
    %44 = tpu.matmul %37, %43, %cst_43 {dimension_numbers = #tpu.dot_dimension_numbers<[2], [0], [0, 1], [1], [0, 0, 0, 1, 1, 1], [], []>} : vector<10x16x4xf32>, vector<4x4xf32>, vector<10x16x4xf32> -> vector<10x16x4xf32>
    "tpu.trace_stop"() : () -> ()
    %45 = arith.addf %41, %44 : vector<10x16x4xf32>
    %46 = vector.extract_strided_slice %14 {offsets = [1, 0, 0], sizes = [10, 16, 4], strides = [1, 1, 1]} : vector<12x18x4xf32> to vector<10x16x4xf32>
    %47 = vector.extract_strided_slice %9 {offsets = [1, 0, 0], sizes = [10, 16, 4], strides = [1, 1, 1]} : vector<12x18x4xf32> to vector<10x16x4xf32>
    %c1_44 = arith.constant 1 : index
    %c0_45 = arith.constant 0 : index
    %c0_46 = arith.constant 0 : index
    %c0_47 = arith.constant 0 : index
    %48 = vector.load %arg7[%c1_44, %c0_45, %c0_46, %c0_47] : memref<3x3x4x4xf32, #tpu.memory_space<vmem>>, vector<1x1x4x4xf32>
    %49 = vector.shape_cast %48 : vector<1x1x4x4xf32> to vector<4x4xf32>
    "tpu.trace_start"() <{level = 10 : i32, message = "hwc,cm->hwm"}> : () -> ()
    %cst_48 = arith.constant dense<0.000000e+00> : vector<10x16x4xf32>
    %50 = tpu.matmul %46, %49, %cst_48 {dimension_numbers = #tpu.dot_dimension_numbers<[2], [0], [0, 1], [1], [0, 0, 0, 1, 1, 1], [], []>} : vector<10x16x4xf32>, vector<4x4xf32>, vector<10x16x4xf32> -> vector<10x16x4xf32>
    "tpu.trace_stop"() : () -> ()
    %51 = arith.addf %45, %50 : vector<10x16x4xf32>
    %c1_49 = arith.constant 1 : index
    %c0_50 = arith.constant 0 : index
    %c0_51 = arith.constant 0 : index
    %c0_52 = arith.constant 0 : index
    %52 = vector.load %arg8[%c1_49, %c0_50, %c0_51, %c0_52] : memref<3x3x4x4xf32, #tpu.memory_space<vmem>>, vector<1x1x4x4xf32>
    %53 = vector.shape_cast %52 : vector<1x1x4x4xf32> to vector<4x4xf32>
    "tpu.trace_start"() <{level = 10 : i32, message = "hwc,cm->hwm"}> : () -> ()
    %cst_53 = arith.constant dense<0.000000e+00> : vector<10x16x4xf32>
    %54 = tpu.matmul %47, %53, %cst_53 {dimension_numbers = #tpu.dot_dimension_numbers<[2], [0], [0, 1], [1], [0, 0, 0, 1, 1, 1], [], []>} : vector<10x16x4xf32>, vector<4x4xf32>, vector<10x16x4xf32> -> vector<10x16x4xf32>
    "tpu.trace_stop"() : () -> ()
    %55 = arith.addf %51, %54 : vector<10x16x4xf32>
    %56 = vector.extract_strided_slice %14 {offsets = [1, 1, 0], sizes = [10, 16, 4], strides = [1, 1, 1]} : vector<12x18x4xf32> to vector<10x16x4xf32>
    %57 = vector.extract_strided_slice %9 {offsets = [1, 1, 0], sizes = [10, 16, 4], strides = [1, 1, 1]} : vector<12x18x4xf32> to vector<10x16x4xf32>
    %c1_54 = arith.constant 1 : index
    %c1_55 = arith.constant 1 : index
    %c0_56 = arith.constant 0 : index
    %c0_57 = arith.constant 0 : index
    %58 = vector.load %arg7[%c1_54, %c1_55, %c0_56, %c0_57] : memref<3x3x4x4xf32, #tpu.memory_space<vmem>>, vector<1x1x4x4xf32>
    %59 = vector.shape_cast %58 : vector<1x1x4x4xf32> to vector<4x4xf32>
    "tpu.trace_start"() <{level = 10 : i32, message = "hwc,cm->hwm"}> : () -> ()
    %cst_58 = arith.constant dense<0.000000e+00> : vector<10x16x4xf32>
    %60 = tpu.matmul %56, %59, %cst_58 {dimension_numbers = #tpu.dot_dimension_numbers<[2], [0], [0, 1], [1], [0, 0, 0, 1, 1, 1], [], []>} : vector<10x16x4xf32>, vector<4x4xf32>, vector<10x16x4xf32> -> vector<10x16x4xf32>
    "tpu.trace_stop"() : () -> ()
    %61 = arith.addf %55, %60 : vector<10x16x4xf32>
    %c1_59 = arith.constant 1 : index
    %c1_60 = arith.constant 1 : index
    %c0_61 = arith.constant 0 : index
    %c0_62 = arith.constant 0 : index
    %62 = vector.load %arg8[%c1_59, %c1_60, %c0_61, %c0_62] : memref<3x3x4x4xf32, #tpu.memory_space<vmem>>, vector<1x1x4x4xf32>
    %63 = vector.shape_cast %62 : vector<1x1x4x4xf32> to vector<4x4xf32>
    "tpu.trace_start"() <{level = 10 : i32, message = "hwc,cm->hwm"}> : () -> ()
    %cst_63 = arith.constant dense<0.000000e+00> : vector<10x16x4xf32>
    %64 = tpu.matmul %57, %63, %cst_63 {dimension_numbers = #tpu.dot_dimension_numbers<[2], [0], [0, 1], [1], [0, 0, 0, 1, 1, 1], [], []>} : vector<10x16x4xf32>, vector<4x4xf32>, vector<10x16x4xf32> -> vector<10x16x4xf32>
    "tpu.trace_stop"() : () -> ()
    %65 = arith.addf %61, %64 : vector<10x16x4xf32>
    %66 = vector.extract_strided_slice %14 {offsets = [1, 2, 0], sizes = [10, 16, 4], strides = [1, 1, 1]} : vector<12x18x4xf32> to vector<10x16x4xf32>
    %67 = vector.extract_strided_slice %9 {offsets = [1, 2, 0], sizes = [10, 16, 4], strides = [1, 1, 1]} : vector<12x18x4xf32> to vector<10x16x4xf32>
    %c1_64 = arith.constant 1 : index
    %c2_65 = arith.constant 2 : index
    %c0_66 = arith.constant 0 : index
    %c0_67 = arith.constant 0 : index
    %68 = vector.load %arg7[%c1_64, %c2_65, %c0_66, %c0_67] : memref<3x3x4x4xf32, #tpu.memory_space<vmem>>, vector<1x1x4x4xf32>
    %69 = vector.shape_cast %68 : vector<1x1x4x4xf32> to vector<4x4xf32>
    "tpu.trace_start"() <{level = 10 : i32, message = "hwc,cm->hwm"}> : () -> ()
    %cst_68 = arith.constant dense<0.000000e+00> : vector<10x16x4xf32>
    %70 = tpu.matmul %66, %69, %cst_68 {dimension_numbers = #tpu.dot_dimension_numbers<[2], [0], [0, 1], [1], [0, 0, 0, 1, 1, 1], [], []>} : vector<10x16x4xf32>, vector<4x4xf32>, vector<10x16x4xf32> -> vector<10x16x4xf32>
    "tpu.trace_stop"() : () -> ()
    %71 = arith.addf %65, %70 : vector<10x16x4xf32>
    %c1_69 = arith.constant 1 : index
    %c2_70 = arith.constant 2 : index
    %c0_71 = arith.constant 0 : index
    %c0_72 = arith.constant 0 : index
    %72 = vector.load %arg8[%c1_69, %c2_70, %c0_71, %c0_72] : memref<3x3x4x4xf32, #tpu.memory_space<vmem>>, vector<1x1x4x4xf32>
    %73 = vector.shape_cast %72 : vector<1x1x4x4xf32> to vector<4x4xf32>
    "tpu.trace_start"() <{level = 10 : i32, message = "hwc,cm->hwm"}> : () -> ()
    %cst_73 = arith.constant dense<0.000000e+00> : vector<10x16x4xf32>
    %74 = tpu.matmul %67, %73, %cst_73 {dimension_numbers = #tpu.dot_dimension_numbers<[2], [0], [0, 1], [1], [0, 0, 0, 1, 1, 1], [], []>} : vector<10x16x4xf32>, vector<4x4xf32>, vector<10x16x4xf32> -> vector<10x16x4xf32>
    "tpu.trace_stop"() : () -> ()
    %75 = arith.addf %71, %74 : vector<10x16x4xf32>
    %76 = vector.extract_strided_slice %14 {offsets = [2, 0, 0], sizes = [10, 16, 4], strides = [1, 1, 1]} : vector<12x18x4xf32> to vector<10x16x4xf32>
    %77 = vector.extract_strided_slice %9 {offsets = [2, 0, 0], sizes = [10, 16, 4], strides = [1, 1, 1]} : vector<12x18x4xf32> to vector<10x16x4xf32>
    %c2_74 = arith.constant 2 : index
    %c0_75 = arith.constant 0 : index
    %c0_76 = arith.constant 0 : index
    %c0_77 = arith.constant 0 : index
    %78 = vector.load %arg7[%c2_74, %c0_75, %c0_76, %c0_77] : memref<3x3x4x4xf32, #tpu.memory_space<vmem>>, vector<1x1x4x4xf32>
    %79 = vector.shape_cast %78 : vector<1x1x4x4xf32> to vector<4x4xf32>
    "tpu.trace_start"() <{level = 10 : i32, message = "hwc,cm->hwm"}> : () -> ()
    %cst_78 = arith.constant dense<0.000000e+00> : vector<10x16x4xf32>
    %80 = tpu.matmul %76, %79, %cst_78 {dimension_numbers = #tpu.dot_dimension_numbers<[2], [0], [0, 1], [1], [0, 0, 0, 1, 1, 1], [], []>} : vector<10x16x4xf32>, vector<4x4xf32>, vector<10x16x4xf32> -> vector<10x16x4xf32>
    "tpu.trace_stop"() : () -> ()
    %81 = arith.addf %75, %80 : vector<10x16x4xf32>
    %c2_79 = arith.constant 2 : index
    %c0_80 = arith.constant 0 : index
    %c0_81 = arith.constant 0 : index
    %c0_82 = arith.constant 0 : index
    %82 = vector.load %arg8[%c2_79, %c0_80, %c0_81, %c0_82] : memref<3x3x4x4xf32, #tpu.memory_space<vmem>>, vector<1x1x4x4xf32>
    %83 = vector.shape_cast %82 : vector<1x1x4x4xf32> to vector<4x4xf32>
    "tpu.trace_start"() <{level = 10 : i32, message = "hwc,cm->hwm"}> : () -> ()
    %cst_83 = arith.constant dense<0.000000e+00> : vector<10x16x4xf32>
    %84 = tpu.matmul %77, %83, %cst_83 {dimension_numbers = #tpu.dot_dimension_numbers<[2], [0], [0, 1], [1], [0, 0, 0, 1, 1, 1], [], []>} : vector<10x16x4xf32>, vector<4x4xf32>, vector<10x16x4xf32> -> vector<10x16x4xf32>
    "tpu.trace_stop"() : () -> ()
    %85 = arith.addf %81, %84 : vector<10x16x4xf32>
    %86 = vector.extract_strided_slice %14 {offsets = [2, 1, 0], sizes = [10, 16, 4], strides = [1, 1, 1]} : vector<12x18x4xf32> to vector<10x16x4xf32>
    %87 = vector.extract_strided_slice %9 {offsets = [2, 1, 0], sizes = [10, 16, 4], strides = [1, 1, 1]} : vector<12x18x4xf32> to vector<10x16x4xf32>
    %c2_84 = arith.constant 2 : index
    %c1_85 = arith.constant 1 : index
    %c0_86 = arith.constant 0 : index
    %c0_87 = arith.constant 0 : index
    %88 = vector.load %arg7[%c2_84, %c1_85, %c0_86, %c0_87] : memref<3x3x4x4xf32, #tpu.memory_space<vmem>>, vector<1x1x4x4xf32>
    %89 = vector.shape_cast %88 : vector<1x1x4x4xf32> to vector<4x4xf32>
    "tpu.trace_start"() <{level = 10 : i32, message = "hwc,cm->hwm"}> : () -> ()
    %cst_88 = arith.constant dense<0.000000e+00> : vector<10x16x4xf32>
    %90 = tpu.matmul %86, %89, %cst_88 {dimension_numbers = #tpu.dot_dimension_numbers<[2], [0], [0, 1], [1], [0, 0, 0, 1, 1, 1], [], []>} : vector<10x16x4xf32>, vector<4x4xf32>, vector<10x16x4xf32> -> vector<10x16x4xf32>
    "tpu.trace_stop"() : () -> ()
    %91 = arith.addf %85, %90 : vector<10x16x4xf32>
    %c2_89 = arith.constant 2 : index
    %c1_90 = arith.constant 1 : index
    %c0_91 = arith.constant 0 : index
    %c0_92 = arith.constant 0 : index
    %92 = vector.load %arg8[%c2_89, %c1_90, %c0_91, %c0_92] : memref<3x3x4x4xf32, #tpu.memory_space<vmem>>, vector<1x1x4x4xf32>
    %93 = vector.shape_cast %92 : vector<1x1x4x4xf32> to vector<4x4xf32>
    "tpu.trace_start"() <{level = 10 : i32, message = "hwc,cm->hwm"}> : () -> ()
    %cst_93 = arith.constant dense<0.000000e+00> : vector<10x16x4xf32>
    %94 = tpu.matmul %87, %93, %cst_93 {dimension_numbers = #tpu.dot_dimension_numbers<[2], [0], [0, 1], [1], [0, 0, 0, 1, 1, 1], [], []>} : vector<10x16x4xf32>, vector<4x4xf32>, vector<10x16x4xf32> -> vector<10x16x4xf32>
    "tpu.trace_stop"() : () -> ()
    %95 = arith.addf %91, %94 : vector<10x16x4xf32>
    %96 = vector.extract_strided_slice %14 {offsets = [2, 2, 0], sizes = [10, 16, 4], strides = [1, 1, 1]} : vector<12x18x4xf32> to vector<10x16x4xf32>
    %97 = vector.extract_strided_slice %9 {offsets = [2, 2, 0], sizes = [10, 16, 4], strides = [1, 1, 1]} : vector<12x18x4xf32> to vector<10x16x4xf32>
    %c2_94 = arith.constant 2 : index
    %c2_95 = arith.constant 2 : index
    %c0_96 = arith.constant 0 : index
    %c0_97 = arith.constant 0 : index
    %98 = vector.load %arg7[%c2_94, %c2_95, %c0_96, %c0_97] : memref<3x3x4x4xf32, #tpu.memory_space<vmem>>, vector<1x1x4x4xf32>
    %99 = vector.shape_cast %98 : vector<1x1x4x4xf32> to vector<4x4xf32>
    "tpu.trace_start"() <{level = 10 : i32, message = "hwc,cm->hwm"}> : () -> ()
    %cst_98 = arith.constant dense<0.000000e+00> : vector<10x16x4xf32>
    %100 = tpu.matmul %96, %99, %cst_98 {dimension_numbers = #tpu.dot_dimension_numbers<[2], [0], [0, 1], [1], [0, 0, 0, 1, 1, 1], [], []>} : vector<10x16x4xf32>, vector<4x4xf32>, vector<10x16x4xf32> -> vector<10x16x4xf32>
    "tpu.trace_stop"() : () -> ()
    %101 = arith.addf %95, %100 : vector<10x16x4xf32>
    %c2_99 = arith.constant 2 : index
    %c2_100 = arith.constant 2 : index
    %c0_101 = arith.constant 0 : index
    %c0_102 = arith.constant 0 : index
    %102 = vector.load %arg8[%c2_99, %c2_100, %c0_101, %c0_102] : memref<3x3x4x4xf32, #tpu.memory_space<vmem>>, vector<1x1x4x4xf32>
    %103 = vector.shape_cast %102 : vector<1x1x4x4xf32> to vector<4x4xf32>
    "tpu.trace_start"() <{level = 10 : i32, message = "hwc,cm->hwm"}> : () -> ()
    %cst_103 = arith.constant dense<0.000000e+00> : vector<10x16x4xf32>
    %104 = tpu.matmul %97, %103, %cst_103 {dimension_numbers = #tpu.dot_dimension_numbers<[2], [0], [0, 1], [1], [0, 0, 0, 1, 1, 1], [], []>} : vector<10x16x4xf32>, vector<4x4xf32>, vector<10x16x4xf32> -> vector<10x16x4xf32>
    "tpu.trace_stop"() : () -> ()
    %105 = arith.addf %101, %104 : vector<10x16x4xf32>
    %c0_104 = arith.constant 0 : index
    %c0_105 = arith.constant 0 : index
    %106 = vector.load %arg9[%c0_104, %c0_105] : memref<1x4xf32, #tpu.memory_space<vmem>>, vector<1x4xf32>
    %107 = vector.shape_cast %106 : vector<1x4xf32> to vector<1x1x4xf32>
    %108 = vector.broadcast %107 : vector<1x1x4xf32> to vector<10x16x4xf32>
    %109 = arith.mulf %105, %108 : vector<10x16x4xf32>
    %c0_106 = arith.constant 0 : index
    %c0_107 = arith.constant 0 : index
    %110 = vector.load %arg10[%c0_106, %c0_107] : memref<1x4xf32, #tpu.memory_space<vmem>>, vector<1x4xf32>
    %111 = vector.shape_cast %110 : vector<1x4xf32> to vector<1x1x4xf32>
    %112 = vector.broadcast %111 : vector<1x1x4xf32> to vector<10x16x4xf32>
    %113 = arith.addf %109, %112 : vector<10x16x4xf32>
    %cst_108 = arith.constant 0.000000e+00 : f32
    %114 = vector.broadcast %cst_108 : f32 to vector<10x16x4xf32>
    %115 = arith.maximumf %113, %114 : vector<10x16x4xf32>
    %116 = tpu.iota {dimensions = array<i32: 0>} : vector<10x1x1xi32>
    %c8_i32_109 = arith.constant 8 : i32
    %117 = arith.muli %arg1, %c8_i32_109 : i32
    %c1_i32 = arith.constant 1 : i32
    %118 = arith.subi %117, %c1_i32 : i32
    %119 = vector.broadcast %118 : i32 to vector<10x1x1xi32>
    %120 = arith.addi %116, %119 : vector<10x1x1xi32>
    %c0_i32 = arith.constant 0 : i32
    %121 = vector.broadcast %c0_i32 : i32 to vector<10x1x1xi32>
    %122 = arith.cmpi sge, %120, %121 : vector<10x1x1xi32>
    %c16_i32 = arith.constant 16 : i32
    %123 = vector.broadcast %c16_i32 : i32 to vector<10x1x1xi32>
    %124 = arith.cmpi slt, %120, %123 : vector<10x1x1xi32>
    %125 = arith.andi %122, %124 : vector<10x1x1xi1>
    %cst_110 = arith.constant 0.000000e+00 : f32
    %126 = vector.shape_cast %125 : vector<10x1x1xi1> to vector<10x1x1xi1>
    %127 = vector.broadcast %126 : vector<10x1x1xi1> to vector<10x16x4xi1>
    %128 = vector.broadcast %cst_110 : f32 to vector<10x16x4xf32>
    %129 = arith.select %127, %115, %128 : vector<10x16x4xi1>, vector<10x16x4xf32>
    %cst_111 = arith.constant 0.000000e+00 : f32
    %130 = vector.broadcast %cst_111 : f32 to vector<10x1x4xf32>
    %c0_112 = arith.constant 0 : index
    %c0_113 = arith.constant 0 : index
    %c0_114 = arith.constant 0 : index
    %131 = vector.load %arg15[%c0_112, %c0_113, %c0_114] : memref<10x18x4xf32, #tpu.memory_space<vmem>>, vector<10x1x4xf32>
    tpu.vector_store %arg15[%c0_112, %c0_113, %c0_114], %130 {strides = array<i32>} : memref<10x18x4xf32, #tpu.memory_space<vmem>>, vector<10x1x4xf32>,
    %cst_115 = arith.constant 0.000000e+00 : f32
    %132 = vector.broadcast %cst_115 : f32 to vector<10x1x4xf32>
    %c0_116 = arith.constant 0 : index
    %c17 = arith.constant 17 : index
    %c0_117 = arith.constant 0 : index
    %133 = vector.load %arg15[%c0_116, %c17, %c0_117] : memref<10x18x4xf32, #tpu.memory_space<vmem>>, vector<10x1x4xf32>
    tpu.vector_store %arg15[%c0_116, %c17, %c0_117], %132 {strides = array<i32>} : memref<10x18x4xf32, #tpu.memory_space<vmem>>, vector<10x1x4xf32>,
    %c0_118 = arith.constant 0 : index
    %c1_119 = arith.constant 1 : index
    %c0_120 = arith.constant 0 : index
    %134 = vector.load %arg15[%c0_118, %c1_119, %c0_120] : memref<10x18x4xf32, #tpu.memory_space<vmem>>, vector<10x16x4xf32>
    tpu.vector_store %arg15[%c0_118, %c1_119, %c0_120], %129 {strides = array<i32>} : memref<10x18x4xf32, #tpu.memory_space<vmem>>, vector<10x16x4xf32>,
    %cst_121 = arith.constant 0.000000e+00 : f32
    %135 = vector.broadcast %cst_121 : f32 to vector<8x16x4xf32>
    %c0_122 = arith.constant 0 : index
    %c0_123 = arith.constant 0 : index
    %c0_124 = arith.constant 0 : index
    %136 = vector.load %arg15[%c0_122, %c0_123, %c0_124] : memref<10x18x4xf32, #tpu.memory_space<vmem>>, vector<8x16x4xf32>
    %c0_125 = arith.constant 0 : index
    %c0_126 = arith.constant 0 : index
    %c0_127 = arith.constant 0 : index
    %c0_128 = arith.constant 0 : index
    %137 = vector.load %arg11[%c0_125, %c0_126, %c0_127, %c0_128] : memref<3x3x4x4xf32, #tpu.memory_space<vmem>>, vector<1x1x4x4xf32>
    %138 = vector.shape_cast %137 : vector<1x1x4x4xf32> to vector<4x4xf32>
    "tpu.trace_start"() <{level = 10 : i32, message = "hwc,cm->hwm"}> : () -> ()
    %cst_129 = arith.constant dense<0.000000e+00> : vector<8x16x4xf32>
    %139 = tpu.matmul %136, %138, %cst_129 {dimension_numbers = #tpu.dot_dimension_numbers<[2], [0], [0, 1], [1], [0, 0, 0, 1, 1, 1], [], []>} : vector<8x16x4xf32>, vector<4x4xf32>, vector<8x16x4xf32> -> vector<8x16x4xf32>
    "tpu.trace_stop"() : () -> ()
    %140 = arith.addf %135, %139 : vector<8x16x4xf32>
    %c0_130 = arith.constant 0 : index
    %c1_131 = arith.constant 1 : index
    %c0_132 = arith.constant 0 : index
    %141 = vector.load %arg15[%c0_130, %c1_131, %c0_132] : memref<10x18x4xf32, #tpu.memory_space<vmem>>, vector<8x16x4xf32>
    %c0_133 = arith.constant 0 : index
    %c1_134 = arith.constant 1 : index
    %c0_135 = arith.constant 0 : index
    %c0_136 = arith.constant 0 : index
    %142 = vector.load %arg11[%c0_133, %c1_134, %c0_135, %c0_136] : memref<3x3x4x4xf32, #tpu.memory_space<vmem>>, vector<1x1x4x4xf32>
    %143 = vector.shape_cast %142 : vector<1x1x4x4xf32> to vector<4x4xf32>
    "tpu.trace_start"() <{level = 10 : i32, message = "hwc,cm->hwm"}> : () -> ()
    %cst_137 = arith.constant dense<0.000000e+00> : vector<8x16x4xf32>
    %144 = tpu.matmul %141, %143, %cst_137 {dimension_numbers = #tpu.dot_dimension_numbers<[2], [0], [0, 1], [1], [0, 0, 0, 1, 1, 1], [], []>} : vector<8x16x4xf32>, vector<4x4xf32>, vector<8x16x4xf32> -> vector<8x16x4xf32>
    "tpu.trace_stop"() : () -> ()
    %145 = arith.addf %140, %144 : vector<8x16x4xf32>
    %c0_138 = arith.constant 0 : index
    %c2_139 = arith.constant 2 : index
    %c0_140 = arith.constant 0 : index
    %146 = vector.load %arg15[%c0_138, %c2_139, %c0_140] : memref<10x18x4xf32, #tpu.memory_space<vmem>>, vector<8x16x4xf32>
    %c0_141 = arith.constant 0 : index
    %c2_142 = arith.constant 2 : index
    %c0_143 = arith.constant 0 : index
    %c0_144 = arith.constant 0 : index
    %147 = vector.load %arg11[%c0_141, %c2_142, %c0_143, %c0_144] : memref<3x3x4x4xf32, #tpu.memory_space<vmem>>, vector<1x1x4x4xf32>
    %148 = vector.shape_cast %147 : vector<1x1x4x4xf32> to vector<4x4xf32>
    "tpu.trace_start"() <{level = 10 : i32, message = "hwc,cm->hwm"}> : () -> ()
    %cst_145 = arith.constant dense<0.000000e+00> : vector<8x16x4xf32>
    %149 = tpu.matmul %146, %148, %cst_145 {dimension_numbers = #tpu.dot_dimension_numbers<[2], [0], [0, 1], [1], [0, 0, 0, 1, 1, 1], [], []>} : vector<8x16x4xf32>, vector<4x4xf32>, vector<8x16x4xf32> -> vector<8x16x4xf32>
    "tpu.trace_stop"() : () -> ()
    %150 = arith.addf %145, %149 : vector<8x16x4xf32>
    %c1_146 = arith.constant 1 : index
    %c0_147 = arith.constant 0 : index
    %c0_148 = arith.constant 0 : index
    %151 = vector.load %arg15[%c1_146, %c0_147, %c0_148] : memref<10x18x4xf32, #tpu.memory_space<vmem>>, vector<8x16x4xf32>
    %c1_149 = arith.constant 1 : index
    %c0_150 = arith.constant 0 : index
    %c0_151 = arith.constant 0 : index
    %c0_152 = arith.constant 0 : index
    %152 = vector.load %arg11[%c1_149, %c0_150, %c0_151, %c0_152] : memref<3x3x4x4xf32, #tpu.memory_space<vmem>>, vector<1x1x4x4xf32>
    %153 = vector.shape_cast %152 : vector<1x1x4x4xf32> to vector<4x4xf32>
    "tpu.trace_start"() <{level = 10 : i32, message = "hwc,cm->hwm"}> : () -> ()
    %cst_153 = arith.constant dense<0.000000e+00> : vector<8x16x4xf32>
    %154 = tpu.matmul %151, %153, %cst_153 {dimension_numbers = #tpu.dot_dimension_numbers<[2], [0], [0, 1], [1], [0, 0, 0, 1, 1, 1], [], []>} : vector<8x16x4xf32>, vector<4x4xf32>, vector<8x16x4xf32> -> vector<8x16x4xf32>
    "tpu.trace_stop"() : () -> ()
    %155 = arith.addf %150, %154 : vector<8x16x4xf32>
    %c1_154 = arith.constant 1 : index
    %c1_155 = arith.constant 1 : index
    %c0_156 = arith.constant 0 : index
    %156 = vector.load %arg15[%c1_154, %c1_155, %c0_156] : memref<10x18x4xf32, #tpu.memory_space<vmem>>, vector<8x16x4xf32>
    %c1_157 = arith.constant 1 : index
    %c1_158 = arith.constant 1 : index
    %c0_159 = arith.constant 0 : index
    %c0_160 = arith.constant 0 : index
    %157 = vector.load %arg11[%c1_157, %c1_158, %c0_159, %c0_160] : memref<3x3x4x4xf32, #tpu.memory_space<vmem>>, vector<1x1x4x4xf32>
    %158 = vector.shape_cast %157 : vector<1x1x4x4xf32> to vector<4x4xf32>
    "tpu.trace_start"() <{level = 10 : i32, message = "hwc,cm->hwm"}> : () -> ()
    %cst_161 = arith.constant dense<0.000000e+00> : vector<8x16x4xf32>
    %159 = tpu.matmul %156, %158, %cst_161 {dimension_numbers = #tpu.dot_dimension_numbers<[2], [0], [0, 1], [1], [0, 0, 0, 1, 1, 1], [], []>} : vector<8x16x4xf32>, vector<4x4xf32>, vector<8x16x4xf32> -> vector<8x16x4xf32>
    "tpu.trace_stop"() : () -> ()
    %160 = arith.addf %155, %159 : vector<8x16x4xf32>
    %c1_162 = arith.constant 1 : index
    %c2_163 = arith.constant 2 : index
    %c0_164 = arith.constant 0 : index
    %161 = vector.load %arg15[%c1_162, %c2_163, %c0_164] : memref<10x18x4xf32, #tpu.memory_space<vmem>>, vector<8x16x4xf32>
    %c1_165 = arith.constant 1 : index
    %c2_166 = arith.constant 2 : index
    %c0_167 = arith.constant 0 : index
    %c0_168 = arith.constant 0 : index
    %162 = vector.load %arg11[%c1_165, %c2_166, %c0_167, %c0_168] : memref<3x3x4x4xf32, #tpu.memory_space<vmem>>, vector<1x1x4x4xf32>
    %163 = vector.shape_cast %162 : vector<1x1x4x4xf32> to vector<4x4xf32>
    "tpu.trace_start"() <{level = 10 : i32, message = "hwc,cm->hwm"}> : () -> ()
    %cst_169 = arith.constant dense<0.000000e+00> : vector<8x16x4xf32>
    %164 = tpu.matmul %161, %163, %cst_169 {dimension_numbers = #tpu.dot_dimension_numbers<[2], [0], [0, 1], [1], [0, 0, 0, 1, 1, 1], [], []>} : vector<8x16x4xf32>, vector<4x4xf32>, vector<8x16x4xf32> -> vector<8x16x4xf32>
    "tpu.trace_stop"() : () -> ()
    %165 = arith.addf %160, %164 : vector<8x16x4xf32>
    %c2_170 = arith.constant 2 : index
    %c0_171 = arith.constant 0 : index
    %c0_172 = arith.constant 0 : index
    %166 = vector.load %arg15[%c2_170, %c0_171, %c0_172] : memref<10x18x4xf32, #tpu.memory_space<vmem>>, vector<8x16x4xf32>
    %c2_173 = arith.constant 2 : index
    %c0_174 = arith.constant 0 : index
    %c0_175 = arith.constant 0 : index
    %c0_176 = arith.constant 0 : index
    %167 = vector.load %arg11[%c2_173, %c0_174, %c0_175, %c0_176] : memref<3x3x4x4xf32, #tpu.memory_space<vmem>>, vector<1x1x4x4xf32>
    %168 = vector.shape_cast %167 : vector<1x1x4x4xf32> to vector<4x4xf32>
    "tpu.trace_start"() <{level = 10 : i32, message = "hwc,cm->hwm"}> : () -> ()
    %cst_177 = arith.constant dense<0.000000e+00> : vector<8x16x4xf32>
    %169 = tpu.matmul %166, %168, %cst_177 {dimension_numbers = #tpu.dot_dimension_numbers<[2], [0], [0, 1], [1], [0, 0, 0, 1, 1, 1], [], []>} : vector<8x16x4xf32>, vector<4x4xf32>, vector<8x16x4xf32> -> vector<8x16x4xf32>
    "tpu.trace_stop"() : () -> ()
    %170 = arith.addf %165, %169 : vector<8x16x4xf32>
    %c2_178 = arith.constant 2 : index
    %c1_179 = arith.constant 1 : index
    %c0_180 = arith.constant 0 : index
    %171 = vector.load %arg15[%c2_178, %c1_179, %c0_180] : memref<10x18x4xf32, #tpu.memory_space<vmem>>, vector<8x16x4xf32>
    %c2_181 = arith.constant 2 : index
    %c1_182 = arith.constant 1 : index
    %c0_183 = arith.constant 0 : index
    %c0_184 = arith.constant 0 : index
    %172 = vector.load %arg11[%c2_181, %c1_182, %c0_183, %c0_184] : memref<3x3x4x4xf32, #tpu.memory_space<vmem>>, vector<1x1x4x4xf32>
    %173 = vector.shape_cast %172 : vector<1x1x4x4xf32> to vector<4x4xf32>
    "tpu.trace_start"() <{level = 10 : i32, message = "hwc,cm->hwm"}> : () -> ()
    %cst_185 = arith.constant dense<0.000000e+00> : vector<8x16x4xf32>
    %174 = tpu.matmul %171, %173, %cst_185 {dimension_numbers = #tpu.dot_dimension_numbers<[2], [0], [0, 1], [1], [0, 0, 0, 1, 1, 1], [], []>} : vector<8x16x4xf32>, vector<4x4xf32>, vector<8x16x4xf32> -> vector<8x16x4xf32>
    "tpu.trace_stop"() : () -> ()
    %175 = arith.addf %170, %174 : vector<8x16x4xf32>
    %c2_186 = arith.constant 2 : index
    %c2_187 = arith.constant 2 : index
    %c0_188 = arith.constant 0 : index
    %176 = vector.load %arg15[%c2_186, %c2_187, %c0_188] : memref<10x18x4xf32, #tpu.memory_space<vmem>>, vector<8x16x4xf32>
    %c2_189 = arith.constant 2 : index
    %c2_190 = arith.constant 2 : index
    %c0_191 = arith.constant 0 : index
    %c0_192 = arith.constant 0 : index
    %177 = vector.load %arg11[%c2_189, %c2_190, %c0_191, %c0_192] : memref<3x3x4x4xf32, #tpu.memory_space<vmem>>, vector<1x1x4x4xf32>
    %178 = vector.shape_cast %177 : vector<1x1x4x4xf32> to vector<4x4xf32>
    "tpu.trace_start"() <{level = 10 : i32, message = "hwc,cm->hwm"}> : () -> ()
    %cst_193 = arith.constant dense<0.000000e+00> : vector<8x16x4xf32>
    %179 = tpu.matmul %176, %178, %cst_193 {dimension_numbers = #tpu.dot_dimension_numbers<[2], [0], [0, 1], [1], [0, 0, 0, 1, 1, 1], [], []>} : vector<8x16x4xf32>, vector<4x4xf32>, vector<8x16x4xf32> -> vector<8x16x4xf32>
    "tpu.trace_stop"() : () -> ()
    %180 = arith.addf %175, %179 : vector<8x16x4xf32>
    %c0_194 = arith.constant 0 : index
    %c0_195 = arith.constant 0 : index
    %181 = vector.load %arg12[%c0_194, %c0_195] : memref<1x4xf32, #tpu.memory_space<vmem>>, vector<1x4xf32>
    %182 = vector.shape_cast %181 : vector<1x4xf32> to vector<1x1x4xf32>
    %183 = vector.broadcast %182 : vector<1x1x4xf32> to vector<8x16x4xf32>
    %184 = arith.mulf %180, %183 : vector<8x16x4xf32>
    %c0_196 = arith.constant 0 : index
    %c0_197 = arith.constant 0 : index
    %185 = vector.load %arg13[%c0_196, %c0_197] : memref<1x4xf32, #tpu.memory_space<vmem>>, vector<1x4xf32>
    %186 = vector.shape_cast %185 : vector<1x4xf32> to vector<1x1x4xf32>
    %187 = vector.broadcast %186 : vector<1x1x4xf32> to vector<8x16x4xf32>
    %188 = arith.addf %184, %187 : vector<8x16x4xf32>
    %cst_198 = arith.constant 0.000000e+00 : f32
    %189 = vector.broadcast %cst_198 : f32 to vector<8x16x4xf32>
    %190 = arith.maximumf %188, %189 : vector<8x16x4xf32>
    %191 = vector.shape_cast %190 : vector<8x16x4xf32> to vector<128x4xf32>
    %192 = tpu.transpose %191, [1, 0] : vector<128x4xf32> -> vector<4x128xf32>
    %c0_199 = arith.constant 0 : index
    %c0_200 = arith.constant 0 : index
    %c0_201 = arith.constant 0 : index
    %193 = vector.load %arg14[%c0_199, %c0_200, %c0_201] : memref<1x4x128xf32, #tpu.memory_space<vmem>>, vector<1x4x128xf32>
    %194 = vector.shape_cast %193 : vector<1x4x128xf32> to vector<4x128xf32>
    %195 = vector.shape_cast %192 : vector<4x128xf32> to vector<1x4x128xf32>
    tpu.vector_store %arg14[%c0_199, %c0_200, %c0_201], %195 {strides = array<i32>} : memref<1x4x128xf32, #tpu.memory_space<vmem>>, vector<1x4x128xf32>,
    return
  }
  func.func @transform_0(%arg0: i32, %arg1: i32) -> (i32, i32, i32, i32) {
    %c0_i32 = arith.constant 0 : i32
    %c0_i32_0 = arith.constant 0 : i32
    %c0_i32_1 = arith.constant 0 : i32
    %c0_i32_2 = arith.constant 0 : i32
    return %arg0, %c0_i32, %c0_i32_0, %c0_i32_1 : i32, i32, i32, i32
  }
  func.func @transform_1(%arg0: i32, %arg1: i32) -> (i32, i32, i32, i32) {
    %c0_i32 = arith.constant 0 : i32
    %c0_i32_0 = arith.constant 0 : i32
    %c0_i32_1 = arith.constant 0 : i32
    return %arg0, %arg1, %c0_i32, %c0_i32_0 : i32, i32, i32, i32
  }
  func.func @transform_2(%arg0: i32, %arg1: i32) -> (i32, i32, i32, i32) {
    %c1_i32 = arith.constant 1 : i32
    %0 = arith.addi %arg1, %c1_i32 : i32
    %c2_i32 = arith.constant 2 : i32
    %1 = arith.muli %0, %c2_i32 : i32
    %c0_i32 = arith.constant 0 : i32
    %c0_i32_0 = arith.constant 0 : i32
    %c0_i32_1 = arith.constant 0 : i32
    return %arg0, %1, %c0_i32, %c0_i32_0 : i32, i32, i32, i32
  }
  func.func @transform_3(%arg0: i32, %arg1: i32) -> (i32, i32) {
    %c0_i32 = arith.constant 0 : i32
    %c0_i32_0 = arith.constant 0 : i32
    %c0_i32_1 = arith.constant 0 : i32
    return %c0_i32, %c0_i32_0 : i32, i32
  }
  func.func @transform_4(%arg0: i32, %arg1: i32) -> (i32, i32) {
    %c0_i32 = arith.constant 0 : i32
    %c0_i32_0 = arith.constant 0 : i32
    %c0_i32_1 = arith.constant 0 : i32
    return %c0_i32, %c0_i32_0 : i32, i32
  }
  func.func @transform_5(%arg0: i32, %arg1: i32) -> (i32, i32, i32, i32) {
    %c0_i32 = arith.constant 0 : i32
    %c0_i32_0 = arith.constant 0 : i32
    %c0_i32_1 = arith.constant 0 : i32
    %c0_i32_2 = arith.constant 0 : i32
    %c0_i32_3 = arith.constant 0 : i32
    return %c0_i32, %c0_i32_0, %c0_i32_1, %c0_i32_2 : i32, i32, i32, i32
  }
  func.func @transform_6(%arg0: i32, %arg1: i32) -> (i32, i32, i32, i32) {
    %c0_i32 = arith.constant 0 : i32
    %c0_i32_0 = arith.constant 0 : i32
    %c0_i32_1 = arith.constant 0 : i32
    %c0_i32_2 = arith.constant 0 : i32
    %c0_i32_3 = arith.constant 0 : i32
    return %c0_i32, %c0_i32_0, %c0_i32_1, %c0_i32_2 : i32, i32, i32, i32
  }
  func.func @transform_7(%arg0: i32, %arg1: i32) -> (i32, i32) {
    %c0_i32 = arith.constant 0 : i32
    %c0_i32_0 = arith.constant 0 : i32
    %c0_i32_1 = arith.constant 0 : i32
    return %c0_i32, %c0_i32_0 : i32, i32
  }
  func.func @transform_8(%arg0: i32, %arg1: i32) -> (i32, i32) {
    %c0_i32 = arith.constant 0 : i32
    %c0_i32_0 = arith.constant 0 : i32
    %c0_i32_1 = arith.constant 0 : i32
    return %c0_i32, %c0_i32_0 : i32, i32
  }
  func.func @transform_9(%arg0: i32, %arg1: i32) -> (i32, i32, i32, i32) {
    %c0_i32 = arith.constant 0 : i32
    %c0_i32_0 = arith.constant 0 : i32
    %c0_i32_1 = arith.constant 0 : i32
    %c0_i32_2 = arith.constant 0 : i32
    %c0_i32_3 = arith.constant 0 : i32
    return %c0_i32, %c0_i32_0, %c0_i32_1, %c0_i32_2 : i32, i32, i32, i32
  }
  func.func @transform_10(%arg0: i32, %arg1: i32) -> (i32, i32) {
    %c0_i32 = arith.constant 0 : i32
    %c0_i32_0 = arith.constant 0 : i32
    %c0_i32_1 = arith.constant 0 : i32
    return %c0_i32, %c0_i32_0 : i32, i32
  }
  func.func @transform_11(%arg0: i32, %arg1: i32) -> (i32, i32) {
    %c0_i32 = arith.constant 0 : i32
    %c0_i32_0 = arith.constant 0 : i32
    %c0_i32_1 = arith.constant 0 : i32
    return %c0_i32, %c0_i32_0 : i32, i32
  }
  func.func @transform_12(%arg0: i32, %arg1: i32) -> (i32, i32, i32) {
    %c0_i32 = arith.constant 0 : i32
    %c0_i32_0 = arith.constant 0 : i32
    return %arg0, %c0_i32, %arg1 : i32, i32, i32
  }
}

</mosaic_0001>

<bundles_post_ra>
// kernel: tpu_custom_call.1
= control target key start
LH: loop header
LB: loop body
LE: loop exit
PB: predicated region body
PF: predicated region fallthrough
CT: control target
= control target key end

     0   :  { %s13707_s0 = inlined_call_operand.vmem [shape: f32[2,8,8,4], index: 0, kind: input, shape index: {}]   ;;  %s13708_s1 = inlined_call_operand.vmem [shape: f32[2,20,18,4], index: 1, kind: input, shape index: {}]   ;;  %s13709_s2 = inlined_call_operand.vmem [shape: f32[2,20,18,4], index: 2, kind: input, shape index: {}]   ;;  %s13710_s3 = inlined_call_operand.vmem [shape: f32[20,8], index: 3, kind: input, shape index: {}]   ;;  %s13711_s4 = inlined_call_operand.vmem [shape: f32[18,8], index: 4, kind: input, shape index: {}]   ;;  %s13712_s5 = inlined_call_operand.vmem [shape: f32[3,3,4,4], index: 5, kind: input, shape index: {}]   ;;  %s13713_s6 = inlined_call_operand.vmem [shape: f32[3,3,4,4], index: 6, kind: input, shape index: {}]   ;;  %s13714_s7 = inlined_call_operand.vmem [shape: f32[1,4], index: 7, kind: input, shape index: {}]   ;;  %s13715_s8 = inlined_call_operand.vmem [shape: f32[1,4], index: 8, kind: input, shape index: {}]   ;;  %s13716_s9 = inlined_call_operand.vmem [shape: f32[3,3,4,4], index: 9, kind: input, shape index: {}]   ;;  %s13717_s10 = inlined_call_operand.vmem [shape: f32[1,4], index: 10, kind: input, shape index: {}]   ;;  %s13718_s11 = inlined_call_operand.vmem [shape: f32[1,4], index: 11, kind: input, shape index: {}]   ;;  %s13719_s12 = inlined_call_operand.hbm [shape: f32[2,4,256], index: 12, kind: output, shape index: {}]  }
   0x1   :  { %13843 = sst [smem:[#allocation84_spill]] %s13707_s0 }
   0x2   :  { %13844 = sst [smem:[#allocation85_spill]] %s13708_s1 }
   0x3   :  { %13845 = sst [smem:[#allocation86_spill]] %s13709_s2 }
   0x4   :  { %13846 = sst [smem:[#allocation87_spill]] %s13710_s3 }
   0x5   :  { %17 = vsyncpa [#allocation4], 0 }
   0x6   :  { %19 = vsyncpa [#allocation4 + $0x1], 0  ;;  %s11293_s21 = smov 0   ;;  %s11295_s22 = smov 0  }
   0x7   :  { %s11297_s23 = smov 0   ;;  %s11299_s24 = smov 0  }
   0x8   :  { %s11301_s25 = smov 0   ;;  %s11303_s26 = smov 0  }
   0x9   :  { %s11305_s27 = smov 0   ;;  %s11307_s28 = smov 0  }
   0xa LB: > { %13847 = sst [smem:[#allocation6_spill]] %s11204_s27  ;;  %s8560_s29 = sadd.s32 4294967295, %s11208_s28   ;;  %s11208_s28 = sphi %s11307_s28, %s25_s28   ;;  %s11204_s27 = sphi %s11305_s27, %s14048_s27   ;;  %s11200_s26 = sphi %s11303_s26, %s14053_s26   ;;  %s11196_s25 = sphi %s11301_s25, %s14046_s25   ;;  %s11192_s24 = sphi %s11299_s24, %s14052_s24   ;;  %s11188_s23 = sphi %s11297_s23, %s14051_s23   ;;  %s11184_s22 = sphi %s11295_s22, %s14050_s22   ;;  %s11180_s21 = sphi %s11293_s21, %s14049_s21  }
   0xb   : > { %s8561_s30 = sadd.s32 4294967294, %s11208_s28   ;;  %s34_s13 = sadd.s32 1, %s11200_s26 }
   0xc   : > { %p35_p0 = scmp.ge.s32.totalorder %s34_s13, 2  ;;  %s37_s14 = sadd.s32 1, %s11204_s27 }
   0xd   : > { %p331_p1 = scmp.ne.s32.totalorder %s11188_s23, %s11184_s22  ;;  %p332_p2 = scmp.eq.s32.totalorder %s8560_s29, 3 }
   0xe   : > { %s14055_s13 = smov (%p35_p0, %s34_s13), 0  ;;  %s14057_s14 = smov (!%p35_p0, %s37_s14), %s11204_s27 }
   0xf   : > { %13848 = sst [smem:[#allocation7_spill]] %s14055_s13  ;;  %s317_s15 = ssub.s32 %s11200_s26, %s14055_s13 }
  0x10   : > { %p11344_p3 = por %p332_p2, %p331_p1  ;;  %p39_p4 = scmp.ge.s32.totalorder %s14057_s14, 2 }
  0x11   : > { %p337_p5 = scmp.ne.s32.totalorder %s11184_s22, %s11180_s21  ;;  %p338_p6 = scmp.eq.s32.totalorder %s8561_s30, 3 }
  0x12   : > { %p8566_p7 = scmp.ge.s32.totalorder %s11208_s28, 1  ;;  %s14059_s14 = smov (%p39_p4, %s14057_s14), 0 }
  0x13   : > { %13850 = sst [smem:[#allocation8_spill]] %s14059_s14  ;;  %p11353_p8 = por %p338_p6, %p337_p5 }
  0x14   : > { %p433_p9 = scmp.lt.s32.totalorder %s11208_s28, 5  ;;  %s316_s18 = ssub.s32 %s11204_s27, %s14059_s14 }
  0x15   : > { %s321_s19 = sadd.s32 1, %s11188_s23  ;;  %s318_s20 = sor.u32 %s317_s15, %s316_s18 }
  0x16   : > { %p434_p10 = pnand %p8566_p7, %p433_p9  ;;  %p319_p11 = scmp.eq.s32.totalorder %s318_s20, 0 }
  0x18   : > { %s11362_s29 = scalar_select %p319_p11, %s11188_s23, %s321_s19  }
  0x19   : > { %437 = sbr.rel (%p434_p10) target bundleno = 2536 (0x9e8), region = 68 }
  0x20   : > { %p502_p12 = scmp.lt.s32.totalorder %s11196_s25, 1  ;;  %v560_v0 = vlaneseq  ;;  %v11210_v1 = vmov 1983009808   ;;  %v11211_v5 = vmov 1934713408   ;;  %s13852_s0 = sld [smem:[#allocation84_spill]] }
  0x21   : > { %v558_v2 = vunpack.c.l.s4 %v11210_v1  ;;  %v622_v6 = vunpack.c.l.s4 %v11211_v5  ;;  %s13853_s3 = sld [smem:[#allocation87_spill]]  ;;  %vm721_vm0 = vcmask 64512   ;;  %v13735_v48 = vmov 0.0   ;;  %s13731_s27 = smov 20  }
  0x22   : > { %s11366_s30 = scalar_select %p502_p12, %s11196_s25, 1  ;;  %v561_v3 = vshrl.u32 %v560_v0, 7  ;;  %v733_v49 = vcombine.low %v13735_v48, %v13735_v48  ;;  %v734_v52 = vcombine.high %v13735_v48, %v13735_v48  ;;  %vm719_vm1 = vcmask 31744   ;;  %vm10536_vm7 = vmpackc.low %vm721_vm0, %vm721_vm0 }
  0x23   : > { %v559_v4 = vunpack.c.0.s8 %v558_v2  ;;  %v623_v8 = vunpack.c.0.s8 %v622_v6  ;;  %vm723_vm2 = vcmask 97280   ;;  %vm725_vm3 = vcmask 130048   ;;  %s13878_s1 = sld [smem:[#allocation85_spill]]  ;;  %s13895_s2 = sld [smem:[#allocation86_spill]] }
  0x24   : > { %s9156_s14 = sshll.u32 %s11366_s30, 6  ;;  %s11012_s13 = smul.u32 60, %s11366_s30  ;;  %vm727_vm4 = vcmask 162816   ;;  %vm729_vm5 = vcmask 195584   ;;  %vm731_vm6 = vcmask 228352   ;;  %vm2179_vm8 = vcmask 1043456  }
  0x25   : > { %v11372_v7 = vsub.s32 %v559_v4, %v561_v3  ;;  %v11376_v19 = vsub.s32 %v623_v8, %v561_v3  ;;  %vm3159_vm9 = vcmask 1045504   ;;  %vm2588_vm10 = vcmask 1046528  }
  0x26   : > { %s506_s19 = scalar_lea.vmem %s13852_s0, %s9156_s14  ;;  %s11399_s14 = sshll.u32 %s11192_s24, 3  ;;  %vm6253_vm11 = vcmask 24576  }
  0x27   : > { %v11102_v9 = vld [vmem:[%s506_s19] ss:$16 sps:$4 sm:$0xff]   ;;  %v11104_v10 = vld [vmem:[%s506_s19 + $0x4] ss:$16 sps:$4 sm:$0xff]   ;;  %v11105_v11 = vld [vmem:[%s506_s19 + $0x8] ss:$16 sps:$4 sm:$0xff]   ;;  %s11406_s18 = scalar_lea.vmem %s13853_s3, %s11399_s14  ;;  %v741_v53 = vrot.slane %v733_v49, %v11372_v7  ;;  %v748_v57 = vrot.slane %v734_v52, %v11372_v7 }
  0x28   : > { %v11107_v12 = vld [vmem:[%s506_s19 + $0xc] ss:$16 sps:$4 sm:$0xff]   ;;  %v563_v13 = vrot.slane %v11102_v9, %v11372_v7  ;;  %v11108_v14 = vld [vmem:[%s506_s19 + $0x20] ss:$16 sps:$4 sm:$0xff]   ;;  %v11110_v15 = vld [vmem:[%s506_s19 + $0x24] ss:$16 sps:$4 sm:$0xff]   ;;  %v579_v17 = vrot.slane %v11105_v11, %v11372_v7  ;;  %v570_v20 = vrot.slane %v11104_v10, %v11372_v7 }
  0x29   : > { %v11111_v16 = vld [vmem:[%s506_s19 + $0x28] ss:$16 sps:$4 sm:$0xff]   ;;  %v11113_v18 = vld [vmem:[%s506_s19 + $0x2c] ss:$16 sps:$4 sm:$0xff]   ;;  %v586_v21 = vrot.slane %v11107_v12, %v11372_v7  ;;  %v595_v22 = vrot.slane %v11108_v14, %v11372_v7  ;;  %v602_v24 = vrot.slane %v11110_v15, %v11372_v7  ;;  %s13722_s19 = smov 4   ;;  %s13724_s0 = smov 12   ;;  %v749_v54 = vcombine.low %v741_v53, %v741_v53 }
  0x2a   : > { %v611_v23 = vrot.slane %v11111_v16, %v11372_v7  ;;  %v619_v25 = vcombine.low %v563_v13, %v579_v17  ;;  %v620_v26 = vcombine.high %v563_v13, %v579_v17  ;;  %v618_v27 = vrot.slane %v11113_v18, %v11372_v7  ;;  %v553_v47 = vld [vmem:[%s11406_s18] sm:$0xff]  ;;  %p515_p13 = scmp.lt.s32.totalorder %s11399_s14, 19  ;;  %s9161_s20 = sadd.s32 8, %s11399_s14 }
  0x2b   : > { %v635_v28 = vcombine.low %v570_v20, %v586_v21  ;;  %v636_v34 = vcombine.high %v570_v20, %v586_v21  ;;  %9707 = vmatprep.mubr.msk.f32.mxu1 %vm721_vm0, %v553_v47  ;;  %p533_p0 = scmp.lt.s32.totalorder %s9161_s20, 19  ;;  %v750_v55 = vcombine.high %v741_v53, %v741_v53  ;;  %v11430_v58 = vrot.slane %v749_v54, %v11376_v19 }
  0x2c   : > { %v651_v29 = vcombine.low %v595_v22, %v611_v23  ;;  %v652_v30 = vcombine.high %v595_v22, %v611_v23  ;;  %v11385_v31 = vrot.slane %v619_v25, %v11376_v19  ;;  %v634_v32 = vrot.slane %v620_v26, %v11376_v19  ;;  %s516_s15 = scalar_select %p515_p13, %s11399_s14, 19 }
  0x2d   : > { %v667_v33 = vcombine.low %v602_v24, %v618_v27  ;;  %v643_v37 = vrot.slane %v635_v28, %v11376_v19  ;;  %v668_v38 = vcombine.high %v602_v24, %v618_v27  ;;  %v650_v43 = vrot.slane %v636_v34, %v11376_v19  ;;  %s14061_s20 = smov (!%p533_p0, %s9161_s20), 19  ;;  %v554_v28 = vld [vmem:[%s11406_s18 + $0x8] sm:$0xf]  ;;  %s11220_s18 = smov 120  }
  0x2e   : > { %v11389_v35 = vrot.slane %v651_v29, %v11376_v19  ;;  %v666_v36 = vrot.slane %v652_v30, %v11376_v19  ;;  %s11011_s3 = smul.u32 3, %s516_s15  ;;  %v764_v59 = vrot.slane %v750_v55, %v11376_v19  ;;  %v782_v60 = vcombine.high %v11430_v58, %v11430_v58 }
  0x2f   : > { %v675_v39 = vrot.slane %v667_v33, %v11376_v19  ;;  %v682_v46 = vrot.slane %v668_v38, %v11376_v19  ;;  %v765_v62 = vcombine.low %v748_v57, %v748_v57  ;;  %v789_v63 = vcombine.high %v11430_v58, %v13735_v48 }
  0x30   : > { %v684_v40 = vcombine.high %v11385_v31, %v11389_v35  ;;  %v683_v41 = vcombine.low %v11385_v31, %v11389_v35  ;;  %v686_v42 = vcombine.high %v634_v32, %v666_v36  ;;  %v685_v44 = vcombine.low %v634_v32, %v666_v36  ;;  %s11424_s30 = sadd.s32 %s11012_s13, %s11011_s3  ;;  %s11219_s3 = smov 28  }
  0x31   : > { %v687_v45 = vcombine.low %v643_v37, %v675_v39  ;;  %v688_v50 = vcombine.high %v643_v37, %v675_v39  ;;  %v689_v51 = vcombine.low %v650_v43, %v682_v46  ;;  %v690_v56 = vcombine.high %v650_v43, %v682_v46 }
  0x32   : > { %692 = vrot.lane.b32.xlu0 %v684_v40, %s13722_s19  ;;  %700 = vrot.lane.b32.xlu1 %v686_v42, %s13724_s0  ;;  %s13727_s19 = smov 8   ;;  %s13729_s0 = smov 16   ;;  %v783_v61 = vcombine.low %v764_v59, %v764_v59  ;;  %v784_v0 = vcombine.high %v764_v59, %v764_v59  ;;  %v773_v1 = vrot.slane %v765_v62, %v11376_v19 }
  0x33   : > { %v766_v3 = vcombine.high %v748_v57, %v748_v57  ;;  %v790_v4 = vcombine.high %v764_v59, %v13735_v48  ;;  %v781_v26 = vcombine.low %v11430_v58, %v11430_v58 }
  0x34   : > { %v785_v2 = vcombine.low %v773_v1, %v773_v1  ;;  %v786_v5 = vcombine.high %v773_v1, %v773_v1  ;;  %v791_v9 = vcombine.high %v773_v1, %v13735_v48 }
  0x35   : > { %v780_v6 = vrot.slane %v766_v3, %v11376_v19 }
  0x36   : > { %696 = vrot.lane.b32.xlu0 %v685_v44, %s13727_s19  ;;  %704 = vrot.lane.b32.xlu1 %v687_v45, %s13729_s0  ;;  %s13733_s19 = smov 24   ;;  %s11013_s0 = smul.u32 3, %s14061_s20 }
  0x37   : > { %s13855_s20 = smov 8   ;;  %v787_v8 = vcombine.low %v780_v6, %v780_v6  ;;  %v788_v10 = vcombine.high %v780_v6, %v780_v6  ;;  %v792_v11 = vcombine.high %v780_v6, %v13735_v48 }
  0x38   : > { %s11433_s15 = sadd.s32 %s11013_s0, %s11012_s13  ;;  %s13856_s0 = smov 12  }
  0x39   : > { %s13857_s13 = smov 16  }
  0x3a   : > { %708 = vrot.lane.b32.xlu0 %v688_v50, %s13731_s27  ;;  %712 = vrot.lane.b32.xlu1 %v689_v51, %s13733_s19  ;;  %s13854_s27 = smov 4   ;;  %s13858_s19 = smov 20  }
  0x3e   : > { %716 = vrot.lane.b32.xlu0 %v690_v56, %s11219_s3  ;;  %795 = vrot.lane.b32.xlu1 %v782_v60, %s13854_s27 }
  0x42   : > { %803 = vrot.lane.b32.xlu0 %v783_v61, %s13855_s20  ;;  %797 = vrot.lane.b32.xlu1 %v789_v63, %s13854_s27  ;;  %s13859_s27 = smov 24  }
  0x46   : > { %811 = vrot.lane.b32.xlu0 %v784_v0, %s13856_s0  ;;  %805 = vrot.lane.b32.xlu1 %v764_v59, %s13855_s20  ;;  %s11223_s20 = smov 116  }
  0x4a   : > { %819 = vrot.lane.b32.xlu0 %v785_v2, %s13857_s13  ;;  %813 = vrot.lane.b32.xlu1 %v790_v4, %s13856_s0  ;;  %s11224_s0 = smov 104  }
  0x4e   : > { %827 = vrot.lane.b32.xlu0 %v786_v5, %s13858_s19  ;;  %821 = vrot.lane.b32.xlu1 %v773_v1, %s13857_s13  ;;  %s11225_s13 = smov 108  }
  0x52   : > { %835 = vrot.lane.b32.xlu0 %v787_v8, %s13859_s27  ;;  %829 = vrot.lane.b32.xlu1 %v791_v9, %s13858_s19  ;;  %s11221_s19 = smov 124  }
  0x56   : > { %843 = vrot.lane.b32.xlu0 %v788_v10, %s11219_s3  ;;  %837 = vrot.lane.b32.xlu1 %v780_v6, %s13859_s27  ;;  %s11226_s27 = smov 100  }
  0x5a   : > { %845 = vrot.lane.b32.xlu0 %v792_v11, %s11219_s3  ;;  %s11222_s3 = smov 112  }
  0xa4   : > { %v693_v12 = vpop.permute.xlu0 %692  ;;  %v701_v13 = vpop.permute.xlu1 %700 }
  0xa5   : > { %v720_v14 = vsel %vm719_vm1, %v683_v41, %v693_v12 }
  0xa8   : > { %v697_v15 = vpop.permute.xlu0 %696  ;;  %v705_v16 = vpop.permute.xlu1 %704 }
  0xa9   : > { %v722_v17 = vsel %vm721_vm0, %v720_v14, %v697_v15 }
  0xaa   : > { %v724_v18 = vsel %vm723_vm2, %v722_v17, %v701_v13 }
  0xab   : > { %v726_v20 = vsel %vm725_vm3, %v724_v18, %v705_v16 }
  0xac   : > { %v709_v21 = vpop.permute.xlu0 %708  ;;  %v713_v23 = vpop.permute.xlu1 %712 }
  0xad   : > { %v728_v22 = vsel %vm727_vm4, %v726_v20, %v709_v21 }
  0xae   : > { %v730_v24 = vsel %vm729_vm5, %v728_v22, %v713_v23 }
  0xb0   : > { %v717_v25 = vpop.permute.xlu0 %716  ;;  %v796_v29 = vpop.permute.xlu1 %795 }
  0xb1   : > { %v732_v27 = vsel %vm731_vm6, %v730_v24, %v717_v25  ;;  %v849_v30 = vsel %vm719_vm1, %v781_v26, %v796_v29 }
  0xb2   : > { %9705 = vmatprep.subr.mxu1 %v732_v27 }
  0xb3   : > { %9706 = vmatpush3.msra.mxu1 %v732_v27 }
  0xb4   : > { %9708 = vmatmul.mubr.msk.f32.vlgmr.msra.gmra.mrb[0].mxu1 %vm721_vm0, %v554_v28  ;;  %v804_v31 = vpop.permute.xlu0 %803  ;;  %v798_v32 = vpop.permute.xlu1 %797 }
  0xb5   : > { %v851_v33 = vsel %vm721_vm0, %v849_v30, %v804_v31  ;;  %v850_v35 = vsel %vm719_vm1, %v11430_v58, %v798_v32 }
  0xb8   : > { %v812_v34 = vpop.permute.xlu0 %811  ;;  %v806_v36 = vpop.permute.xlu1 %805 }
  0xb9   : > { %v853_v37 = vsel %vm723_vm2, %v851_v33, %v812_v34  ;;  %v852_v38 = vsel %vm721_vm0, %v850_v35, %v806_v36 }
  0xbc   : > { %v820_v39 = vpop.permute.xlu0 %819  ;;  %v814_v41 = vpop.permute.xlu1 %813 }
  0xbd   : > { %v855_v40 = vsel %vm725_vm3, %v853_v37, %v820_v39  ;;  %v854_v42 = vsel %vm723_vm2, %v852_v38, %v814_v41 }
  0xc0   : > { %v828_v43 = vpop.permute.xlu0 %827  ;;  %v822_v45 = vpop.permute.xlu1 %821 }
  0xc1   : > { %v857_v44 = vsel %vm727_vm4, %v855_v40, %v828_v43  ;;  %v856_v46 = vsel %vm725_vm3, %v854_v42, %v822_v45  ;;  %v988_v42 = vld [vmem:[%s13711_s4] sm:$0xff]  ;;  %v989_v43 = vld [vmem:[%s13711_s4 + $0x8] sm:$0xff]  ;;  %v990_v45 = vld [vmem:[%s13711_s4 + $0x10] sm:$0x3] }
  0xc4   : > { %v836_v47 = vpop.permute.xlu0 %835  ;;  %v830_v50 = vpop.permute.xlu1 %829 }
  0xc5   : > { %v859_v49 = vsel %vm729_vm5, %v857_v44, %v836_v47  ;;  %v858_v51 = vsel %vm727_vm4, %v856_v46, %v830_v50  ;;  %v10535_v44 = vpack.c.bf16 %v989_v43, %v988_v42  ;;  %v2117_v42 = vld [vmem:[%s13712_s5] sm:$0xf] }
  0xc7   : > { %10537 = vmatprep.subr.msk.bf16.mxu1 %vm10536_vm7, %v10535_v44 }
  0xc8   : > { %v838_v52 = vpop.permute.xlu1 %837  ;;  %v844_v54 = vpop.permute.xlu0 %843  ;;  %10540 = vmatpush3.bf16.xpose.msk.msra.mxu1 %vm10536_vm7, %v10535_v44 }
  0xc9   : > { %v860_v53 = vsel %vm729_vm5, %v858_v51, %v838_v52  ;;  %v861_v59 = vsel %vm731_vm6, %v859_v49, %v844_v54  ;;  %9714 = vmatprep.subr.msk.mxu1 %vm721_vm0, %v990_v45 }
  0xcc   : > { %v846_v55 = vpop.permute.xlu0 %845 }
  0xcd   : > { %v862_v56 = vsel %vm731_vm6, %v860_v53, %v846_v55 }
  0xd0   : > { %9715 = vmatpush3.xpose.msk.msra.mxu1 %vm721_vm0, %v990_v45 }
 0x187   : > { %v9709_v57 = vpop.f32.mrb[0].mxu1 }
 0x188   : > { %v941_v58 = vadd.f32 %v9709_v57, %v862_v56  ;;  %v935_v60 = vpop.f32.mrb[1].mxu1 }
 0x189   : > { %v936_v61 = vadd.f32 %v935_v60, %v861_v59 }
 0x18a   : > { %954 = vrot.lane.b32.xlu1 %v941_v58, %s11220_s18  ;;  %948 = vrot.lane.b32.xlu0 %v941_v58, %s11221_s19 }
 0x18e   : > { %966 = vrot.lane.b32.xlu1 %v941_v58, %s11222_s3  ;;  %960 = vrot.lane.b32.xlu0 %v941_v58, %s11223_s20 }
 0x192   : > { %978 = vrot.lane.b32.xlu1 %v941_v58, %s11224_s0  ;;  %972 = vrot.lane.b32.xlu0 %v941_v58, %s11225_s13 }
 0x196   : > { %952 = vrot.lane.b32.xlu0 %v936_v61, %s11220_s18  ;;  %946 = vrot.lane.b32.xlu1 %v936_v61, %s11221_s19 }
 0x19a   : > { %964 = vrot.lane.b32.xlu0 %v936_v61, %s11222_s3  ;;  %958 = vrot.lane.b32.xlu1 %v936_v61, %s11223_s20 }
 0x19e   : > { %976 = vrot.lane.b32.xlu0 %v936_v61, %s11224_s0  ;;  %970 = vrot.lane.b32.xlu1 %v936_v61, %s11225_s13  ;;  %s8571_s0 = sshll.u32 %s11424_s30, 3 }
 0x19f   : > { %s11749_s18 = scalar_lea.vmem %s13878_s1, %s8571_s0  ;;  %s8574_s0 = sshll.u32 %s11433_s15, 3 }
 0x1a0   : > { %s11893_s15 = scalar_lea.vmem %s13895_s2, %s8574_s0 }
 0x1a2   : > { %984 = vrot.lane.b32.xlu0 %v941_v58, %s11226_s27  ;;  %982 = vrot.lane.b32.xlu1 %v936_v61, %s11226_s27  ;;  %s8983_s27 = sadd.s32 4294967295, %s11399_s14  ;;  %s9148_s14 = sshll.u32 %s11196_s25, 1 }
 0x1a3   : > { %s8440_s20 = sadd.s32 %s11192_s24, %s9148_s14  ;;  %s11227_s24 = smov [#allocation3]  }
 0x1a4   : > { %s9149_s13 = sshll.u32 %s8440_s20, 6  ;;  %s11118_s25 = sshll.u32 %s11227_s24, 4  ;;  %s11119_s25 = int_to_ptr.vmem [resolvable:$false] %s11118_s25 }
 0x1a5   : > { %s13656_s19 = scalar_lea.hbm %s13719_s12, %s9149_s13 }
 0x1cb   : > { %991 = vxpose.xlu1.b32.start [1/2] (short) (narrow) %v936_v61, 8 }
 0x1cf   : > { %992 = vxpose.xlu1.b32.end [2/2] (short) (narrow) %v941_v58, 8 }
 0x1fc   : > { %v955_v62 = vpop.permute.xlu1 %954  ;;  %v949_v63 = vpop.permute.xlu0 %948 }
 0x200   : > { %v967_v0 = vpop.permute.xlu1 %966  ;;  %v961_v1 = vpop.permute.xlu0 %960 }
 0x204   : > { %v979_v2 = vpop.permute.xlu1 %978  ;;  %v973_v3 = vpop.permute.xlu0 %972 }
 0x208   : > { %v947_v4 = vpop.permute.xlu1 %946  ;;  %v953_v6 = vpop.permute.xlu0 %952 }
 0x209   : > { %1023 = vxpose.xlu0.b32.start [1/2] (short) (narrow) %v947_v4, 8 }
 0x20c   : > { %v959_v5 = vpop.permute.xlu1 %958  ;;  %v965_v8 = vpop.permute.xlu0 %964 }
 0x20d   : > { %1024 = vxpose.xlu0.b32.end [2/2] (short) (narrow) %v949_v63, 8  ;;  %1087 = vxpose.xlu1.b32.start [1/2] (short) (narrow) %v959_v5, 8 }
 0x210   : > { %v971_v9 = vpop.permute.xlu1 %970  ;;  %v977_v10 = vpop.permute.xlu0 %976 }
 0x211   : > { %1055 = vxpose.xlu0.b32.start [1/2] (short) (narrow) %v953_v6, 8  ;;  %1088 = vxpose.xlu1.b32.end [2/2] (short) (narrow) %v961_v1, 8 }
 0x214   : > { %v983_v11 = vpop.permute.xlu1 %982  ;;  %v985_v12 = vpop.permute.xlu0 %984 }
 0x215   : > { %1056 = vxpose.xlu0.b32.end [2/2] (short) (narrow) %v955_v62, 8  ;;  %1151 = vxpose.xlu1.b32.start [1/2] (short) (narrow) %v971_v9, 8 }
 0x219   : > { %1119 = vxpose.xlu0.b32.start [1/2] (short) (narrow) %v965_v8, 8  ;;  %1152 = vxpose.xlu1.b32.end [2/2] (short) (narrow) %v973_v3, 8 }
 0x21d   : > { %1120 = vxpose.xlu0.b32.end [2/2] (short) (narrow) %v967_v0, 8  ;;  %1215 = vxpose.xlu1.b32.start [1/2] (short) (narrow) %v983_v11, 8 }
 0x221   : > { %1183 = vxpose.xlu0.b32.start [1/2] (short) (narrow) %v977_v10, 8  ;;  %1216 = vxpose.xlu1.b32.end [2/2] (short) (narrow) %v985_v12, 8 }
 0x225   : > { %1184 = vxpose.xlu0.b32.end [2/2] (short) (narrow) %v979_v2, 8 }
 0x24b   : > { %v1007_v13 = vpop.trf.xlu1 }
 0x289   : > { %v1039_v14 = vpop.trf.xlu0 }
 0x28d   : > { %v1103_v15 = vpop.trf.xlu1 }
 0x28e   : > { %v1255_v21 = vcombine.low %v1039_v14, %v1103_v15 }
 0x290   : > { %v1262_v24 = vrot.slane %v1255_v21, %v11372_v7 }
 0x291   : > { %v1071_v16 = vpop.trf.xlu0 }
 0x292   : > { %v1247_v20 = vcombine.low %v1007_v13, %v1071_v16 }
 0x294   : > { %v1254_v23 = vrot.slane %v1247_v20, %v11372_v7 }
 0x295   : > { %v1167_v17 = vpop.trf.xlu1 }
 0x296   : > { %v1279_v28 = vcombine.low %v1254_v23, %v1262_v24  ;;  %v1280_v29 = vcombine.high %v1254_v23, %v1262_v24 }
 0x298   : > { %v1294_v34 = vrot.slane %v1280_v29, %v11376_v19  ;;  %v1287_v36 = vrot.slane %v1279_v28, %v11376_v19 }
 0x299   : > { %v1135_v18 = vpop.trf.xlu0 }
 0x29d   : > { %v1231_v22 = vpop.trf.xlu1 }
 0x29e   : > { %v1271_v25 = vcombine.low %v1167_v17, %v1231_v22 }
 0x2a0   : > { %v1278_v30 = vrot.slane %v1271_v25, %v11372_v7 }
 0x2a1   : > { %v1199_v26 = vpop.trf.xlu0 }
 0x2a2   : > { %v1263_v27 = vcombine.low %v1135_v18, %v1199_v26 }
 0x2a4   : > { %v1270_v31 = vrot.slane %v1263_v27, %v11372_v7 }
 0x2a6   : > { %v1295_v32 = vcombine.low %v1270_v31, %v1278_v30  ;;  %v1296_v33 = vcombine.high %v1270_v31, %v1278_v30  ;;  %v2118_v30 = vld [vmem:[%s13713_s6] sm:$0xf] }
 0x2a7   : > { %9725 = vmatprep.subr.msk.mxu1 %vm2179_vm8, %v2118_v30 }
 0x2a8   : > { %v1310_v35 = vrot.slane %v1296_v33, %v11376_v19  ;;  %v1303_v37 = vrot.slane %v1295_v32, %v11376_v19 }
 0x2aa   : > { %v1313_v38 = vcombine.low %v1294_v34, %v1310_v35  ;;  %v1311_v39 = vcombine.low %v1287_v36, %v1303_v37  ;;  %v1312_v40 = vcombine.high %v1287_v36, %v1303_v37  ;;  %v1314_v41 = vcombine.high %v1294_v34, %v1310_v35  ;;  %v11538_v36 = vld [vmem:[%s13713_s6 + $0x8] sm:$0xf] }
 0x2ab   : > { %9885 = vmatprep.subr.msk.mxu0 %vm2179_vm8, %v11538_v36 }
 0x2ac   : > { %1379 = vxpose.xlu1.b32.start.end [1/1] (short) (narrow) %v1313_v38, 16  ;;  %1315 = vxpose.xlu0.b32.start.end [1/1] (short) (narrow) %v1311_v39, 16  ;;  %v8717_v38 = vld [vmem:[%s13712_s5 + $0xc] sm:$0xf] }
 0x2ad   : > { %9886 = vmatpush3.msk.msra.mxu0 %vm2179_vm8, %v11538_v36 }
 0x2ae   : > { %9917 = vmatprep.subr.msk.mxu0 %vm2179_vm8, %v8717_v38 }
 0x2b1   : > { %1347 = vxpose.xlu0.b32.start.end [1/1] (short) (narrow) %v1312_v40, 16 }
 0x2b6   : > { %1411 = vxpose.xlu0.b32.start.end [1/1] (short) (narrow) %v1314_v41, 16 }
 0x32c   : > { %v1331_v46 = vpop.trf.xlu0  ;;  %v1395_v50 = vpop.trf.xlu1 }
 0x32d   : > { %v1443_v52 = vcombine.low %v1331_v46, %v1395_v50  ;;  %v1444_v53 = vcombine.high %v1331_v46, %v1395_v50  ;;  %v11558_v46 = vld [vmem:[%s13712_s5 + $0x4] sm:$0xf] }
 0x32f   : > { %v1451_v58 = vrot.slane %v1443_v52, %v11372_v7  ;;  %v1458_v59 = vrot.slane %v1444_v53, %v11372_v7 }
 0x330   : > { %v1332_v47 = vpop.trf.xlu0  ;;  %v1396_v55 = vpop.trf.xlu1 }
 0x331   : > { %v1511_v62 = vcombine.low %v1332_v47, %v1396_v55 }
 0x333   : > { %v1518_v9 = vrot.slane %v1511_v62, %v11372_v7 }
 0x334   : > { %v1363_v49 = vpop.trf.xlu0 }
 0x338   : > { %v1364_v51 = vpop.trf.xlu0 }
 0x33c   : > { %v1427_v54 = vpop.trf.xlu0 }
 0x33d   : > { %v1459_v56 = vcombine.low %v1363_v49, %v1427_v54  ;;  %v1460_v57 = vcombine.high %v1363_v49, %v1427_v54 }
 0x33f   : > { %v1467_v60 = vrot.slane %v1459_v56, %v11372_v7  ;;  %v1474_v61 = vrot.slane %v1460_v57, %v11372_v7 }
 0x340   : > { %v1428_v63 = vpop.trf.xlu0 }
 0x341   : > { %v1475_v0 = vcombine.low %v1451_v58, %v1467_v60  ;;  %v1476_v1 = vcombine.high %v1451_v58, %v1467_v60  ;;  %v1491_v2 = vcombine.low %v1458_v59, %v1474_v61  ;;  %v1492_v3 = vcombine.high %v1458_v59, %v1474_v61 }
 0x342   : > { %v1519_v4 = vcombine.low %v1364_v51, %v1428_v63 }
 0x343   : > { %v1483_v5 = vrot.slane %v1475_v0, %v11376_v19  ;;  %v1490_v6 = vrot.slane %v1476_v1, %v11376_v19  ;;  %v1499_v8 = vrot.slane %v1491_v2, %v11376_v19  ;;  %v1506_v10 = vrot.slane %v1492_v3, %v11376_v19  ;;  %v11593_v2 = vld [vmem:[%s13713_s6 + $0xc] sm:$0xf] }
 0x344   : > { %v1526_v11 = vrot.slane %v1519_v4, %v11372_v7 }
 0x345   : > { %v1508_v12 = vcombine.high %v1490_v6, %v13735_v48  ;;  %v1507_v13 = vcombine.high %v1483_v5, %v13735_v48  ;;  %v1509_v14 = vcombine.high %v1499_v8, %v13735_v48  ;;  %v1510_v22 = vcombine.high %v1506_v10, %v13735_v48 }
 0x346   : > { %v1527_v15 = vcombine.low %v1518_v9, %v1526_v11  ;;  %v1528_v16 = vcombine.high %v1518_v9, %v1526_v11 }
 0x347   : > { %v1558_v17 = vcombine.low %v1490_v6, %v1508_v12  ;;  %v1557_v18 = vcombine.low %v1483_v5, %v1507_v13  ;;  %v1559_v23 = vcombine.low %v1499_v8, %v1509_v14  ;;  %v1560_v25 = vcombine.low %v1506_v10, %v1510_v22 }
 0x348   : > { %v1535_v20 = vrot.slane %v1527_v15, %v11376_v19  ;;  %v1542_v21 = vrot.slane %v1528_v16, %v11376_v19 }
 0x349   : > { %9716 = vmatprep.mubr.msk.f32.mxu1 %vm721_vm0, %v1557_v18 }
 0x34a   : > { %v1543_v7 = vcombine.high %v1535_v20, %v13735_v48  ;;  %9717 = vmatmul.mubr.msk.f32.vlgmr.msra.gmra.mrb[2].mxu1 %vm721_vm0, %v1558_v17  ;;  %v1544_v24 = vcombine.high %v1542_v21, %v13735_v48  ;;  %v11907_v48 = vld [vmem:[%s11893_s15] sm:$0xff] }
 0x34b   : > { %9719 = vmatprep.mubr.msk.f32.mxu1 %vm721_vm0, %v1559_v23  ;;  %9726 = vmatpush3.msk.msra.mxu1 %vm2179_vm8, %v2118_v30  ;;  %13897 = vst [vmem:[#allocation44_spill] sm:$0xff] %v11907_v48 }
 0x34c   : > { %v1561_v26 = vcombine.low %v1535_v20, %v1543_v7  ;;  %v1562_v19 = vcombine.low %v1542_v21, %v1544_v24  ;;  %9757 = vmatprep.subr.msk.mxu1 %vm2179_vm8, %v2117_v42 }
 0x34e   : > { %9720 = vmatmul.mubr.msk.f32.gmra.mrb[4].mxu1 %vm721_vm0, %v1560_v25 }
 0x34f   : > { %9722 = vmatprep.mubr.msk.f32.mxu1 %vm721_vm0, %v1561_v26 }
 0x352   : > { %9723 = vmatmul.mubr.msk.f32.gmra.mrb[6].mxu1 %vm721_vm0, %v1562_v19 }
 0x41d   : > { %v9718_v27 = vpop.f32.mrb[2].mxu1 }
 0x41e   : > { %v1650_v28 = vpop.f32.mrb[3].mxu1  ;;  %v1686_v35 = vcombine.high %v9718_v27, %v9718_v27 }
 0x41f   : > { %1697 = vxpose.xlu1.b32.start.end [1/1] (short) (narrow) %v1650_v28, 24  ;;  %v1685_v29 = vcombine.high %v1650_v28, %v1650_v28 }
 0x421   : > { %1729 = vxpose.xlu0.b32.start.end [1/1] (short) (narrow) %v1685_v29, 24  ;;  %v9721_v31 = vpop.f32.mrb[4].mxu1 }
 0x422   : > { %v1660_v32 = vpop.f32.mrb[5].mxu1  ;;  %v1688_v39 = vcombine.high %v9721_v31, %v9721_v31 }
 0x423   : > { %v1687_v37 = vcombine.high %v1660_v32, %v1660_v32 }
 0x425   : > { %v9724_v33 = vpop.f32.mrb[6].mxu1 }
 0x426   : > { %v1670_v34 = vpop.f32.mrb[7].mxu1  ;;  %v1690_v41 = vcombine.high %v9724_v33, %v9724_v33 }
 0x427   : > { %v1689_v40 = vcombine.high %v1670_v34, %v1670_v34 }
 0x428   : > { %1761 = vxpose.xlu1.b32.start.end [1/1] (short) (narrow) %v9718_v27, 24 }
 0x42a   : > { %1793 = vxpose.xlu0.b32.start.end [1/1] (short) (narrow) %v1686_v35, 24 }
 0x431   : > { %1825 = vxpose.xlu1.b32.start.end [1/1] (short) (narrow) %v1660_v32, 24 }
 0x433   : > { %1857 = vxpose.xlu0.b32.start.end [1/1] (short) (narrow) %v1687_v37, 24 }
 0x43a   : > { %1889 = vxpose.xlu1.b32.start.end [1/1] (short) (narrow) %v9721_v31, 24 }
 0x43c   : > { %1921 = vxpose.xlu0.b32.start.end [1/1] (short) (narrow) %v1688_v39, 24 }
 0x443   : > { %1953 = vxpose.xlu1.b32.start.end [1/1] (short) (narrow) %v1670_v34, 24 }
 0x445   : > { %1985 = vxpose.xlu0.b32.start.end [1/1] (short) (narrow) %v1689_v40, 24 }
 0x44c   : > { %2017 = vxpose.xlu1.b32.start.end [1/1] (short) (narrow) %v9724_v33, 24 }
 0x44e   : > { %2049 = vxpose.xlu0.b32.start.end [1/1] (short) (narrow) %v1690_v41, 24 }
 0x49f   : > { %v1713_v43 = vpop.trf.xlu1 }
 0x4a0   : > { %9727 = vmatprep.mubr.msk.f32.mxu1 %vm719_vm1, %v1713_v43  ;;  %v3440_v47 = vrot.slane %v1713_v43, 2  ;;  %v2879_v51 = vrot.slane %v1713_v43, 1 }
 0x4a1   : > { %v11553_v44 = vpop.trf.xlu0 }
 0x4a2   : > { %v3445_v52 = vrot.slane %v11553_v44, 2 }
 0x4a3   : > { %v1714_v45 = vpop.trf.xlu1 }
 0x4a4   : > { %v2880_v49 = vrot.slane %v1714_v45, 1  ;;  %v3441_v50 = vrot.slane %v1714_v45, 2  ;;  %9728 = vmatmul.mubr.msk.f32.vlgmr.msra.gmra.mrb[8].mxu1 %vm719_vm1, %v1714_v45 }
 0x4a5   : > { %v11562_v53 = vpop.trf.xlu0  ;;  %9730 = vmatprep.mubr.msk.f32.mxu1 %vm719_vm1, %v11553_v44  ;;  %9758 = vmatpush3.msk.msra.mxu1 %vm2179_vm8, %v2117_v42 }
 0x4a6   : > { %v3442_v54 = vsel %vm3159_vm9, %v3440_v47, %v3441_v50  ;;  %v3446_v55 = vrot.slane %v11562_v53, 2  ;;  %9789 = vmatprep.subr.msk.mxu1 %vm2179_vm8, %v11558_v46  ;;  %v11573_v57 = vsel %vm2588_vm10, %v2879_v51, %v2880_v49 }
 0x4a7   : > { %9887 = vmatprep.mubr.msk.f32.mxu0 %vm719_vm1, %v3442_v54  ;;  %v1715_v56 = vpop.trf.xlu1 }
 0x4a8   : > { %v2882_v58 = vrot.slane %v1715_v56, 1  ;;  %v3443_v59 = vrot.slane %v1715_v56, 2  ;;  %9731 = vmatmul.mubr.msk.f32.gmra.mrb[10].mxu1 %vm719_vm1, %v11562_v53  ;;  %v11580_v61 = vsel %vm3159_vm9, %v3445_v52, %v3446_v55 }
 0x4a9   : > { %v11577_v60 = vpop.trf.xlu0  ;;  %13860 = vst [vmem:[#allocation9_spill] sm:$0xff] %v11580_v61 }
 0x4aa   : > { %v11583_v62 = vsel %vm2588_vm10, %v2880_v49, %v2882_v58  ;;  %v3444_v63 = vsel %vm3159_vm9, %v3441_v50, %v3443_v59  ;;  %v3448_v0 = vrot.slane %v11577_v60, 2 }
 0x4ab   : > { %9888 = vmatmul.mubr.msk.f32.vlgmr.msra.gmra.mrb[0].mxu0 %vm719_vm1, %v3444_v63  ;;  %v11588_v1 = vpop.trf.xlu1 }
 0x4ac   : > { %9733 = vmatprep.mubr.msk.f32.mxu1 %vm719_vm1, %v11588_v1  ;;  %9890 = vmatprep.mubr.msk.f32.mxu0 %vm719_vm1, %v11580_v61  ;;  %v11600_v3 = vsel %vm3159_vm9, %v3446_v55, %v3448_v0  ;;  %v3450_v6 = vrot.slane %v11588_v1, 2 }
 0x4ad   : > { %13861 = vst [vmem:[#allocation10_spill] sm:$0xff] %v11600_v3  ;;  %v11602_v4 = vpop.trf.xlu0  ;;  %9918 = vmatpush3.msk.msra.mxu0 %vm2179_vm8, %v8717_v38 }
 0x4ae   : > { %9949 = vmatprep.subr.msk.mxu0 %vm2179_vm8, %v11593_v2  ;;  %v3455_v10 = vrot.slane %v11602_v4, 2 }
 0x4af   : > { %v11607_v5 = vpop.trf.xlu1  ;;  %9891 = vmatmul.mubr.msk.f32.gmra.mrb[2].mxu0 %vm719_vm1, %v11600_v3 }
 0x4b0   : > { %9734 = vmatmul.mubr.msk.f32.gmra.mrb[12].mxu1 %vm719_vm1, %v11607_v5  ;;  %v3451_v8 = vrot.slane %v11607_v5, 2 }
 0x4b1   : > { %v11615_v9 = vpop.trf.xlu0  ;;  %9736 = vmatprep.mubr.msk.f32.mxu1 %vm719_vm1, %v11602_v4 }
 0x4b2   : > { %v11621_v11 = vsel %vm3159_vm9, %v3450_v6, %v3451_v8  ;;  %v3456_v12 = vrot.slane %v11615_v9, 2 }
 0x4b3   : > { %13862 = vst [vmem:[#allocation11_spill] sm:$0xff] %v11621_v11  ;;  %v11624_v13 = vpop.trf.xlu1  ;;  %9893 = vmatprep.mubr.msk.f32.mxu0 %vm719_vm1, %v11621_v11 }
 0x4b4   : > { %v3453_v14 = vrot.slane %v11624_v13, 2  ;;  %9737 = vmatmul.mubr.msk.f32.gmra.mrb[14].mxu1 %vm719_vm1, %v11615_v9  ;;  %v11634_v16 = vsel %vm3159_vm9, %v3455_v10, %v3456_v12  ;;  %v11767_v10 = vld [vmem:[%s11749_s18] sm:$0xff] }
 0x4b5   : > { %v11631_v15 = vpop.trf.xlu0  ;;  %13863 = vst [vmem:[#allocation12_spill] sm:$0xff] %v11634_v16 }
 0x4b6   : > { %v11637_v17 = vsel %vm3159_vm9, %v3451_v8, %v3453_v14  ;;  %v3458_v18 = vrot.slane %v11631_v15, 2 }
 0x4b7   : > { %13864 = vst [vmem:[#allocation13_spill] sm:$0xff] %v11637_v17  ;;  %v11640_v20 = vpop.trf.xlu1  ;;  %9894 = vmatmul.mubr.msk.f32.gmra.mrb[4].mxu0 %vm719_vm1, %v11637_v17  ;;  %v11956_v17 = vld [vmem:[%s11893_s15 + $0x38] sm:$0xff] }
 0x4b8   : > { %9739 = vmatprep.mubr.msk.f32.mxu1 %vm719_vm1, %v11640_v20  ;;  %9896 = vmatprep.mubr.msk.f32.mxu0 %vm719_vm1, %v11634_v16  ;;  %v11649_v21 = vsel %vm3159_vm9, %v3456_v12, %v3458_v18  ;;  %v3460_v7 = vrot.slane %v11640_v20, 2  ;;  %v11779_v18 = vld [vmem:[%s11749_s18 + $0x8] sm:$0xff] }
 0x4b9   : > { %13865 = vst [vmem:[#allocation14_spill] sm:$0xff] %v11649_v21  ;;  %v11651_v22 = vpop.trf.xlu0  ;;  %v11947_v16 = vld [vmem:[%s11749_s18 + $0x28] sm:$0x3] }
 0x4ba   : > { %v3465_v26 = vrot.slane %v11651_v22, 2 }
 0x4bb   : > { %v11653_v23 = vpop.trf.xlu1  ;;  %9897 = vmatmul.mubr.msk.f32.gmra.mrb[6].mxu0 %vm719_vm1, %v11649_v21 }
 0x4bc   : > { %9740 = vmatmul.mubr.msk.f32.gmra.mrb[16].mxu1 %vm719_vm1, %v11653_v23  ;;  %v3461_v24 = vrot.slane %v11653_v23, 2 }
 0x4bd   : > { %v11661_v25 = vpop.trf.xlu0  ;;  %9742 = vmatprep.mubr.msk.f32.mxu1 %vm719_vm1, %v11651_v22 }
 0x4be   : > { %v11667_v19 = vsel %vm3159_vm9, %v3460_v7, %v3461_v24  ;;  %v3466_v27 = vrot.slane %v11661_v25, 2  ;;  %v11782_v7 = vld [vmem:[%s11749_s18 + $0x18] sm:$0xff] }
 0x4bf   : > { %13866 = vst [vmem:[#allocation15_spill] sm:$0xff] %v11667_v19  ;;  %v11670_v28 = vpop.trf.xlu1  ;;  %9899 = vmatprep.mubr.msk.f32.mxu0 %vm719_vm1, %v11667_v19  ;;  %13881 = vst [vmem:[#allocation29_spill] sm:$0xff] %v11782_v7 }
 0x4c0   : > { %v3463_v29 = vrot.slane %v11670_v28, 2  ;;  %9743 = vmatmul.mubr.msk.f32.gmra.mrb[18].mxu1 %vm719_vm1, %v11661_v25  ;;  %v11680_v31 = vsel %vm3159_vm9, %v3465_v26, %v3466_v27  ;;  %v11792_v26 = vld [vmem:[%s13713_s6 + $0x4] sm:$0xf] }
 0x4c1   : > { %v11677_v30 = vpop.trf.xlu0  ;;  %13867 = vst [vmem:[#allocation16_spill] sm:$0xff] %v11680_v31 }
 0x4c2   : > { %v11683_v32 = vsel %vm3159_vm9, %v3461_v24, %v3463_v29  ;;  %v3468_v33 = vrot.slane %v11677_v30, 2  ;;  %v11806_v29 = vld [vmem:[%s11749_s18 + $0x30] sm:$0xff] }
 0x4c3   : > { %13868 = vst [vmem:[#allocation17_spill] sm:$0xff] %v11683_v32  ;;  %v11686_v34 = vpop.trf.xlu1  ;;  %9900 = vmatmul.mubr.msk.f32.gmra.mrb[8].mxu0 %vm719_vm1, %v11683_v32  ;;  %13884 = vst [vmem:[#allocation32_spill] sm:$0xff] %v11806_v29  ;;  %v2594_v32 = vrot.slane %v11782_v7, 1  ;;  %v2599_v61 = vrot.slane %v11806_v29, 1 }
 0x4c4   : > { %9745 = vmatprep.mubr.msk.f32.mxu1 %vm719_vm1, %v11686_v34  ;;  %9902 = vmatprep.mubr.msk.f32.mxu0 %vm719_vm1, %v11680_v31  ;;  %v11695_v35 = vsel %vm3159_vm9, %v3466_v27, %v3468_v33  ;;  %v3470_v39 = vrot.slane %v11686_v34, 2  ;;  %v11799_v27 = vld [vmem:[%s11749_s18 + $0x20] sm:$0xff]  ;;  %v11815_v33 = vld [vmem:[%s13712_s5 + $0x10] sm:$0xf] }
 0x4c5   : > { %13869 = vst [vmem:[#allocation18_spill] sm:$0xff] %v11695_v35  ;;  %v11697_v37 = vpop.trf.xlu0  ;;  %13883 = vst [vmem:[#allocation31_spill] sm:$0xff] %v11799_v27  ;;  %v2595_v21 = vrot.slane %v11799_v27, 1 }
 0x4c6   : > { %13870 = vst [vmem:[#allocation19_spill] sm:$0xff] %v11697_v37  ;;  %v3475_v42 = vrot.slane %v11697_v37, 2 }
 0x4c7   : > { %v11699_v38 = vpop.trf.xlu1  ;;  %9903 = vmatmul.mubr.msk.f32.gmra.mrb[10].mxu0 %vm719_vm1, %v11695_v35  ;;  %v11940_v35 = vld [vmem:[%s11893_s15 + $0x30] sm:$0xff]  ;;  %v11962_v3 = vsel %vm2588_vm10, %v2594_v32, %v2595_v21 }
 0x4c8   : > { %13871 = vst [vmem:[#allocation20_spill] sm:$0xff] %v11699_v38  ;;  %9746 = vmatmul.mubr.msk.f32.gmra.mrb[20].mxu1 %vm719_vm1, %v11699_v38  ;;  %v3471_v40 = vrot.slane %v11699_v38, 2 }
 0x4c9   : > { %v11707_v41 = vpop.trf.xlu0  ;;  %9748 = vmatprep.mubr.msk.f32.mxu1 %vm719_vm1, %v11697_v37 }
 0x4ca   : > { %13872 = vst [vmem:[#allocation21_spill] sm:$0xff] %v11707_v41  ;;  %v11713_v43 = vsel %vm3159_vm9, %v3470_v39, %v3471_v40  ;;  %v3476_v45 = vrot.slane %v11707_v41, 2  ;;  %v11829_v39 = vld [vmem:[%s11749_s18 + $0x48] sm:$0xff] }
 0x4cb   : > { %13873 = vst [vmem:[#allocation22_spill] sm:$0xff] %v11713_v43  ;;  %v11716_v47 = vpop.trf.xlu1  ;;  %9905 = vmatprep.mubr.msk.f32.mxu0 %vm719_vm1, %v11713_v43  ;;  %13886 = vst [vmem:[#allocation34_spill] sm:$0xff] %v11829_v39  ;;  %v11935_v43 = vld [vmem:[%s11893_s15 + $0x20] sm:$0xff] }
 0x4cc   : > { %v3473_v49 = vrot.slane %v11716_v47, 2  ;;  %9749 = vmatmul.mubr.msk.f32.gmra.mrb[22].mxu1 %vm719_vm1, %v11707_v41  ;;  %v11726_v51 = vsel %vm3159_vm9, %v3475_v42, %v3476_v45  ;;  %v11854_v42 = vld [vmem:[%s11749_s18 + $0x68] sm:$0xff]  ;;  %13899 = vst [vmem:[#allocation46_spill] sm:$0xff] %v11935_v43 }
 0x4cd   : > { %v11723_v50 = vpop.trf.xlu0  ;;  %13874 = vst [vmem:[#allocation23_spill] sm:$0xff] %v11726_v51  ;;  %13889 = vst [vmem:[#allocation37_spill] sm:$0xff] %v11854_v42 }
 0x4ce   : > { %v11729_v52 = vsel %vm3159_vm9, %v3471_v40, %v3473_v49  ;;  %v3478_v54 = vrot.slane %v11723_v50, 2  ;;  %v11845_v40 = vld [vmem:[%s11749_s18 + $0x60] sm:$0xff] }
 0x4cf   : > { %13875 = vst [vmem:[#allocation24_spill] sm:$0xff] %v11729_v52  ;;  %v11732_v55 = vpop.trf.xlu1  ;;  %9906 = vmatmul.mubr.msk.f32.gmra.mrb[12].mxu0 %vm719_vm1, %v11729_v52  ;;  %13888 = vst [vmem:[#allocation36_spill] sm:$0xff] %v11845_v40  ;;  %v11868_v49 = vld [vmem:[%s11749_s18 + $0x80] sm:$0xff]  ;;  %v11926_v52 = vld [vmem:[%s11749_s18 + $0x10] sm:$0x3] }
 0x4d0   : > { %13876 = vst [vmem:[#allocation25_spill] sm:$0xff] %v11732_v55  ;;  %9751 = vmatprep.mubr.msk.f32.mxu1 %vm719_vm1, %v11732_v55  ;;  %9908 = vmatprep.mubr.msk.f32.mxu0 %vm719_vm1, %v11726_v51  ;;  %v11742_v56 = vsel %vm3159_vm9, %v3476_v45, %v3478_v54  ;;  %v3480_v63 = vrot.slane %v11732_v55, 2  ;;  %v11859_v45 = vld [vmem:[%s11749_s18 + $0x78] sm:$0xff]  ;;  %13891 = vst [vmem:[#allocation39_spill] sm:$0xff] %v11868_v49  ;;  %v11873_v54 = vld [vmem:[%s11749_s18 + $0x90] sm:$0xff]  ;;  %v2590_v51 = vrot.slane %v11779_v18, 1 }
 0x4d1   : > { %13877 = vst [vmem:[#allocation26_spill] sm:$0xff] %v11742_v56  ;;  %v11744_v58 = vpop.trf.xlu0  ;;  %13890 = vst [vmem:[#allocation38_spill] sm:$0xff] %v11859_v45  ;;  %v2592_v31 = vrot.slane %v11926_v52, 1 }
 0x4d2   : > { %13892 = vst [vmem:[#allocation40_spill] sm:$0xff] %v11873_v54 }
 0x4d3   : > { %v11751_v59 = vpop.trf.xlu1  ;;  %9909 = vmatmul.mubr.msk.f32.gmra.mrb[14].mxu0 %vm719_vm1, %v11742_v56  ;;  %v2589_v56 = vrot.slane %v11767_v10, 1  ;;  %v2593_v11 = vsel %vm2588_vm10, %v2590_v51, %v2592_v31 }
 0x4d4   : > { %13879 = vst [vmem:[#allocation27_spill] sm:$0xff] %v11751_v59  ;;  %9752 = vmatmul.mubr.msk.f32.gmra.mrb[24].mxu1 %vm719_vm1, %v11751_v59  ;;  %v3481_v0 = vrot.slane %v11751_v59, 2 }
 0x4d5   : > { %9754 = vmatprep.mubr.msk.f32.mxu1 %vm719_vm1, %v11744_v58  ;;  %v11761_v6 = vpop.trf.xlu0  ;;  %v2591_v19 = vsel %vm2588_vm10, %v2589_v56, %v2590_v51  ;;  %v2597_v56 = vrot.slane %v11947_v16, 1 }
 0x4d6   : > { %v11764_v8 = vsel %vm3159_vm9, %v3480_v63, %v3481_v0  ;;  %v11883_v63 = vld [vmem:[%s11749_s18 + $0x98] sm:$0xff] }
 0x4d7   : > { %13880 = vst [vmem:[#allocation28_spill] sm:$0xff] %v11764_v8  ;;  %v11769_v12 = vpop.trf.xlu1  ;;  %9911 = vmatprep.mubr.msk.f32.mxu0 %vm719_vm1, %v11764_v8  ;;  %13893 = vst [vmem:[#allocation41_spill] sm:$0xff] %v11883_v63  ;;  %v11921_v8 = vld [vmem:[%s11893_s15 + $0x18] sm:$0xff]  ;;  %v11982_v31 = vsel %vm2588_vm10, %v2595_v21, %v2597_v56  ;;  %v12002_v21 = vld [vmem:[%s13713_s6 + $0x10] sm:$0xf] }
 0x4d8   : > { %v3483_v14 = vrot.slane %v11769_v12, 2  ;;  %9755 = vmatmul.mubr.msk.f32.gmra.mrb[26].mxu1 %vm719_vm1, %v11761_v6 }
 0x4d9   : > { %9759 = vmatprep.mubr.msk.f32.mxu1 %vm719_vm1, %v11767_v10 }
 0x4da   : > { %v11785_v24 = vsel %vm3159_vm9, %v3481_v0, %v3483_v14  ;;  %v11888_v0 = vld [vmem:[%s11749_s18 + $0xa8] sm:$0xff]  ;;  %v11902_v14 = vld [vmem:[%s11749_s18 + $0xb0] sm:$0xff] }
 0x4db   : > { %13882 = vst [vmem:[#allocation30_spill] sm:$0xff] %v11785_v24  ;;  %9912 = vmatmul.mubr.msk.f32.gmra.mrb[16].mxu0 %vm719_vm1, %v11785_v24  ;;  %13894 = vst [vmem:[#allocation42_spill] sm:$0xff] %v11888_v0  ;;  %v11916_v24 = vld [vmem:[%s11893_s15 + $0x8] sm:$0xff] }
 0x4dc   : > { %9760 = vmatmul.mubr.msk.f32.vlgmr.msra.gmra.mrb[8].mxu1 %vm719_vm1, %v11779_v18  ;;  %9919 = vmatprep.mubr.msk.f32.mxu0 %vm719_vm1, %v11782_v7  ;;  %13896 = vst [vmem:[#allocation43_spill] sm:$0xff] %v11902_v14  ;;  %13898 = vst [vmem:[#allocation45_spill] sm:$0xff] %v11916_v24 }
 0x4dd   : > { %9762 = vmatprep.mubr.msk.f32.mxu1 %vm719_vm1, %v11782_v7  ;;  %9790 = vmatpush3.msk.msra.mxu1 %vm2179_vm8, %v11558_v46  ;;  %v11822_v46 = vld [vmem:[%s11749_s18 + $0x38] sm:$0xff]  ;;  %v11967_v7 = vld [vmem:[%s11749_s18 + $0x40] sm:$0x3] }
 0x4de   : > { %9821 = vmatprep.subr.msk.mxu1 %vm2179_vm8, %v11792_v26  ;;  %13885 = vst [vmem:[#allocation33_spill] sm:$0xff] %v11822_v46  ;;  %v2602_v32 = vrot.slane %v11967_v7, 1 }
 0x4df   : > { %9920 = vmatmul.mubr.msk.f32.vlgmr.msra.gmra.mrb[0].mxu0 %vm719_vm1, %v11799_v27 }
 0x4e0   : > { %9950 = vmatpush3.msk.msra.mxu0 %vm2179_vm8, %v11593_v2  ;;  %9763 = vmatmul.mubr.msk.f32.gmra.mrb[10].mxu1 %vm719_vm1, %v11799_v27  ;;  %v11840_v2 = vld [vmem:[%s11749_s18 + $0x50] sm:$0xff]  ;;  %v2600_v27 = vrot.slane %v11822_v46, 1 }
 0x4e1   : > { %9922 = vmatprep.mubr.msk.f32.mxu0 %vm719_vm1, %v11806_v29  ;;  %9765 = vmatprep.mubr.msk.f32.mxu1 %vm719_vm1, %v11806_v29  ;;  %13887 = vst [vmem:[#allocation35_spill] sm:$0xff] %v11840_v2  ;;  %v11993_v29 = vld [vmem:[%s11749_s18 + $0x58] sm:$0x3] }
 0x4e2   : > { %9981 = vmatprep.subr.msk.mxu0 %vm2179_vm8, %v11815_v33  ;;  %v11988_v51 = vsel %vm2588_vm10, %v2599_v61, %v2600_v27  ;;  %13901 = vst [vmem:[#allocation48_spill] sm:$0xff] %v11993_v29  ;;  %v12013_v61 = vsel %vm2588_vm10, %v2600_v27, %v2602_v32 }
 0x4e3   : > { %9923 = vmatmul.mubr.msk.f32.gmra.mrb[2].mxu0 %vm719_vm1, %v11822_v46  ;;  %13900 = vst [vmem:[#allocation47_spill] sm:$0xff] %v11988_v51  ;;  %13902 = vst [vmem:[#allocation49_spill] sm:$0xff] %v12013_v61 }
 0x4e4   : > { %9766 = vmatmul.mubr.msk.f32.gmra.mrb[12].mxu1 %vm719_vm1, %v11822_v46  ;;  %9925 = vmatprep.mubr.msk.f32.mxu0 %vm719_vm1, %v11829_v39  ;;  %v2605_v46 = vrot.slane %v11840_v2, 1 }
 0x4e5   : > { %9768 = vmatprep.mubr.msk.f32.mxu1 %vm719_vm1, %v11829_v39 }
 0x4e7   : > { %9926 = vmatmul.mubr.msk.f32.gmra.mrb[4].mxu0 %vm719_vm1, %v11840_v2 }
 0x4e8   : > { %9769 = vmatmul.mubr.msk.f32.gmra.mrb[14].mxu1 %vm719_vm1, %v11840_v2  ;;  %9928 = vmatprep.mubr.msk.f32.mxu0 %vm719_vm1, %v11845_v40  ;;  %v2610_v2 = vrot.slane %v11854_v42, 1 }
 0x4e9   : > { %9771 = vmatprep.mubr.msk.f32.mxu1 %vm719_vm1, %v11845_v40 }
 0x4eb   : > { %9929 = vmatmul.mubr.msk.f32.gmra.mrb[6].mxu0 %vm719_vm1, %v11854_v42 }
 0x4ec   : > { %9772 = vmatmul.mubr.msk.f32.gmra.mrb[16].mxu1 %vm719_vm1, %v11854_v42  ;;  %9931 = vmatprep.mubr.msk.f32.mxu0 %vm719_vm1, %v11859_v45  ;;  %v2614_v42 = vrot.slane %v11859_v45, 1 }
 0x4ed   : > { %9774 = vmatprep.mubr.msk.f32.mxu1 %vm719_vm1, %v11859_v45  ;;  %v2620_v45 = vrot.slane %v11883_v63, 1 }
 0x4ef   : > { %9932 = vmatmul.mubr.msk.f32.gmra.mrb[8].mxu0 %vm719_vm1, %v11868_v49 }
 0x4f0   : > { %9775 = vmatmul.mubr.msk.f32.gmra.mrb[18].mxu1 %vm719_vm1, %v11868_v49  ;;  %9934 = vmatprep.mubr.msk.f32.mxu0 %vm719_vm1, %v11873_v54 }
 0x4f1   : > { %9777 = vmatprep.mubr.msk.f32.mxu1 %vm719_vm1, %v11873_v54 }
 0x4f3   : > { %9935 = vmatmul.mubr.msk.f32.gmra.mrb[10].mxu0 %vm719_vm1, %v11883_v63 }
 0x4f4   : > { %9778 = vmatmul.mubr.msk.f32.gmra.mrb[20].mxu1 %vm719_vm1, %v11883_v63  ;;  %9937 = vmatprep.mubr.msk.f32.mxu0 %vm719_vm1, %v11888_v0  ;;  %v2624_v63 = vrot.slane %v11888_v0, 1 }
 0x4f5   : > { %9780 = vmatprep.mubr.msk.f32.mxu1 %vm719_vm1, %v11888_v0  ;;  %v2630_v0 = vrot.slane %v11916_v24, 1 }
 0x4f7   : > { %9938 = vmatmul.mubr.msk.f32.gmra.mrb[12].mxu0 %vm719_vm1, %v11902_v14 }
 0x4f8   : > { %9781 = vmatmul.mubr.msk.f32.gmra.mrb[22].mxu1 %vm719_vm1, %v11902_v14  ;;  %9940 = vmatprep.mubr.msk.f32.mxu0 %vm719_vm1, %v11907_v48 }
 0x4f9   : > { %9783 = vmatprep.mubr.msk.f32.mxu1 %vm719_vm1, %v11907_v48 }
 0x4fb   : > { %9941 = vmatmul.mubr.msk.f32.gmra.mrb[14].mxu0 %vm719_vm1, %v11916_v24 }
 0x4fc   : > { %9784 = vmatmul.mubr.msk.f32.gmra.mrb[24].mxu1 %vm719_vm1, %v11916_v24  ;;  %9943 = vmatprep.mubr.msk.f32.mxu0 %vm719_vm1, %v11921_v8  ;;  %v2634_v24 = vrot.slane %v11921_v8, 1 }
 0x4fd   : > { %9786 = vmatprep.mubr.msk.f32.mxu1 %vm719_vm1, %v11921_v8 }
 0x4ff   : > { %9944 = vmatmul.mubr.msk.f32.gmra.mrb[16].mxu0 %vm719_vm1, %v11935_v43 }
 0x500   : > { %9787 = vmatmul.mubr.msk.f32.gmra.mrb[26].mxu1 %vm719_vm1, %v11935_v43  ;;  %9946 = vmatprep.mubr.msk.f32.mxu0 %vm719_vm1, %v11940_v35 }
 0x501   : > { %9791 = vmatprep.mubr.msk.f32.mxu1 %vm719_vm1, %v2591_v19  ;;  %v11974_v19 = vld [vmem:[%s13712_s5 + $0x8] sm:$0xf] }
 0x503   : > { %9947 = vmatmul.mubr.msk.f32.gmra.mrb[18].mxu0 %vm719_vm1, %v11956_v17 }
 0x504   : > { %9792 = vmatmul.mubr.msk.f32.vlgmr.msra.gmra.mrb[8].mxu1 %vm719_vm1, %v2593_v11  ;;  %9951 = vmatprep.mubr.msk.f32.mxu0 %vm719_vm1, %v11553_v44  ;;  %v2604_v11 = vrot.slane %v11829_v39, 1  ;;  %v12022_v39 = vld [vmem:[%s11749_s18 + $0x70] sm:$0x3] }
 0x505   : > { %9794 = vmatprep.mubr.msk.f32.mxu1 %vm719_vm1, %v11962_v3  ;;  %9822 = vmatpush3.msk.msra.mxu1 %vm2179_vm8, %v11792_v26  ;;  %v2607_v26 = vrot.slane %v11993_v29, 1  ;;  %13904 = vst [vmem:[#allocation51_spill] sm:$0xff] %v12022_v39  ;;  %v2612_v32 = vrot.slane %v12022_v39, 1  ;;  %v12044_v29 = vld [vmem:[%s11749_s18 + $0x88] sm:$0x3] }
 0x506   : > { %9853 = vmatprep.subr.msk.mxu1 %vm2179_vm8, %v11974_v19  ;;  %v12017_v56 = vsel %vm2588_vm10, %v2604_v11, %v2605_v46  ;;  %13907 = vst [vmem:[#allocation54_spill] sm:$0xff] %v12044_v29  ;;  %v12064_v39 = vld [vmem:[%s11749_s18 + $0xa0] sm:$0x3] }
 0x507   : > { %9952 = vmatmul.mubr.msk.f32.vlgmr.msra.gmra.mrb[0].mxu0 %vm719_vm1, %v11562_v53  ;;  %13903 = vst [vmem:[#allocation50_spill] sm:$0xff] %v12017_v56  ;;  %v12035_v27 = vsel %vm2588_vm10, %v2605_v46, %v2607_v26  ;;  %v12055_v46 = vsel %vm2588_vm10, %v2610_v2, %v2612_v32  ;;  %v2617_v26 = vrot.slane %v12044_v29, 1  ;;  %13910 = vst [vmem:[#allocation57_spill] sm:$0xff] %v12064_v39  ;;  %v12084_v29 = vld [vmem:[%s11749_s18 + $0xb8] sm:$0x3] }
 0x508   : > { %9982 = vmatpush3.msk.msra.mxu0 %vm2179_vm8, %v11815_v33  ;;  %9795 = vmatmul.mubr.msk.f32.gmra.mrb[10].mxu1 %vm719_vm1, %v11982_v31  ;;  %v2609_v33 = vrot.slane %v11845_v40, 1  ;;  %13905 = vst [vmem:[#allocation52_spill] sm:$0xff] %v12035_v27  ;;  %v2615_v40 = vrot.slane %v11868_v49, 1  ;;  %13908 = vst [vmem:[#allocation55_spill] sm:$0xff] %v12055_v46  ;;  %v2619_v49 = vrot.slane %v11873_v54, 1  ;;  %v2625_v54 = vrot.slane %v11902_v14, 1 }
 0x509   : > { %9954 = vmatprep.mubr.msk.f32.mxu0 %vm719_vm1, %v11588_v1  ;;  %9797 = vmatprep.mubr.msk.f32.mxu1 %vm719_vm1, %v11988_v51  ;;  %13913 = vst [vmem:[#allocation60_spill] sm:$0xff] %v12084_v29  ;;  %v2629_v14 = vrot.slane %v11907_v48, 1  ;;  %v2635_v48 = vrot.slane %v11935_v43, 1  ;;  %v12143_v43 = vpop.trf.xlu1 }
 0x50a   : > { %10013 = vmatprep.subr.msk.mxu0 %vm2179_vm8, %v12002_v21  ;;  %v12039_v11 = vsel %vm2588_vm10, %v2609_v33, %v2610_v2  ;;  %v12059_v33 = vsel %vm2588_vm10, %v2614_v42, %v2615_v40  ;;  %v12075_v2 = vsel %vm2588_vm10, %v2615_v40, %v2617_v26  ;;  %v2622_v42 = vrot.slane %v12064_v39, 1  ;;  %v12104_v39 = vld [vmem:[%s11893_s15 + $0x10] sm:$0x3] }
 0x50b   : > { %9955 = vmatmul.mubr.msk.f32.gmra.mrb[2].mxu0 %vm719_vm1, %v11607_v5  ;;  %13906 = vst [vmem:[#allocation53_spill] sm:$0xff] %v12039_v11  ;;  %13909 = vst [vmem:[#allocation56_spill] sm:$0xff] %v12059_v33  ;;  %v12079_v32 = vsel %vm2588_vm10, %v2619_v49, %v2620_v45  ;;  %v2627_v49 = vrot.slane %v12084_v29, 1  ;;  %v12099_v26 = vsel %vm2588_vm10, %v2624_v63, %v2625_v54  ;;  %v2632_v63 = vrot.slane %v12104_v39, 1  ;;  %v12124_v29 = vld [vmem:[%s11893_s15 + $0x28] sm:$0x3] }
 0x50c   : > { %9798 = vmatmul.mubr.msk.f32.gmra.mrb[12].mxu1 %vm719_vm1, %v12013_v61  ;;  %9957 = vmatprep.mubr.msk.f32.mxu0 %vm719_vm1, %v11602_v4  ;;  %13911 = vst [vmem:[#allocation58_spill] sm:$0xff] %v12075_v2  ;;  %13912 = vst [vmem:[#allocation59_spill] sm:$0xff] %v12079_v32  ;;  %v12095_v40 = vsel %vm2588_vm10, %v2620_v45, %v2622_v42  ;;  %v12119_v42 = vsel %vm2588_vm10, %v2629_v14, %v2630_v0  ;;  %v2637_v14 = vrot.slane %v12124_v29, 1 }
 0x50d   : > { %9800 = vmatprep.mubr.msk.f32.mxu1 %vm719_vm1, %v12017_v56  ;;  %13914 = vst [vmem:[#allocation61_spill] sm:$0xff] %v12095_v40  ;;  %13915 = vst [vmem:[#allocation62_spill] sm:$0xff] %v12099_v26  ;;  %v12115_v45 = vsel %vm2588_vm10, %v2625_v54, %v2627_v49  ;;  %v12135_v54 = vsel %vm2588_vm10, %v2630_v0, %v2632_v63  ;;  %v12139_v49 = vsel %vm2588_vm10, %v2634_v24, %v2635_v48 }
 0x50e   : > { %13916 = vst [vmem:[#allocation63_spill] sm:$0xff] %v12115_v45  ;;  %13917 = vst [vmem:[#allocation64_spill] sm:$0xff] %v12119_v42  ;;  %v12152_v0 = vsel %vm2588_vm10, %v2635_v48, %v2637_v14  ;;  %v2884_v24 = vrot.slane %v11553_v44, 1  ;;  %v2885_v63 = vrot.slane %v11562_v53, 1  ;;  %v2887_v48 = vrot.slane %v11577_v60, 1 }
 0x50f   : > { %9958 = vmatmul.mubr.msk.f32.gmra.mrb[4].mxu0 %vm719_vm1, %v11615_v9  ;;  %13918 = vst [vmem:[#allocation65_spill] sm:$0xff] %v12124_v29  ;;  %13919 = vst [vmem:[#allocation66_spill] sm:$0xff] %v12135_v54  ;;  %v12164_v29 = vpop.trf.xlu1  ;;  %v2890_v53 = vrot.slane %v11607_v5, 1  ;;  %v2892_v60 = vrot.slane %v11624_v13, 1  ;;  %v2894_v13 = vrot.slane %v11602_v4, 1 }
 0x510   : > { %9801 = vmatmul.mubr.msk.f32.gmra.mrb[14].mxu1 %vm719_vm1, %v12035_v27  ;;  %9960 = vmatprep.mubr.msk.f32.mxu0 %vm719_vm1, %v11640_v20  ;;  %13920 = vst [vmem:[#allocation67_spill] sm:$0xff] %v12139_v49  ;;  %13921 = vst [vmem:[#allocation68_spill] sm:$0xff] %v12152_v0  ;;  %v12172_v44 = vsel %vm2588_vm10, %v2884_v24, %v2885_v63 }
 0x511   : > { %9803 = vmatprep.mubr.msk.f32.mxu1 %vm719_vm1, %v12039_v11  ;;  %v12214_v14 = vsel %vm2588_vm10, %v2890_v53, %v2892_v60  ;;  %v2904_v60 = vrot.slane %v11651_v22, 1 }
 0x512   : > { %13923 = vst [vmem:[#allocation70_spill] sm:$0xff] %v12214_v14 }
 0x513   : > { %9961 = vmatmul.mubr.msk.f32.gmra.mrb[6].mxu0 %vm719_vm1, %v11653_v23 }
 0x514   : > { %9804 = vmatmul.mubr.msk.f32.gmra.mrb[16].mxu1 %vm719_vm1, %v12055_v46  ;;  %9963 = vmatprep.mubr.msk.f32.mxu0 %vm719_vm1, %v11651_v22 }
 0x515   : > { %9806 = vmatprep.mubr.msk.f32.mxu1 %vm719_vm1, %v12059_v33 }
 0x517   : > { %9964 = vmatmul.mubr.msk.f32.gmra.mrb[8].mxu0 %vm719_vm1, %v11661_v25 }
 0x518   : > { %9807 = vmatmul.mubr.msk.f32.gmra.mrb[18].mxu1 %vm719_vm1, %v12075_v2  ;;  %9966 = vmatprep.mubr.msk.f32.mxu0 %vm719_vm1, %v11686_v34 }
 0x519   : > { %9809 = vmatprep.mubr.msk.f32.mxu1 %vm719_vm1, %v12079_v32 }
 0x51b   : > { %9967 = vmatmul.mubr.msk.f32.gmra.mrb[10].mxu0 %vm719_vm1, %v11699_v38 }
 0x51c   : > { %9810 = vmatmul.mubr.msk.f32.gmra.mrb[20].mxu1 %vm719_vm1, %v12095_v40  ;;  %9969 = vmatprep.mubr.msk.f32.mxu0 %vm719_vm1, %v11697_v37 }
 0x51d   : > { %9812 = vmatprep.mubr.msk.f32.mxu1 %vm719_vm1, %v12099_v26 }
 0x51f   : > { %9970 = vmatmul.mubr.msk.f32.gmra.mrb[12].mxu0 %vm719_vm1, %v11707_v41 }
 0x520   : > { %9813 = vmatmul.mubr.msk.f32.gmra.mrb[22].mxu1 %vm719_vm1, %v12115_v45  ;;  %9972 = vmatprep.mubr.msk.f32.mxu0 %vm719_vm1, %v11732_v55 }
 0x521   : > { %9815 = vmatprep.mubr.msk.f32.mxu1 %vm719_vm1, %v12119_v42 }
 0x523   : > { %9973 = vmatmul.mubr.msk.f32.gmra.mrb[14].mxu0 %vm719_vm1, %v11751_v59 }
 0x524   : > { %9816 = vmatmul.mubr.msk.f32.gmra.mrb[24].mxu1 %vm719_vm1, %v12135_v54  ;;  %9975 = vmatprep.mubr.msk.f32.mxu0 %vm719_vm1, %v11744_v58 }
 0x525   : > { %9818 = vmatprep.mubr.msk.f32.mxu1 %vm719_vm1, %v12139_v49 }
 0x527   : > { %9976 = vmatmul.mubr.msk.f32.gmra.mrb[16].mxu0 %vm719_vm1, %v11761_v6 }
 0x528   : > { %9819 = vmatmul.mubr.msk.f32.gmra.mrb[26].mxu1 %vm719_vm1, %v12152_v0  ;;  %9978 = vmatprep.mubr.msk.f32.mxu0 %vm719_vm1, %v12143_v43 }
 0x529   : > { %9823 = vmatprep.mubr.msk.f32.mxu1 %vm719_vm1, %v11573_v57  ;;  %v2889_v57 = vrot.slane %v11588_v1, 1 }
 0x52b   : > { %9979 = vmatmul.mubr.msk.f32.gmra.mrb[18].mxu0 %vm719_vm1, %v12164_v29 }
 0x52c   : > { %9824 = vmatmul.mubr.msk.f32.vlgmr.msra.gmra.mrb[8].mxu1 %vm719_vm1, %v11583_v62  ;;  %9983 = vmatprep.mubr.msk.f32.mxu0 %vm719_vm1, %v11962_v3  ;;  %v12188_v62 = vsel %vm2588_vm10, %v2885_v63, %v2887_v48  ;;  %v12193_v3 = vld [vmem:[%s13712_s5 + $0x14] sm:$0xf]  ;;  %v2900_v63 = vrot.slane %v11653_v23, 1  ;;  %v2902_v48 = vrot.slane %v11670_v28, 1  ;;  %v2907_v28 = vrot.slane %v11677_v30, 1 }
 0x52d   : > { %9826 = vmatprep.mubr.msk.f32.mxu1 %vm719_vm1, %v12172_v44  ;;  %9854 = vmatpush3.msk.msra.mxu1 %vm2179_vm8, %v11974_v19  ;;  %v12200_v19 = vsel %vm2588_vm10, %v2889_v57, %v2890_v53  ;;  %v2909_v30 = vrot.slane %v11686_v34, 1 }
 0x52e   : > { %10541 = vmatprep.subr.msk.mxu1 %vm2179_vm8, %v11538_v36  ;;  %13922 = vst [vmem:[#allocation69_spill] sm:$0xff] %v12200_v19 }
 0x52f   : > { %9984 = vmatmul.mubr.msk.f32.vlgmr.msra.gmra.mrb[0].mxu0 %vm719_vm1, %v11982_v31  ;;  %v2895_v31 = vrot.slane %v11615_v9, 1 }
 0x530   : > { %10014 = vmatpush3.msk.msra.mxu0 %vm2179_vm8, %v12002_v21  ;;  %9827 = vmatmul.mubr.msk.f32.gmra.mrb[10].mxu1 %vm719_vm1, %v12188_v62  ;;  %v2897_v21 = vrot.slane %v11631_v15, 1  ;;  %v2899_v15 = vrot.slane %v11640_v20, 1 }
 0x531   : > { %9829 = vmatprep.mubr.msk.f32.mxu1 %vm719_vm1, %v12200_v19  ;;  %9986 = vmatprep.mubr.msk.f32.mxu0 %vm719_vm1, %v11988_v51  ;;  %v12219_v24 = vsel %vm2588_vm10, %v2894_v13, %v2895_v31  ;;  %v2905_v13 = vrot.slane %v11661_v25, 1 }
 0x532   : > { %10045 = vmatprep.subr.msk.mxu0 %vm2179_vm8, %v12193_v3  ;;  %13924 = vst [vmem:[#allocation71_spill] sm:$0xff] %v12219_v24  ;;  %v12231_v53 = vsel %vm2588_vm10, %v2895_v31, %v2897_v21  ;;  %v12236_v57 = vsel %vm2588_vm10, %v2899_v15, %v2900_v63  ;;  %v12248_v31 = vsel %vm2588_vm10, %v2900_v63, %v2902_v48  ;;  %v2910_v15 = vrot.slane %v11699_v38, 1  ;;  %v12510_v38 = vpop.trf.xlu1 }
 0x533   : > { %9987 = vmatmul.mubr.msk.f32.gmra.mrb[2].mxu0 %vm719_vm1, %v12013_v61  ;;  %13925 = vst [vmem:[#allocation72_spill] sm:$0xff] %v12231_v53  ;;  %13926 = vst [vmem:[#allocation73_spill] sm:$0xff] %v12236_v57  ;;  %v12253_v21 = vsel %vm2588_vm10, %v2904_v60, %v2905_v13  ;;  %v12265_v63 = vsel %vm2588_vm10, %v2905_v13, %v2907_v28  ;;  %v2914_v60 = vrot.slane %v11697_v37, 1 }
 0x534   : > { %9830 = vmatmul.mubr.msk.f32.gmra.mrb[12].mxu1 %vm719_vm1, %v12214_v14  ;;  %9989 = vmatprep.mubr.msk.f32.mxu0 %vm719_vm1, %v12017_v56  ;;  %13927 = vst [vmem:[#allocation74_spill] sm:$0xff] %v12248_v31  ;;  %13928 = vst [vmem:[#allocation75_spill] sm:$0xff] %v12253_v21  ;;  %v12270_v48 = vsel %vm2588_vm10, %v2909_v30, %v2910_v15  ;;  %v2920_v30 = vrot.slane %v11751_v59, 1  ;;  %v13938_v56 = vld [vmem:[#allocation31_spill] sm:$0xff] }
 0x535   : > { %9832 = vmatprep.mubr.msk.f32.mxu1 %vm719_vm1, %v12219_v24  ;;  %13929 = vst [vmem:[#allocation76_spill] sm:$0xff] %v12265_v63  ;;  %13930 = vst [vmem:[#allocation77_spill] sm:$0xff] %v12270_v48 }
 0x537   : > { %9990 = vmatmul.mubr.msk.f32.gmra.mrb[4].mxu0 %vm719_vm1, %v12035_v27 }
 0x538   : > { %9833 = vmatmul.mubr.msk.f32.gmra.mrb[14].mxu1 %vm719_vm1, %v12231_v53  ;;  %9992 = vmatprep.mubr.msk.f32.mxu0 %vm719_vm1, %v12039_v11 }
 0x539   : > { %9835 = vmatprep.mubr.msk.f32.mxu1 %vm719_vm1, %v12236_v57 }
 0x53b   : > { %9993 = vmatmul.mubr.msk.f32.gmra.mrb[6].mxu0 %vm719_vm1, %v12055_v46  ;;  %v2912_v46 = vrot.slane %v11716_v47, 1  ;;  %v2917_v47 = vrot.slane %v11723_v50, 1  ;;  %v2919_v50 = vrot.slane %v11732_v55, 1 }
 0x53c   : > { %9836 = vmatmul.mubr.msk.f32.gmra.mrb[16].mxu1 %vm719_vm1, %v12248_v31  ;;  %9995 = vmatprep.mubr.msk.f32.mxu0 %vm719_vm1, %v12059_v33  ;;  %v2915_v33 = vrot.slane %v11707_v41, 1 }
 0x53d   : > { %9838 = vmatprep.mubr.msk.f32.mxu1 %vm719_vm1, %v12253_v21  ;;  %v12282_v13 = vsel %vm2588_vm10, %v2910_v15, %v2912_v46  ;;  %v2922_v46 = vrot.slane %v11769_v12, 1  ;;  %v2925_v12 = vrot.slane %v11761_v6, 1 }
 0x53e   : > { %13931 = vst [vmem:[#allocation78_spill] sm:$0xff] %v12282_v13  ;;  %v12287_v28 = vsel %vm2588_vm10, %v2914_v60, %v2915_v33  ;;  %v12299_v15 = vsel %vm2588_vm10, %v2915_v33, %v2917_v47  ;;  %v12301_v60 = vpop.trf.xlu0  ;;  %v4114_v33 = vrot.slane %v11956_v17, 1  ;;  %v12317_v47 = vld [vmem:[%s11893_s15 + $0x40] sm:$0x3] }
 0x53f   : > { %9996 = vmatmul.mubr.msk.f32.gmra.mrb[8].mxu0 %vm719_vm1, %v12075_v2  ;;  %13932 = vst [vmem:[#allocation79_spill] sm:$0xff] %v12287_v28  ;;  %13933 = vst [vmem:[#allocation80_spill] sm:$0xff] %v12299_v15  ;;  %v2927_v2 = vrot.slane %v12301_v60, 1 }
 0x540   : > { %9839 = vmatmul.mubr.msk.f32.gmra.mrb[18].mxu1 %vm719_vm1, %v12265_v63  ;;  %9998 = vmatprep.mubr.msk.f32.mxu0 %vm719_vm1, %v12079_v32  ;;  %v3160_v32 = vrot.slane %v11767_v10, 2  ;;  %v4116_v10 = vrot.slane %v12317_v47, 1 }
 0x541   : > { %9841 = vmatprep.mubr.msk.f32.mxu1 %vm719_vm1, %v12270_v48 }
 0x543   : > { %9999 = vmatmul.mubr.msk.f32.gmra.mrb[10].mxu0 %vm719_vm1, %v12095_v40  ;;  %v2924_v40 = vrot.slane %v11744_v58, 1 }
 0x544   : > { %9842 = vmatmul.mubr.msk.f32.gmra.mrb[20].mxu1 %vm719_vm1, %v12282_v13  ;;  %10001 = vmatprep.mubr.msk.f32.mxu0 %vm719_vm1, %v12099_v26  ;;  %v12306_v26 = vsel %vm2588_vm10, %v2919_v50, %v2920_v30  ;;  %v3161_v50 = vrot.slane %v11779_v18, 2 }
 0x545   : > { %9844 = vmatprep.mubr.msk.f32.mxu1 %vm719_vm1, %v12287_v28  ;;  %13934 = vst [vmem:[#allocation81_spill] sm:$0xff] %v12306_v26  ;;  %v12330_v11 = vsel %vm2588_vm10, %v2924_v40, %v2925_v12  ;;  %v3166_v40 = vrot.slane %v13938_v56, 2  ;;  %v3168_v56 = vrot.slane %v11947_v16, 2 }
 0x546   : > { %13935 = vst [vmem:[#allocation82_spill] sm:$0xff] %v12330_v11  ;;  %v3162_v27 = vsel %vm3159_vm9, %v3160_v32, %v3161_v50 }
 0x547   : > { %10002 = vmatmul.mubr.msk.f32.gmra.mrb[12].mxu0 %vm719_vm1, %v12115_v45  ;;  %v4113_v45 = vrot.slane %v11940_v35, 1  ;;  %v12372_v16 = vsel %vm3159_vm9, %v3166_v40, %v3168_v56 }
 0x548   : > { %9845 = vmatmul.mubr.msk.f32.gmra.mrb[22].mxu1 %vm719_vm1, %v12299_v15  ;;  %10004 = vmatprep.mubr.msk.f32.mxu0 %vm719_vm1, %v12119_v42  ;;  %v12325_v42 = vsel %vm2588_vm10, %v2920_v30, %v2922_v46  ;;  %v3163_v30 = vrot.slane %v11926_v52, 2  ;;  %v13937_v46 = vld [vmem:[#allocation29_spill] sm:$0xff]  ;;  %v12354_v52 = vsel %vm2588_vm10, %v4114_v33, %v4116_v10  ;;  %v13943_v10 = vld [vmem:[#allocation35_spill] sm:$0xff] }
 0x549   : > { %9847 = vmatprep.mubr.msk.f32.mxu1 %vm719_vm1, %v12306_v26  ;;  %v12338_v18 = vsel %vm2588_vm10, %v4113_v45, %v4114_v33  ;;  %13939 = vst [vmem:[#allocation29_spill] sm:$0xff] %v12354_v52  ;;  %v13942_v33 = vld [vmem:[#allocation34_spill] sm:$0xff] }
 0x54a   : > { %13936 = vst [vmem:[#allocation83_spill] sm:$0xff] %v12338_v18  ;;  %v3164_v32 = vsel %vm3159_vm9, %v3161_v50, %v3163_v30  ;;  %v3175_v50 = vrot.slane %v13942_v33, 2  ;;  %v3176_v30 = vrot.slane %v13943_v10, 2 }
 0x54b   : > { %10005 = vmatmul.mubr.msk.f32.gmra.mrb[14].mxu0 %vm719_vm1, %v12135_v54  ;;  %v3165_v54 = vrot.slane %v13937_v46, 2  ;;  %v13941_v46 = vld [vmem:[#allocation33_spill] sm:$0xff] }
 0x54c   : > { %9848 = vmatmul.mubr.msk.f32.gmra.mrb[24].mxu1 %vm719_vm1, %v12325_v42  ;;  %10007 = vmatprep.mubr.msk.f32.mxu0 %vm719_vm1, %v12139_v49  ;;  %v12347_v49 = vsel %vm2588_vm10, %v2925_v12, %v2927_v2  ;;  %v13940_v2 = vld [vmem:[#allocation32_spill] sm:$0xff] }
 0x54d   : > { %9850 = vmatprep.mubr.msk.f32.mxu1 %vm719_vm1, %v12330_v11  ;;  %v12360_v45 = vsel %vm3159_vm9, %v3165_v54, %v3166_v40  ;;  %v3170_v12 = vrot.slane %v13940_v2, 2  ;;  %v12402_v40 = vsel %vm3159_vm9, %v3175_v50, %v3176_v30 }
 0x54f   : > { %10008 = vmatmul.mubr.msk.f32.gmra.mrb[16].mxu0 %vm719_vm1, %v12152_v0  ;;  %v3171_v0 = vrot.slane %v13941_v46, 2 }
 0x550   : > { %9851 = vmatmul.mubr.msk.f32.gmra.mrb[26].mxu1 %vm719_vm1, %v12347_v49  ;;  %10010 = vmatprep.mubr.msk.f32.mxu0 %vm719_vm1, %v12338_v18 }
 0x551   : > { %9855 = vmatprep.mubr.msk.f32.mxu1 %vm719_vm1, %v3162_v27  ;;  %v3173_v27 = vrot.slane %v11967_v7, 2  ;;  %v12378_v54 = vsel %vm3159_vm9, %v3170_v12, %v3171_v0  ;;  %v13944_v7 = vld [vmem:[#allocation48_spill] sm:$0xff] }
 0x553   : > { %10011 = vmatmul.mubr.msk.f32.gmra.mrb[18].mxu0 %vm719_vm1, %v12354_v52 }
 0x554   : > { %9856 = vmatmul.mubr.msk.f32.vlgmr.msra.gmra.mrb[8].mxu1 %vm719_vm1, %v3164_v32  ;;  %10015 = vmatprep.mubr.msk.f32.mxu0 %vm719_vm1, %v12172_v44  ;;  %v12387_v44 = vld [vmem:[%s13713_s6 + $0x14] sm:$0xf] }
 0x555   : > { %9858 = vmatprep.mubr.msk.f32.mxu1 %vm719_vm1, %v12360_v45  ;;  %10542 = vmatpush3.msk.msra.mxu1 %vm2179_vm8, %v11538_v36  ;;  %v12398_v36 = vsel %vm3159_vm9, %v3171_v0, %v3173_v27  ;;  %v13945_v32 = vld [vmem:[#allocation36_spill] sm:$0xff]  ;;  %v13947_v27 = vld [vmem:[#allocation51_spill] sm:$0xff] }
 0x556   : > { %v3180_v56 = vrot.slane %v13945_v32, 2  ;;  %v3183_v50 = vrot.slane %v13947_v27, 2 }
 0x557   : > { %10016 = vmatmul.mubr.msk.f32.vlgmr.msra.gmra.mrb[0].mxu0 %vm719_vm1, %v12188_v62  ;;  %v3178_v62 = vrot.slane %v13944_v7, 2 }
 0x558   : > { %10046 = vmatpush3.msk.msra.mxu0 %vm2179_vm8, %v12193_v3  ;;  %9859 = vmatmul.mubr.msk.f32.gmra.mrb[10].mxu1 %vm719_vm1, %v12372_v16  ;;  %v13946_v3 = vld [vmem:[#allocation37_spill] sm:$0xff] }
 0x559   : > { %10018 = vmatprep.mubr.msk.f32.mxu0 %vm719_vm1, %v12200_v19  ;;  %9861 = vmatprep.mubr.msk.f32.mxu1 %vm719_vm1, %v12378_v54  ;;  %v3181_v12 = vrot.slane %v13946_v3, 2  ;;  %v12417_v0 = vsel %vm3159_vm9, %v3176_v30, %v3178_v62  ;;  %v13948_v19 = vld [vmem:[#allocation38_spill] sm:$0xff] }
 0x55a   : > { %10077 = vmatprep.subr.msk.mxu0 %vm2179_vm8, %v12387_v44  ;;  %v3185_v52 = vrot.slane %v13948_v19, 2  ;;  %v13950_v62 = vld [vmem:[#allocation54_spill] sm:$0xff] }
 0x55b   : > { %10019 = vmatmul.mubr.msk.f32.gmra.mrb[2].mxu0 %vm719_vm1, %v12214_v14  ;;  %v12421_v7 = vsel %vm3159_vm9, %v3180_v56, %v3181_v12  ;;  %v13949_v14 = vld [vmem:[#allocation39_spill] sm:$0xff]  ;;  %v12434_v30 = vsel %vm3159_vm9, %v3181_v12, %v3183_v50  ;;  %v3188_v56 = vrot.slane %v13950_v62, 2 }
 0x55c   : > { %9862 = vmatmul.mubr.msk.f32.gmra.mrb[12].mxu1 %vm719_vm1, %v12398_v36  ;;  %10021 = vmatprep.mubr.msk.f32.mxu0 %vm719_vm1, %v12219_v24  ;;  %v3186_v18 = vrot.slane %v13949_v14, 2  ;;  %v13951_v24 = vld [vmem:[#allocation40_spill] sm:$0xff] }
 0x55d   : > { %9864 = vmatprep.mubr.msk.f32.mxu1 %vm719_vm1, %v12402_v40  ;;  %v3190_v61 = vrot.slane %v13951_v24, 2 }
 0x55e   : > { %v12438_v27 = vsel %vm3159_vm9, %v3185_v52, %v3186_v18  ;;  %v12451_v12 = vsel %vm3159_vm9, %v3186_v18, %v3188_v56  ;;  %v13953_v52 = vld [vmem:[#allocation57_spill] sm:$0xff] }
 0x55f   : > { %10022 = vmatmul.mubr.msk.f32.gmra.mrb[4].mxu0 %vm719_vm1, %v12231_v53  ;;  %v13952_v53 = vld [vmem:[#allocation41_spill] sm:$0xff]  ;;  %v3193_v50 = vrot.slane %v13953_v52, 2 }
 0x560   : > { %9865 = vmatmul.mubr.msk.f32.gmra.mrb[14].mxu1 %vm719_vm1, %v12417_v0  ;;  %10024 = vmatprep.mubr.msk.f32.mxu0 %vm719_vm1, %v12236_v57  ;;  %v3191_v51 = vrot.slane %v13952_v53, 2  ;;  %v13954_v57 = vld [vmem:[#allocation42_spill] sm:$0xff] }
 0x561   : > { %9867 = vmatprep.mubr.msk.f32.mxu1 %vm719_vm1, %v12421_v7  ;;  %v3195_v59 = vrot.slane %v13954_v57, 2 }
 0x562   : > { %v12455_v62 = vsel %vm3159_vm9, %v3190_v61, %v3191_v51  ;;  %v12468_v18 = vsel %vm3159_vm9, %v3191_v51, %v3193_v50  ;;  %v13956_v61 = vld [vmem:[#allocation60_spill] sm:$0xff] }
 0x563   : > { %10025 = vmatmul.mubr.msk.f32.gmra.mrb[6].mxu0 %vm719_vm1, %v12248_v31  ;;  %v13955_v31 = vld [vmem:[#allocation43_spill] sm:$0xff]  ;;  %v3198_v56 = vrot.slane %v13956_v61, 2  ;;  %v3205_v61 = vrot.slane %v11921_v8, 2 }
 0x564   : > { %9868 = vmatmul.mubr.msk.f32.gmra.mrb[16].mxu1 %vm719_vm1, %v12434_v30  ;;  %10027 = vmatprep.mubr.msk.f32.mxu0 %vm719_vm1, %v12253_v21  ;;  %v3196_v55 = vrot.slane %v13955_v31, 2  ;;  %v13957_v21 = vld [vmem:[#allocation44_spill] sm:$0xff] }
 0x565   : > { %9870 = vmatprep.mubr.msk.f32.mxu1 %vm719_vm1, %v12438_v27  ;;  %v3200_v41 = vrot.slane %v13957_v21, 2 }
 0x566   : > { %v12472_v52 = vsel %vm3159_vm9, %v3195_v59, %v3196_v55  ;;  %v12485_v51 = vsel %vm3159_vm9, %v3196_v55, %v3198_v56  ;;  %v3203_v59 = vrot.slane %v12104_v39, 2 }
 0x567   : > { %10028 = vmatmul.mubr.msk.f32.gmra.mrb[8].mxu0 %vm719_vm1, %v12265_v63  ;;  %v13958_v63 = vld [vmem:[#allocation45_spill] sm:$0xff] }
 0x568   : > { %9871 = vmatmul.mubr.msk.f32.gmra.mrb[18].mxu1 %vm719_vm1, %v12451_v12  ;;  %10030 = vmatprep.mubr.msk.f32.mxu0 %vm719_vm1, %v12270_v48  ;;  %v3201_v37 = vrot.slane %v13958_v63, 2 }
 0x569   : > { %9873 = vmatprep.mubr.msk.f32.mxu1 %vm719_vm1, %v12455_v62 }
 0x56a   : > { %v12489_v50 = vsel %vm3159_vm9, %v3200_v41, %v3201_v37  ;;  %v12502_v55 = vsel %vm3159_vm9, %v3201_v37, %v3203_v59  ;;  %v13960_v41 = vld [vmem:[#allocation65_spill] sm:$0xff]  ;;  %v3485_v37 = vrot.slane %v11744_v58, 2 }
 0x56b   : > { %10031 = vmatmul.mubr.msk.f32.gmra.mrb[10].mxu0 %vm719_vm1, %v12282_v13  ;;  %v13959_v13 = vld [vmem:[#allocation46_spill] sm:$0xff]  ;;  %v3208_v39 = vrot.slane %v13960_v41, 2 }
 0x56c   : > { %9874 = vmatmul.mubr.msk.f32.gmra.mrb[20].mxu1 %vm719_vm1, %v12468_v18  ;;  %10033 = vmatprep.mubr.msk.f32.mxu0 %vm719_vm1, %v12287_v28  ;;  %v3206_v48 = vrot.slane %v13959_v13, 2  ;;  %v4313_v28 = vrot.slane %v12143_v43, 1 }
 0x56d   : > { %9876 = vmatprep.mubr.msk.f32.mxu1 %vm719_vm1, %v12472_v52 }
 0x56e   : > { %v12506_v56 = vsel %vm3159_vm9, %v3205_v61, %v3206_v48  ;;  %v12523_v59 = vsel %vm3159_vm9, %v3206_v48, %v3208_v39  ;;  %v4316_v61 = vrot.slane %v12510_v38, 1  ;;  %v3488_v39 = vrot.slane %v12301_v60, 2 }
 0x56f   : > { %10034 = vmatmul.mubr.msk.f32.gmra.mrb[12].mxu0 %vm719_vm1, %v12299_v15  ;;  %v4314_v15 = vrot.slane %v12164_v29, 1  ;;  %v4515_v60 = vrot.slane %v12317_v47, 2  ;;  %v8871_v47 = vld [vmem:[%s13713_s6 + $0x18] sm:$0xf] }
 0x570   : > { %9877 = vmatmul.mubr.msk.f32.gmra.mrb[22].mxu1 %vm719_vm1, %v12485_v51  ;;  %10036 = vmatprep.mubr.msk.f32.mxu0 %vm719_vm1, %v12306_v26  ;;  %v3486_v26 = vrot.slane %v11761_v6, 2 }
 0x571   : > { %9879 = vmatprep.mubr.msk.f32.mxu1 %vm719_vm1, %v12489_v50  ;;  %v12529_v41 = vsel %vm2588_vm10, %v4313_v28, %v4314_v15  ;;  %v12541_v48 = vsel %vm2588_vm10, %v4314_v15, %v4316_v61  ;;  %v8849_v28 = vld [vmem:[%s13712_s5 + $0x18] sm:$0xf]  ;;  %v4513_v15 = vrot.slane %v11956_v17, 2  ;;  %v13963_v61 = vld [vmem:[#allocation10_spill] sm:$0xff] }
 0x573   : > { %10037 = vmatmul.mubr.msk.f32.gmra.mrb[14].mxu0 %vm719_vm1, %v12325_v42 }
 0x574   : > { %9880 = vmatmul.mubr.msk.f32.gmra.mrb[24].mxu1 %vm719_vm1, %v12502_v55  ;;  %10039 = vmatprep.mubr.msk.f32.mxu0 %vm719_vm1, %v12330_v11  ;;  %v12536_v11 = vsel %vm3159_vm9, %v3485_v37, %v3486_v26  ;;  %v12552_v37 = vsel %vm3159_vm9, %v3486_v26, %v3488_v39  ;;  %v4512_v26 = vrot.slane %v11940_v35, 2  ;;  %v13964_v39 = vld [vmem:[#allocation11_spill] sm:$0xff] }
 0x575   : > { %9882 = vmatprep.mubr.msk.f32.mxu1 %vm719_vm1, %v12506_v56 }
 0x577   : > { %10040 = vmatmul.mubr.msk.f32.gmra.mrb[16].mxu0 %vm719_vm1, %v12347_v49 }
 0x578   : > { %9883 = vmatmul.mubr.msk.f32.gmra.mrb[26].mxu1 %vm719_vm1, %v12523_v59  ;;  %10042 = vmatprep.mubr.msk.f32.mxu0 %vm719_vm1, %v12529_v41 }
 0x579   : > { %9914 = vmatprep.mubr.msk.f32.mxu1 %vm719_vm1, %v12536_v11 }
 0x57b   : > { %10043 = vmatmul.mubr.msk.f32.gmra.mrb[18].mxu0 %vm719_vm1, %v12541_v48 }
 0x57c   : > { %10047 = vmatprep.mubr.msk.f32.mxu0 %vm719_vm1, %v12360_v45  ;;  %v12595_v45 = vsel %vm3159_vm9, %v4512_v26, %v4513_v15  ;;  %v13965_v26 = vld [vmem:[#allocation13_spill] sm:$0xff] }
 0x57f   : > { %10048 = vmatmul.mubr.msk.f32.vlgmr.msra.gmra.mrb[0].mxu0 %vm719_vm1, %v12372_v16  ;;  %v12602_v16 = vsel %vm3159_vm9, %v4513_v15, %v4515_v60  ;;  %v13966_v15 = vld [vmem:[#allocation12_spill] sm:$0xff]  ;;  %v13967_v60 = vld [vmem:[#allocation14_spill] sm:$0xff] }
 0x580   : > { %10078 = vmatpush3.msk.msra.mxu0 %vm2179_vm8, %v12387_v44  ;;  %9915 = vmatmul.mubr.msk.f32.vlgmr.msra.gmra.mrb[26].mxu1 %vm719_vm1, %v12552_v37  ;;  %13961 = vst [vmem:[#allocation31_spill] sm:$0xff] %v12602_v16  ;;  %v13962_v44 = vld [vmem:[#allocation9_spill] sm:$0xff] }
 0x581   : > { %10050 = vmatprep.mubr.msk.f32.mxu0 %vm719_vm1, %v12378_v54  ;;  %10109 = vmatprep.subr.msk.mxu0 %vm2179_vm8, %v8849_v28 }
 0x583   : > { %10051 = vmatmul.mubr.msk.f32.gmra.mrb[2].mxu0 %vm719_vm1, %v12398_v36 }
 0x584   : > { %10053 = vmatprep.mubr.msk.f32.mxu0 %vm719_vm1, %v12402_v40 }
 0x587   : > { %10054 = vmatmul.mubr.msk.f32.gmra.mrb[4].mxu0 %vm719_vm1, %v12417_v0 }
 0x588   : > { %10056 = vmatprep.mubr.msk.f32.mxu0 %vm719_vm1, %v12421_v7 }
 0x58b   : > { %10057 = vmatmul.mubr.msk.f32.gmra.mrb[6].mxu0 %vm719_vm1, %v12434_v30 }
 0x58c   : > { %10059 = vmatprep.mubr.msk.f32.mxu0 %vm719_vm1, %v12438_v27 }
 0x58f   : > { %10060 = vmatmul.mubr.msk.f32.gmra.mrb[8].mxu0 %vm719_vm1, %v12451_v12 }
 0x590   : > { %10062 = vmatprep.mubr.msk.f32.mxu0 %vm719_vm1, %v12455_v62 }
 0x593   : > { %10063 = vmatmul.mubr.msk.f32.gmra.mrb[10].mxu0 %vm719_vm1, %v12468_v18 }
 0x594   : > { %10065 = vmatprep.mubr.msk.f32.mxu0 %vm719_vm1, %v12472_v52 }
 0x597   : > { %10066 = vmatmul.mubr.msk.f32.gmra.mrb[12].mxu0 %vm719_vm1, %v12485_v51 }
 0x598   : > { %10068 = vmatprep.mubr.msk.f32.mxu0 %vm719_vm1, %v12489_v50 }
 0x59b   : > { %10069 = vmatmul.mubr.msk.f32.gmra.mrb[14].mxu0 %vm719_vm1, %v12502_v55 }
 0x59c   : > { %10071 = vmatprep.mubr.msk.f32.mxu0 %vm719_vm1, %v12506_v56 }
 0x59f   : > { %10072 = vmatmul.mubr.msk.f32.gmra.mrb[16].mxu0 %vm719_vm1, %v12523_v59 }
 0x5a0   : > { %10074 = vmatprep.mubr.msk.f32.mxu0 %vm719_vm1, %v12595_v45 }
 0x5a3   : > { %10075 = vmatmul.mubr.msk.f32.gmra.mrb[18].mxu0 %vm719_vm1, %v12602_v16  ;;  %v13972_v16 = vld [vmem:[#allocation22_spill] sm:$0xff] }
 0x5a4   : > { %10079 = vmatprep.mubr.msk.f32.mxu0 %vm719_vm1, %v13962_v44  ;;  %v13968_v44 = vld [vmem:[#allocation15_spill] sm:$0xff] }
 0x5a7   : > { %10080 = vmatmul.mubr.msk.f32.vlgmr.msra.gmra.mrb[0].mxu0 %vm719_vm1, %v13963_v61  ;;  %v13969_v61 = vld [vmem:[#allocation17_spill] sm:$0xff] }
 0x5a8   : > { %10110 = vmatpush3.msk.msra.mxu0 %vm2179_vm8, %v8849_v28  ;;  %10082 = vmatprep.mubr.msk.f32.mxu0 %vm719_vm1, %v13964_v39  ;;  %v13970_v28 = vld [vmem:[#allocation16_spill] sm:$0xff]  ;;  %v13971_v39 = vld [vmem:[#allocation18_spill] sm:$0xff] }
 0x5a9   : > { %10141 = vmatprep.subr.msk.mxu0 %vm2179_vm8, %v8871_v47 }
 0x5ab   : > { %10083 = vmatmul.mubr.msk.f32.gmra.mrb[2].mxu0 %vm719_vm1, %v13965_v26  ;;  %v13973_v26 = vld [vmem:[#allocation24_spill] sm:$0xff] }
 0x5ac   : > { %10085 = vmatprep.mubr.msk.f32.mxu0 %vm719_vm1, %v13966_v15  ;;  %v13974_v15 = vld [vmem:[#allocation23_spill] sm:$0xff] }
 0x5af   : > { %10086 = vmatmul.mubr.msk.f32.gmra.mrb[4].mxu0 %vm719_vm1, %v13967_v60  ;;  %v13975_v60 = vld [vmem:[#allocation26_spill] sm:$0xff] }
 0x5b0   : > { %10088 = vmatprep.mubr.msk.f32.mxu0 %vm719_vm1, %v13968_v44  ;;  %v13976_v44 = vld [vmem:[#allocation28_spill] sm:$0xff] }
 0x5b3   : > { %10089 = vmatmul.mubr.msk.f32.gmra.mrb[6].mxu0 %vm719_vm1, %v13969_v61  ;;  %v4712_v61 = vrot.slane %v12164_v29, 2 }
 0x5b4   : > { %10091 = vmatprep.mubr.msk.f32.mxu0 %vm719_vm1, %v13970_v28  ;;  %v4711_v28 = vrot.slane %v12143_v43, 2 }
 0x5b7   : > { %10092 = vmatmul.mubr.msk.f32.gmra.mrb[8].mxu0 %vm719_vm1, %v13971_v39  ;;  %v13977_v39 = vld [vmem:[#allocation30_spill] sm:$0xff] }
 0x5b8   : > { %10094 = vmatprep.mubr.msk.f32.mxu0 %vm719_vm1, %v13972_v16 }
 0x5bb   : > { %10095 = vmatmul.mubr.msk.f32.gmra.mrb[10].mxu0 %vm719_vm1, %v13973_v26  ;;  %v4714_v26 = vrot.slane %v12510_v38, 2  ;;  %v8893_v38 = vld [vmem:[%s13712_s5 + $0x1c] sm:$0xf] }
 0x5bc   : > { %10097 = vmatprep.mubr.msk.f32.mxu0 %vm719_vm1, %v13974_v15 }
 0x5bf   : > { %10098 = vmatmul.mubr.msk.f32.gmra.mrb[12].mxu0 %vm719_vm1, %v13975_v60  ;;  %v12651_v60 = vsel %vm3159_vm9, %v4711_v28, %v4712_v61 }
 0x5c0   : > { %10100 = vmatprep.mubr.msk.f32.mxu0 %vm719_vm1, %v13976_v44  ;;  %v12656_v44 = vsel %vm3159_vm9, %v4712_v61, %v4714_v26  ;;  %v13996_v61 = vld [vmem:[#allocation66_spill] sm:$0xff] }
 0x5c3   : > { %10101 = vmatmul.mubr.msk.f32.gmra.mrb[14].mxu0 %vm719_vm1, %v13977_v39 }
 0x5c4   : > { %10103 = vmatprep.mubr.msk.f32.mxu0 %vm719_vm1, %v12536_v11 }
 0x5c7   : > { %10104 = vmatmul.mubr.msk.f32.gmra.mrb[16].mxu0 %vm719_vm1, %v12552_v37 }
 0x5c8   : > { %10106 = vmatprep.mubr.msk.f32.mxu0 %vm719_vm1, %v12651_v60 }
 0x5cb   : > { %10107 = vmatmul.mubr.msk.f32.gmra.mrb[18].mxu0 %vm719_vm1, %v12656_v44 }
 0x5cc   : > { %10111 = vmatprep.mubr.msk.f32.mxu0 %vm719_vm1, %v13940_v2  ;;  %v13992_v2 = vld [vmem:[#allocation61_spill] sm:$0xff] }
 0x5cf   : > { %10112 = vmatmul.mubr.msk.f32.vlgmr.msra.gmra.mrb[0].mxu0 %vm719_vm1, %v13941_v46 }
 0x5d0   : > { %10142 = vmatpush3.msk.msra.mxu0 %vm2179_vm8, %v8871_v47  ;;  %10114 = vmatprep.mubr.msk.f32.mxu0 %vm719_vm1, %v13942_v33  ;;  %v13993_v33 = vld [vmem:[#allocation62_spill] sm:$0xff]  ;;  %v13995_v47 = vld [vmem:[#allocation64_spill] sm:$0xff] }
 0x5d1   : > { %10173 = vmatprep.subr.msk.mxu0 %vm2179_vm8, %v8893_v38 }
 0x5d3   : > { %10115 = vmatmul.mubr.msk.f32.gmra.mrb[2].mxu0 %vm719_vm1, %v13943_v10 }
 0x5d4   : > { %10117 = vmatprep.mubr.msk.f32.mxu0 %vm719_vm1, %v13945_v32  ;;  %v13994_v32 = vld [vmem:[#allocation63_spill] sm:$0xff] }
 0x5d7   : > { %10118 = vmatmul.mubr.msk.f32.gmra.mrb[4].mxu0 %vm719_vm1, %v13946_v3 }
 0x5d8   : > { %10120 = vmatprep.mubr.msk.f32.mxu0 %vm719_vm1, %v13948_v19  ;;  %v12700_v19 = vld [vmem:[%s11893_s15 + $0x48] sm:$0xff] }
 0x5db   : > { %10121 = vmatmul.mubr.msk.f32.gmra.mrb[6].mxu0 %vm719_vm1, %v13949_v14  ;;  %v12707_v14 = vld [vmem:[%s11893_s15 + $0x50] sm:$0xff] }
 0x5dc   : > { %10123 = vmatprep.mubr.msk.f32.mxu0 %vm719_vm1, %v13951_v24 }
 0x5df   : > { %10124 = vmatmul.mubr.msk.f32.gmra.mrb[8].mxu0 %vm719_vm1, %v13952_v53  ;;  %v13989_v53 = vld [vmem:[#allocation56_spill] sm:$0xff] }
 0x5e0   : > { %10126 = vmatprep.mubr.msk.f32.mxu0 %vm719_vm1, %v13954_v57 }
 0x5e3   : > { %10127 = vmatmul.mubr.msk.f32.gmra.mrb[10].mxu0 %vm719_vm1, %v13955_v31  ;;  %v13990_v31 = vld [vmem:[#allocation58_spill] sm:$0xff] }
 0x5e4   : > { %10129 = vmatprep.mubr.msk.f32.mxu0 %vm719_vm1, %v13957_v21 }
 0x5e7   : > { %10130 = vmatmul.mubr.msk.f32.gmra.mrb[12].mxu0 %vm719_vm1, %v13958_v63  ;;  %v13991_v63 = vld [vmem:[#allocation59_spill] sm:$0xff] }
 0x5e8   : > { %10132 = vmatprep.mubr.msk.f32.mxu0 %vm719_vm1, %v11921_v8 }
 0x5eb   : > { %10133 = vmatmul.mubr.msk.f32.gmra.mrb[14].mxu0 %vm719_vm1, %v13959_v13 }
 0x5ec   : > { %10135 = vmatprep.mubr.msk.f32.mxu0 %vm719_vm1, %v11940_v35  ;;  %v8915_v35 = vld [vmem:[%s13713_s6 + $0x1c] sm:$0xf] }
 0x5ef   : > { %10136 = vmatmul.mubr.msk.f32.gmra.mrb[16].mxu0 %vm719_vm1, %v11956_v17  ;;  %v13982_v17 = vld [vmem:[#allocation27_spill] sm:$0xff] }
 0x5f0   : > { %10138 = vmatprep.mubr.msk.f32.mxu0 %vm719_vm1, %v12700_v19 }
 0x5f3   : > { %10139 = vmatmul.mubr.msk.f32.gmra.mrb[18].mxu0 %vm719_vm1, %v12707_v14 }
 0x5f4   : > { %10143 = vmatprep.mubr.msk.f32.mxu0 %vm719_vm1, %v11588_v1  ;;  %v13978_v1 = vld [vmem:[#allocation20_spill] sm:$0xff] }
 0x5f7   : > { %10144 = vmatmul.mubr.msk.f32.vlgmr.msra.gmra.mrb[0].mxu0 %vm719_vm1, %v11607_v5  ;;  %v13980_v5 = vld [vmem:[#allocation21_spill] sm:$0xff] }
 0x5f8   : > { %10174 = vmatpush3.msk.msra.mxu0 %vm2179_vm8, %v8893_v38  ;;  %10146 = vmatprep.mubr.msk.f32.mxu0 %vm719_vm1, %v11602_v4  ;;  %v13979_v4 = vld [vmem:[#allocation19_spill] sm:$0xff] }
 0x5f9   : > { %10205 = vmatprep.subr.msk.mxu0 %vm2179_vm8, %v8915_v35  ;;  %v13997_v38 = vld [vmem:[#allocation67_spill] sm:$0xff] }
 0x5fb   : > { %10147 = vmatmul.mubr.msk.f32.gmra.mrb[2].mxu0 %vm719_vm1, %v11615_v9  ;;  %v13981_v9 = vld [vmem:[#allocation25_spill] sm:$0xff] }
 0x5fc   : > { %10149 = vmatprep.mubr.msk.f32.mxu0 %vm719_vm1, %v11640_v20  ;;  %v12748_v20 = vpop.trf.xlu0 }
 0x5ff   : > { %10150 = vmatmul.mubr.msk.f32.gmra.mrb[4].mxu0 %vm719_vm1, %v11653_v23  ;;  %v13983_v23 = vld [vmem:[#allocation47_spill] sm:$0xff] }
 0x600   : > { %10152 = vmatprep.mubr.msk.f32.mxu0 %vm719_vm1, %v11651_v22  ;;  %v12756_v22 = vpop.trf.xlu0 }
 0x603   : > { %10153 = vmatmul.mubr.msk.f32.gmra.mrb[6].mxu0 %vm719_vm1, %v11661_v25  ;;  %v8937_v25 = vld [vmem:[%s13712_s5 + $0x20] sm:$0xf] }
 0x604   : > { %10155 = vmatprep.mubr.msk.f32.mxu0 %vm719_vm1, %v11686_v34  ;;  %v13984_v34 = vld [vmem:[#allocation49_spill] sm:$0xff] }
 0x607   : > { %10156 = vmatmul.mubr.msk.f32.gmra.mrb[8].mxu0 %vm719_vm1, %v13978_v1  ;;  %v5304_v1 = vrot.slane %v12707_v14, 1 }
 0x608   : > { %10158 = vmatprep.mubr.msk.f32.mxu0 %vm719_vm1, %v13979_v4  ;;  %v12818_v4 = vld [vmem:[%s11893_s15 + $0x58] sm:$0x3]  ;;  %s499_s15 = sand.u32 1, %s11184_s22  }
 0x609   : > { %s8567_s3 = sshll.u32 %s499_s15, 2  ;;  %s8429_s1 = scalar_lea.sflag [#allocation4], %s499_s15 }
 0x60a   : > { %s501_s18 = scalar_lea.vmem [#allocation3], %s8567_s3  ;;  %s11120_s3 = scalar_lea.vmem %s11119_s25, 128 }
 0x60b   : > { %10159 = vmatmul.mubr.msk.f32.gmra.mrb[10].mxu0 %vm719_vm1, %v13980_v5  ;;  %s8444_s0 = sshll.u32 %s501_s18, 4  ;;  %s13651_s0 = int_to_ptr.vmem [resolvable:$true] %s8444_s0 }
 0x60c   : > { %10161 = vmatprep.mubr.msk.f32.mxu0 %vm719_vm1, %v13981_v9  ;;  %v13998_v9 = vld [vmem:[#allocation68_spill] sm:$0xff]  ;;  %s11114_s2 = scalar_lea.vmem %s13651_s0, 64  ;;  %p11121_p5 = scmp.lt.s32.totalorder %s13651_s0, %s11119_s25 }
 0x60d   : > { %p11115_p1 = scmp.ne.s32.totalorder %s13651_s0, %s11114_s2  ;;  %p11122_p6 = scmp.lt.s32.totalorder %s11120_s3, %s11114_s2 }
 0x60f   : > { %10162 = vmatmul.mubr.msk.f32.gmra.mrb[12].mxu0 %vm719_vm1, %v13982_v17  ;;  %p11116_p2 = pnand %p11115_p1, %p11344_p3  ;;  %p11123_p7 = por %p11122_p6, %p11121_p5 }
 0x610   : > { %10164 = vmatprep.mubr.msk.f32.mxu0 %vm719_vm1, %v11744_v58  ;;  %v13986_v58 = vld [vmem:[#allocation52_spill] sm:$0xff] }
 0x611   : > { %p11117_p4 = pneg %p11116_p2 }
 0x613   : > { %10165 = vmatmul.mubr.msk.f32.gmra.mrb[14].mxu0 %vm719_vm1, %v11761_v6  ;;  %v13987_v6 = vld [vmem:[#allocation53_spill] sm:$0xff]  ;;  %p11124_p9 = pnand %p11123_p7, %p11117_p4 }
 0x614   : > { %10167 = vmatprep.mubr.msk.f32.mxu0 %vm719_vm1, %v12143_v43  ;;  %v13985_v43 = vld [vmem:[#allocation50_spill] sm:$0xff] }
 0x617   : > { %10168 = vmatmul.mubr.msk.f32.gmra.mrb[16].mxu0 %vm719_vm1, %v12164_v29  ;;  %v13988_v29 = vld [vmem:[#allocation55_spill] sm:$0xff] }
 0x618   : > { %10170 = vmatprep.mubr.msk.f32.mxu0 %vm719_vm1, %v12748_v20 }
 0x61b   : > { %10171 = vmatmul.mubr.msk.f32.gmra.mrb[18].mxu0 %vm719_vm1, %v12756_v22 }
 0x61c   : > { %10175 = vmatprep.mubr.msk.f32.mxu0 %vm719_vm1, %v13983_v23  ;;  %v13999_v23 = vld [vmem:[#allocation83_spill] sm:$0xff] }
 0x61f   : > { %10176 = vmatmul.mubr.msk.f32.vlgmr.msra.gmra.mrb[0].mxu0 %vm719_vm1, %v13984_v34  ;;  %v5306_v34 = vrot.slane %v12818_v4, 1 }
 0x620   : > { %10206 = vmatpush3.msk.msra.mxu0 %vm2179_vm8, %v8915_v35  ;;  %10178 = vmatprep.mubr.msk.f32.mxu0 %vm719_vm1, %v13985_v43  ;;  %v5303_v35 = vrot.slane %v12700_v19, 1 }
 0x621   : > { %10237 = vmatprep.subr.msk.mxu0 %vm2179_vm8, %v8937_v25 }
 0x622   : > { %v5305_v43 = vsel %vm2588_vm10, %v5303_v35, %v5304_v1  ;;  %v14004_v35 = vld [vmem:[#allocation72_spill] sm:$0xff] }
 0x623   : > { %10179 = vmatmul.mubr.msk.f32.gmra.mrb[2].mxu0 %vm719_vm1, %v13986_v58 }
 0x624   : > { %10181 = vmatprep.mubr.msk.f32.mxu0 %vm719_vm1, %v13987_v6  ;;  %v14000_v6 = vld [vmem:[#allocation29_spill] sm:$0xff] }
 0x627   : > { %v12775_v8 = vpop.f32.mrb[8].mxu1  ;;  %10182 = vmatmul.mubr.msk.f32.gmra.mrb[4].mxu0 %vm719_vm1, %v13988_v29 }
 0x628   : > { %v12779_v24 = vpop.f32.mrb[9].mxu1  ;;  %10184 = vmatprep.mubr.msk.f32.mxu0 %vm719_vm1, %v13989_v53  ;;  %v5307_v53 = vsel %vm2588_vm10, %v5304_v1, %v5306_v34  ;;  %v14005_v1 = vld [vmem:[#allocation73_spill] sm:$0xff]  ;;  %v14008_v34 = vld [vmem:[#allocation76_spill] sm:$0xff] }
 0x62b   : > { %v12783_v57 = vpop.f32.mrb[10].mxu1  ;;  %10185 = vmatmul.mubr.msk.f32.gmra.mrb[6].mxu0 %vm719_vm1, %v13990_v31 }
 0x62c   : > { %v12787_v21 = vpop.f32.mrb[11].mxu1  ;;  %10187 = vmatprep.mubr.msk.f32.mxu0 %vm719_vm1, %v13991_v63 }
 0x62f   : > { %v12791_v13 = vpop.f32.mrb[12].mxu1  ;;  %10188 = vmatmul.mubr.msk.f32.gmra.mrb[8].mxu0 %vm719_vm1, %v13992_v2  ;;  %v14001_v2 = vld [vmem:[#allocation69_spill] sm:$0xff] }
 0x630   : > { %v12795_v46 = vpop.f32.mrb[13].mxu1  ;;  %10190 = vmatprep.mubr.msk.f32.mxu0 %vm719_vm1, %v13993_v33  ;;  %v8959_v33 = vld [vmem:[%s13713_s6 + $0x20] sm:$0xf] }
 0x633   : > { %v12799_v10 = vpop.f32.mrb[14].mxu1  ;;  %10191 = vmatmul.mubr.msk.f32.gmra.mrb[10].mxu0 %vm719_vm1, %v13994_v32 }
 0x634   : > { %v12803_v3 = vpop.f32.mrb[15].mxu1  ;;  %10193 = vmatprep.mubr.msk.f32.mxu0 %vm719_vm1, %v13995_v47  ;;  %v14002_v47 = vld [vmem:[#allocation70_spill] sm:$0xff] }
 0x637   : > { %v12807_v26 = vpop.f32.mrb[16].mxu1  ;;  %10194 = vmatmul.mubr.msk.f32.gmra.mrb[12].mxu0 %vm719_vm1, %v13996_v61 }
 0x638   : > { %v12811_v28 = vpop.f32.mrb[17].mxu1  ;;  %10196 = vmatprep.mubr.msk.f32.mxu0 %vm719_vm1, %v13997_v38  ;;  %v14003_v38 = vld [vmem:[#allocation71_spill] sm:$0xff] }
 0x63b   : > { %v12820_v5 = vpop.f32.mrb[18].mxu1  ;;  %10197 = vmatmul.mubr.msk.f32.gmra.mrb[14].mxu0 %vm719_vm1, %v13998_v9  ;;  %v14006_v9 = vld [vmem:[#allocation74_spill] sm:$0xff] }
 0x63c   : > { %v12824_v17 = vpop.f32.mrb[19].mxu1  ;;  %10199 = vmatprep.mubr.msk.f32.mxu0 %vm719_vm1, %v13999_v23  ;;  %v14007_v23 = vld [vmem:[#allocation75_spill] sm:$0xff] }
 0x63f   : > { %v12830_v58 = vpop.f32.mrb[20].mxu1  ;;  %10200 = vmatmul.mubr.msk.f32.gmra.mrb[16].mxu0 %vm719_vm1, %v14000_v6  ;;  %v14009_v6 = vld [vmem:[#allocation77_spill] sm:$0xff] }
 0x640   : > { %v12834_v29 = vpop.f32.mrb[21].mxu1  ;;  %10202 = vmatprep.mubr.msk.f32.mxu0 %vm719_vm1, %v5305_v43 }
 0x643   : > { %v12838_v31 = vpop.f32.mrb[22].mxu1  ;;  %10203 = vmatmul.mubr.msk.f32.gmra.mrb[18].mxu0 %vm719_vm1, %v5307_v53  ;;  %v14010_v53 = vld [vmem:[#allocation78_spill] sm:$0xff] }
 0x644   : > { %v12841_v63 = vpop.f32.mrb[23].mxu1  ;;  %10207 = vmatprep.mubr.msk.f32.mxu0 %vm719_vm1, %v14001_v2  ;;  %v14011_v2 = vld [vmem:[#allocation79_spill] sm:$0xff] }
 0x647   : > { %v12848_v32 = vpop.f32.mrb[24].mxu1  ;;  %10208 = vmatmul.mubr.msk.f32.vlgmr.msra.gmra.mrb[0].mxu0 %vm719_vm1, %v14002_v47  ;;  %v14012_v47 = vld [vmem:[#allocation80_spill] sm:$0xff] }
 0x648   : > { %10238 = vmatpush3.msk.msra.mxu0 %vm2179_vm8, %v8937_v25  ;;  %v12853_v61 = vpop.f32.mrb[25].mxu1  ;;  %10210 = vmatprep.mubr.msk.f32.mxu0 %vm719_vm1, %v14003_v38  ;;  %v14013_v38 = vld [vmem:[#allocation81_spill] sm:$0xff] }
 0x649   : > { %10269 = vmatprep.subr.msk.mxu0 %vm2179_vm8, %v8959_v33 }
 0x64b   : > { %10211 = vmatmul.mubr.msk.f32.gmra.mrb[2].mxu0 %vm719_vm1, %v14004_v35  ;;  %v14014_v35 = vld [vmem:[#allocation82_spill] sm:$0xff] }
 0x64c   : > { %10213 = vmatprep.mubr.msk.f32.mxu0 %vm719_vm1, %v14005_v1  ;;  %v5503_v1 = vrot.slane %v12748_v20, 1 }
 0x64f   : > { %10214 = vmatmul.mubr.msk.f32.gmra.mrb[4].mxu0 %vm719_vm1, %v14006_v9  ;;  %v5504_v9 = vrot.slane %v12756_v22, 1 }
 0x650   : > { %10216 = vmatprep.mubr.msk.f32.mxu0 %vm719_vm1, %v14007_v23  ;;  %v2067_v23 = vpop.trf.xlu0 }
 0x653   : > { %v12866_v25 = vpop.f32.mrb[26].mxu1  ;;  %10217 = vmatmul.mubr.msk.f32.gmra.mrb[6].mxu0 %vm719_vm1, %v14008_v34  ;;  %v5506_v34 = vrot.slane %v2067_v23, 1 }
 0x654   : > { %v12870_v43 = vpop.f32.mrb[27].mxu1  ;;  %10219 = vmatprep.mubr.msk.f32.mxu0 %vm719_vm1, %v14009_v6 }
 0x655   : > { %v5507_v6 = vsel %vm2588_vm10, %v5504_v9, %v5506_v34 }
 0x657   : > { %10220 = vmatmul.mubr.msk.f32.gmra.mrb[8].mxu0 %vm719_vm1, %v14010_v53 }
 0x658   : > { %10222 = vmatprep.mubr.msk.f32.mxu0 %vm719_vm1, %v14011_v2 }
 0x65b   : > { %10223 = vmatmul.mubr.msk.f32.gmra.mrb[10].mxu0 %vm719_vm1, %v14012_v47 }
 0x65c   : > { %10225 = vmatprep.mubr.msk.f32.mxu0 %vm719_vm1, %v14013_v38 }
 0x65f   : > { %10226 = vmatmul.mubr.msk.f32.gmra.mrb[12].mxu0 %vm719_vm1, %v12325_v42  ;;  %v5505_v42 = vsel %vm2588_vm10, %v5503_v1, %v5504_v9 }
 0x660   : > { %10228 = vmatprep.mubr.msk.f32.mxu0 %vm719_vm1, %v14014_v35 }
 0x663   : > { %10229 = vmatmul.mubr.msk.f32.gmra.mrb[14].mxu0 %vm719_vm1, %v12347_v49  ;;  %v5702_v49 = vrot.slane %v12700_v19, 2  ;;  %v13042_v19 = vld [vmem:[%s13714_s7] ss:$0 sm:$0xff] }
 0x664   : > { %10231 = vmatprep.mubr.msk.f32.mxu0 %vm719_vm1, %v12529_v41  ;;  %v5901_v41 = vrot.slane %v12748_v20, 2 }
 0x667   : > { %10232 = vmatmul.mubr.msk.f32.gmra.mrb[16].mxu0 %vm719_vm1, %v12541_v48  ;;  %v5902_v48 = vrot.slane %v12756_v22, 2  ;;  %v13048_v22 = vld [vmem:[%s13715_s8] ss:$0 sm:$0xff] }
 0x668   : > { %10234 = vmatprep.mubr.msk.f32.mxu0 %vm719_vm1, %v5505_v42 }
 0x66b   : > { %10235 = vmatmul.mubr.msk.f32.gmra.mrb[18].mxu0 %vm719_vm1, %v5507_v6 }
 0x66c   : > { %10239 = vmatprep.mubr.msk.f32.mxu0 %vm719_vm1, %v12378_v54  ;;  %v5703_v54 = vrot.slane %v12707_v14, 2 }
 0x66f   : > { %10240 = vmatmul.mubr.msk.f32.vlgmr.msra.gmra.mrb[0].mxu0 %vm719_vm1, %v12398_v36  ;;  %v5705_v36 = vrot.slane %v12818_v4, 2 }
 0x670   : > { %10270 = vmatpush3.msk.msra.mxu0 %vm2179_vm8, %v8959_v33  ;;  %10242 = vmatprep.mubr.msk.f32.mxu0 %vm719_vm1, %v12402_v40  ;;  %v5704_v40 = vsel %vm3159_vm9, %v5702_v49, %v5703_v54 }
 0x673   : > { %10243 = vmatmul.mubr.msk.f32.gmra.mrb[2].mxu0 %vm719_vm1, %v12417_v0  ;;  %v14015_v0 = vld [vmem:[#allocation31_spill] sm:$0xff] }
 0x674   : > { %10245 = vmatprep.mubr.msk.f32.mxu0 %vm719_vm1, %v12421_v7  ;;  %v5706_v7 = vsel %vm3159_vm9, %v5703_v54, %v5705_v36 }
 0x677   : > { %10246 = vmatmul.mubr.msk.f32.gmra.mrb[4].mxu0 %vm719_vm1, %v12434_v30  ;;  %v14016_v30 = vld [vmem:[#allocation11_spill] sm:$0xff] }
 0x678   : > { %10248 = vmatprep.mubr.msk.f32.mxu0 %vm719_vm1, %v12438_v27  ;;  %v14017_v27 = vld [vmem:[#allocation13_spill] sm:$0xff] }
 0x67b   : > { %10249 = vmatmul.mubr.msk.f32.gmra.mrb[6].mxu0 %vm719_vm1, %v12451_v12  ;;  %v14018_v12 = vld [vmem:[#allocation12_spill] sm:$0xff] }
 0x67c   : > { %10251 = vmatprep.mubr.msk.f32.mxu0 %vm719_vm1, %v12455_v62  ;;  %v14019_v62 = vld [vmem:[#allocation14_spill] sm:$0xff] }
 0x67f   : > { %10252 = vmatmul.mubr.msk.f32.gmra.mrb[8].mxu0 %vm719_vm1, %v12468_v18  ;;  %v14020_v18 = vld [vmem:[#allocation15_spill] sm:$0xff] }
 0x680   : > { %10254 = vmatprep.mubr.msk.f32.mxu0 %vm719_vm1, %v12472_v52  ;;  %v14021_v52 = vld [vmem:[#allocation17_spill] sm:$0xff] }
 0x683   : > { %10255 = vmatmul.mubr.msk.f32.gmra.mrb[10].mxu0 %vm719_vm1, %v12485_v51  ;;  %v14022_v51 = vld [vmem:[#allocation16_spill] sm:$0xff] }
 0x684   : > { %10257 = vmatprep.mubr.msk.f32.mxu0 %vm719_vm1, %v12489_v50  ;;  %v14023_v50 = vld [vmem:[#allocation18_spill] sm:$0xff] }
 0x687   : > { %10258 = vmatmul.mubr.msk.f32.gmra.mrb[12].mxu0 %vm719_vm1, %v12502_v55  ;;  %v14024_v55 = vld [vmem:[#allocation24_spill] sm:$0xff] }
 0x688   : > { %10260 = vmatprep.mubr.msk.f32.mxu0 %vm719_vm1, %v12506_v56  ;;  %v14025_v56 = vld [vmem:[#allocation26_spill] sm:$0xff] }
 0x68b   : > { %10261 = vmatmul.mubr.msk.f32.gmra.mrb[14].mxu0 %vm719_vm1, %v12523_v59  ;;  %v14026_v59 = vld [vmem:[#allocation28_spill] sm:$0xff] }
 0x68c   : > { %10263 = vmatprep.mubr.msk.f32.mxu0 %vm719_vm1, %v12595_v45  ;;  %v5904_v45 = vrot.slane %v2067_v23, 2 }
 0x68f   : > { %10264 = vmatmul.mubr.msk.f32.gmra.mrb[16].mxu0 %vm719_vm1, %v14015_v0 }
 0x690   : > { %10266 = vmatprep.mubr.msk.f32.mxu0 %vm719_vm1, %v5704_v40 }
 0x693   : > { %10267 = vmatmul.mubr.msk.f32.gmra.mrb[18].mxu0 %vm719_vm1, %v5706_v7 }
 0x694   : > { %10271 = vmatprep.mubr.msk.f32.mxu0 %vm719_vm1, %v14016_v30 }
 0x697   : > { %10272 = vmatmul.mubr.msk.f32.vlgmr.msra.gmra.mrb[0].mxu0 %vm719_vm1, %v14017_v27 }
 0x698   : > { %10274 = vmatprep.mubr.msk.f32.mxu0 %vm719_vm1, %v14018_v12 }
 0x69b   : > { %10275 = vmatmul.mubr.msk.f32.gmra.mrb[2].mxu0 %vm719_vm1, %v14019_v62 }
 0x69c   : > { %10277 = vmatprep.mubr.msk.f32.mxu0 %vm719_vm1, %v14020_v18 }
 0x69f   : > { %10278 = vmatmul.mubr.msk.f32.gmra.mrb[4].mxu0 %vm719_vm1, %v14021_v52 }
 0x6a0   : > { %10280 = vmatprep.mubr.msk.f32.mxu0 %vm719_vm1, %v14022_v51 }
 0x6a3   : > { %10281 = vmatmul.mubr.msk.f32.gmra.mrb[6].mxu0 %vm719_vm1, %v14023_v50 }
 0x6a4   : > { %10283 = vmatprep.mubr.msk.f32.mxu0 %vm719_vm1, %v13972_v16  ;;  %v5903_v16 = vsel %vm3159_vm9, %v5901_v41, %v5902_v48 }
 0x6a7   : > { %10284 = vmatmul.mubr.msk.f32.gmra.mrb[8].mxu0 %vm719_vm1, %v14024_v55 }
 0x6a8   : > { %10286 = vmatprep.mubr.msk.f32.mxu0 %vm719_vm1, %v13974_v15  ;;  %v13032_v15 = vld [vmem:[%s13716_s9] sm:$0xf] }
 0x6ab   : > { %10287 = vmatmul.mubr.msk.f32.gmra.mrb[10].mxu0 %vm719_vm1, %v14025_v56 }
 0x6ac   : > { %10289 = vmatprep.mubr.msk.f32.mxu0 %vm719_vm1, %v14026_v59 }
 0x6af   : > { %10290 = vmatmul.mubr.msk.f32.gmra.mrb[12].mxu0 %vm719_vm1, %v13977_v39  ;;  %v14027_v39 = vmov 0.0  }
 0x6b0   : > { %10292 = vmatprep.mubr.msk.f32.mxu0 %vm719_vm1, %v12536_v11  ;;  %v5905_v11 = vsel %vm3159_vm9, %v5902_v48, %v5904_v45  ;;  %6254 = vst.msk [vmem:[#allocation2] sm:$0x1] %vm6253_vm11, %v14027_v39  ;;  %6255 = vst.msk [vmem:[#allocation2 + $0x18] sm:$0x1] %vm6253_vm11, %v14027_v39 }
 0x6b1   : > { %6256 = vst.msk [vmem:[#allocation2 + $0x30] sm:$0x1] %vm6253_vm11, %v14027_v39  ;;  %6257 = vst.msk [vmem:[#allocation2 + $0x48] sm:$0x1] %vm6253_vm11, %v14027_v39 }
 0x6b2   : > { %6258 = vst.msk [vmem:[#allocation2 + $0x60] sm:$0x1] %vm6253_vm11, %v14027_v39  ;;  %6259 = vst.msk [vmem:[#allocation2 + $0x78] sm:$0x1] %vm6253_vm11, %v14027_v39 }
 0x6b3   : > { %10293 = vmatmul.mubr.msk.f32.gmra.mrb[14].mxu0 %vm719_vm1, %v12552_v37  ;;  %6260 = vst.msk [vmem:[#allocation2 + $0x90] sm:$0x1] %vm6253_vm11, %v14027_v39  ;;  %6261 = vst.msk [vmem:[#allocation2 + $0xa8] sm:$0x1] %vm6253_vm11, %v14027_v39  ;;  %v8984_v37 = vld [vmem:[%s13716_s9 + $0x4] sm:$0xf] }
 0x6b4   : > { %10295 = vmatprep.mubr.msk.f32.mxu0 %vm719_vm1, %v12651_v60  ;;  %6262 = vst.msk [vmem:[#allocation2 + $0xc0] sm:$0x1] %vm6253_vm11, %v14027_v39  ;;  %6263 = vst.msk [vmem:[#allocation2 + $0xd8] sm:$0x1] %vm6253_vm11, %v14027_v39  ;;  %10301 = vmatprep.subr.msk.mxu1 %vm2179_vm8, %v8984_v37  ;;  %v13037_v60 = vstv %s8983_s27 }
 0x6b5   : > { %6264 = vst.msk [vmem:[#allocation2 + $0x11] sm:$0x1] %vm6253_vm11, %v14027_v39  ;;  %6265 = vst.msk [vmem:[#allocation2 + $0x29] sm:$0x1] %vm6253_vm11, %v14027_v39  ;;  %10302 = vmatpush3.msk.msra.mxu1 %vm2179_vm8, %v8984_v37  ;;  %vm6183_vm12 = vcmp.ge.s32.totalorder %v13037_v60, 0  ;;  %vm6193_vm13 = vcmp.lt.s32.totalorder %v13037_v60, 16 }
 0x6b6   : > { %6266 = vst.msk [vmem:[#allocation2 + $0x41] sm:$0x1] %vm6253_vm11, %v14027_v39  ;;  %6267 = vst.msk [vmem:[#allocation2 + $0x59] sm:$0x1] %vm6253_vm11, %v14027_v39  ;;  %10327 = vmatprep.subr.msk.mxu1 %vm2179_vm8, %v13032_v15  ;;  %v6174_v53 = vadd.s32 1, %v13037_v60  ;;  %v6175_v23 = vadd.s32 2, %v13037_v60 }
 0x6b7   : > { %10296 = vmatmul.mubr.msk.f32.gmra.mrb[16].mxu0 %vm719_vm1, %v12656_v44  ;;  %6268 = vst.msk [vmem:[#allocation2 + $0x71] sm:$0x1] %vm6253_vm11, %v14027_v39  ;;  %6269 = vst.msk [vmem:[#allocation2 + $0x89] sm:$0x1] %vm6253_vm11, %v14027_v39  ;;  %v6176_v62 = vadd.s32 3, %v13037_v60 }
 0x6b8   : > { %10298 = vmatprep.mubr.msk.f32.mxu0 %vm719_vm1, %v5903_v16  ;;  %6270 = vst.msk [vmem:[#allocation2 + $0xa1] sm:$0x1] %vm6253_vm11, %v14027_v39  ;;  %6271 = vst.msk [vmem:[#allocation2 + $0xb9] sm:$0x1] %vm6253_vm11, %v14027_v39  ;;  %vm6184_vm15 = vcmp.ge.s32.totalorder %v6174_v53, 0  ;;  %vm6194_vm0 = vcmp.lt.s32.totalorder %v6174_v53, 16 }
 0x6b9   : > { %6272 = vst.msk [vmem:[#allocation2 + $0xd1] sm:$0x1] %vm6253_vm11, %v14027_v39  ;;  %6273 = vst.msk [vmem:[#allocation2 + $0xe9] sm:$0x1] %vm6253_vm11, %v14027_v39  ;;  %vm6185_vm3 = vcmp.ge.s32.totalorder %v6175_v23, 0  ;;  %vm6195_vm4 = vcmp.lt.s32.totalorder %v6175_v23, 16 }
 0x6ba   : > { %vm13058_vm14 = vmand %vm6183_vm12, %vm6193_vm13  ;;  %v6177_v16 = vadd.s32 4, %v13037_v60  ;;  %vm6186_vm6 = vcmp.ge.s32.totalorder %v6176_v62, 0  ;;  %vm6196_vm7 = vcmp.lt.s32.totalorder %v6176_v62, 16 }
 0x6bb   : > { %10299 = vmatmul.mubr.msk.f32.gmra.mrb[18].mxu0 %vm719_vm1, %v5905_v11  ;;  %vm13074_vm2 = vmand %vm6184_vm15, %vm6194_vm0 }
 0x6bc   : > { %vm13092_vm5 = vmand %vm6185_vm3, %vm6195_vm4  ;;  %vm6187_vm10 = vcmp.ge.s32.totalorder %v6177_v16, 0  ;;  %vm6197_vm11 = vcmp.lt.s32.totalorder %v6177_v16, 16 }
 0x6bd   : > { %vm13109_vm9 = vmand %vm6186_vm6, %vm6196_vm7 }
 0x6be   : > { %vm13137_vm12 = vmand %vm6187_vm10, %vm6197_vm11 }
 0x76a   : > { %v10273_v44 = vpop.f32.mrb[0].mxu0 }
 0x76b   : > { %v10543_v14 = vadd.f32 %v10273_v44, %v12775_v8  ;;  %v5979_v20 = vpop.f32.mrb[1].mxu0 }
 0x76c   : > { %v10544_v4 = vadd.f32 %v5979_v20, %v12779_v24 }
 0x76d   : > { %v6106_v33 = vmul.f32 %v10543_v14, %v13042_v19 }
 0x76e   : > { %v6105_v2 = vmul.f32 %v10544_v4, %v13042_v19  ;;  %v10276_v47 = vpop.f32.mrb[2].mxu0 }
 0x76f   : > { %v6133_v8 = vadd.f32 %v13048_v22, %v6106_v33  ;;  %v10545_v38 = vadd.f32 %v10276_v47, %v12783_v57  ;;  %v5989_v35 = vpop.f32.mrb[3].mxu0 }
 0x770   : > { %v6132_v24 = vadd.f32 %v13048_v22, %v6105_v2  ;;  %v10546_v9 = vadd.f32 %v5989_v35, %v12787_v21  ;;  %v6178_v35 = vadd.s32 5, %v13037_v60 }
 0x771   : > { %v6153_v34 = vmax.f32 %v6133_v8, 0.0  ;;  %v6108_v42 = vmul.f32 %v10545_v38, %v13042_v19 }
 0x772   : > { %v6152_v6 = vmax.f32 %v6132_v24, 0.0  ;;  %v6107_v49 = vmul.f32 %v10546_v9, %v13042_v19  ;;  %v10279_v57 = vpop.f32.mrb[4].mxu0  ;;  %v13122_v24 = vld [vmem:[%s13716_s9 + $0x8] sm:$0xf]  ;;  %vm6188_vm13 = vcmp.ge.s32.totalorder %v6178_v35, 0 }
 0x773   : > { %v6234_v54 = vsel %vm13058_vm14, %v6153_v34, 0.0  ;;  %v6135_v36 = vadd.f32 %v13048_v22, %v6108_v42  ;;  %v10547_v40 = vadd.f32 %v10279_v57, %v12791_v13  ;;  %v5999_v0 = vpop.f32.mrb[5].mxu0 }
 0x774   : > { %6275 = vst.msk [vmem:[#allocation2 + $0x9] sm:$0xff] %vm719_vm1, %v6234_v54  ;;  %v6233_v21 = vsel %vm13058_vm14, %v6152_v6, 0.0  ;;  %v6134_v30 = vadd.f32 %v13048_v22, %v6107_v49  ;;  %v10548_v27 = vadd.f32 %v5999_v0, %v12795_v46  ;;  %vm6198_vm14 = vcmp.lt.s32.totalorder %v6178_v35, 16 }
 0x775   : > { %6274 = vst.msk [vmem:[#allocation2 + $0x1] sm:$0xff] %vm719_vm1, %v6233_v21  ;;  %v6155_v12 = vmax.f32 %v6135_v36, 0.0  ;;  %v6110_v13 = vmul.f32 %v10547_v40, %v13042_v19  ;;  %vm13164_vm15 = vmand %vm6188_vm13, %vm6198_vm14 }
 0x776   : > { %v6154_v18 = vmax.f32 %v6134_v30, 0.0  ;;  %v6109_v52 = vmul.f32 %v10548_v27, %v13042_v19  ;;  %v10282_v51 = vpop.f32.mrb[6].mxu0 }
 0x777   : > { %v6236_v50 = vsel %vm13074_vm2, %v6155_v12, 0.0  ;;  %v6137_v55 = vadd.f32 %v13048_v22, %v6110_v13  ;;  %v10549_v56 = vadd.f32 %v10282_v51, %v12799_v10  ;;  %v6009_v46 = vpop.f32.mrb[7].mxu0 }
 0x778   : > { %6277 = vst.msk [vmem:[#allocation2 + $0x21] sm:$0xff] %vm719_vm1, %v6236_v50  ;;  %v6235_v59 = vsel %vm13074_vm2, %v6154_v18, 0.0  ;;  %v6136_v48 = vadd.f32 %v13048_v22, %v6109_v52  ;;  %v10550_v45 = vadd.f32 %v6009_v46, %v12803_v3 }
 0x779   : > { %6276 = vst.msk [vmem:[#allocation2 + $0x19] sm:$0xff] %vm719_vm1, %v6235_v59  ;;  %v6157_v10 = vmax.f32 %v6137_v55, 0.0  ;;  %v6112_v11 = vmul.f32 %v10549_v56, %v13042_v19  ;;  %v6180_v59 = vadd.s32 7, %v13037_v60 }
 0x77a   : > { %v6156_v39 = vmax.f32 %v6136_v48, 0.0  ;;  %v6111_v37 = vmul.f32 %v10550_v45, %v13042_v19  ;;  %v10285_v44 = vpop.f32.mrb[8].mxu0 }
 0x77b   : > { %v6238_v14 = vsel %vm13092_vm5, %v6157_v10, 0.0  ;;  %v6139_v20 = vadd.f32 %v13048_v22, %v6112_v11  ;;  %v10551_v3 = vadd.f32 %v10285_v44, %v12807_v26  ;;  %v6019_v4 = vpop.f32.mrb[9].mxu0  ;;  %v6312_v1 = vld [vmem:[#allocation2 + $0x9] sm:$0xff]  ;;  %vm6190_vm4 = vcmp.ge.s32.totalorder %v6180_v59, 0 }
 0x77c   : > { %6279 = vst.msk [vmem:[#allocation2 + $0x39] sm:$0xff] %vm719_vm1, %v6238_v14  ;;  %v6237_v33 = vsel %vm13092_vm5, %v6156_v39, 0.0  ;;  %v6138_v2 = vadd.f32 %v13048_v22, %v6111_v37  ;;  %v10552_v47 = vadd.f32 %v6019_v4, %v12811_v28  ;;  %v6311_v8 = vld [vmem:[#allocation2 + $0x1] sm:$0xff]  ;;  %v6181_v4 = vadd.s32 8, %v13037_v60 }
 0x77d   : > { %6278 = vst.msk [vmem:[#allocation2 + $0x31] sm:$0xff] %vm719_vm1, %v6237_v33  ;;  %v6159_v38 = vmax.f32 %v6139_v20, 0.0  ;;  %v6114_v26 = vmul.f32 %v10551_v3, %v13042_v19  ;;  %10303 = vmatprep.mubr.msk.f32.mxu1 %vm719_vm1, %v6311_v8  ;;  %vm6200_vm5 = vcmp.lt.s32.totalorder %v6180_v59, 16 }
 0x77e   : > { %v6158_v9 = vmax.f32 %v6138_v2, 0.0  ;;  %v6113_v28 = vmul.f32 %v10552_v47, %v13042_v19  ;;  %v10288_v23 = vpop.f32.mrb[10].mxu0  ;;  %10304 = vmatmul.mubr.msk.f32.vlgmr.msra.gmra.mrb[28].mxu1 %vm719_vm1, %v6312_v1  ;;  %vm13215_vm6 = vmand %vm6190_vm4, %vm6200_vm5  ;;  %vm6191_vm7 = vcmp.ge.s32.totalorder %v6181_v4, 0 }
 0x77f   : > { %v6240_v34 = vsel %vm13109_vm9, %v6159_v38, 0.0  ;;  %v6141_v42 = vadd.f32 %v13048_v22, %v6114_v26  ;;  %v10553_v6 = vadd.f32 %v10288_v23, %v12820_v5  ;;  %10328 = vmatpush3.msk.msra.mxu1 %vm2179_vm8, %v13032_v15  ;;  %v6029_v49 = vpop.f32.mrb[11].mxu0  ;;  %v6179_v15 = vadd.s32 6, %v13037_v60  ;;  %v13152_v7 = vld [vmem:[#allocation2 + $0x21] sm:$0xff] }
 0x780   : > { %6281 = vst.msk [vmem:[#allocation2 + $0x51] sm:$0xff] %vm719_vm1, %v6240_v34  ;;  %v6239_v57 = vsel %vm13109_vm9, %v6158_v9, 0.0  ;;  %v6140_v36 = vadd.f32 %v13048_v22, %v6113_v28  ;;  %v10554_v40 = vadd.f32 %v6029_v49, %v12824_v17  ;;  %v13143_v5 = vld [vmem:[#allocation2 + $0x19] sm:$0xff]  ;;  %10353 = vmatprep.subr.msk.mxu1 %vm2179_vm8, %v13122_v24  ;;  %vm6201_vm9 = vcmp.lt.s32.totalorder %v6181_v4, 16  ;;  %v13359_v9 = vld [vmem:[#allocation2 + $0x22] sm:$0xff] }
 0x781   : > { %6280 = vst.msk [vmem:[#allocation2 + $0x49] sm:$0xff] %vm719_vm1, %v6239_v57  ;;  %v6161_v0 = vmax.f32 %v6141_v42, 0.0  ;;  %v6116_v21 = vmul.f32 %v10553_v6, %v13042_v19  ;;  %10306 = vmatprep.mubr.msk.f32.mxu1 %vm719_vm1, %v13143_v5  ;;  %vm6189_vm0 = vcmp.ge.s32.totalorder %v6179_v15, 0  ;;  %vm6199_vm2 = vcmp.lt.s32.totalorder %v6179_v15, 16  ;;  %vm13241_vm10 = vmand %vm6191_vm7, %vm6201_vm9 }
 0x782   : > { %v6160_v17 = vmax.f32 %v6140_v36, 0.0  ;;  %v6115_v30 = vmul.f32 %v10554_v40, %v13042_v19  ;;  %v10291_v27 = vpop.f32.mrb[12].mxu0  ;;  %10307 = vmatmul.mubr.msk.f32.gmra.mrb[30].mxu1 %vm719_vm1, %v13152_v7  ;;  %vm13190_vm3 = vmand %vm6189_vm0, %vm6199_vm2  ;;  %v6182_v6 = vadd.s32 9, %v13037_v60 }
 0x783   : > { %v6242_v12 = vsel %vm13137_vm12, %v6161_v0, 0.0  ;;  %v6143_v13 = vadd.f32 %v13048_v22, %v6116_v21  ;;  %v10555_v62 = vadd.f32 %v10291_v27, %v12830_v58  ;;  %v6039_v18 = vpop.f32.mrb[13].mxu0  ;;  %v13177_v41 = vld [vmem:[#allocation2 + $0x39] sm:$0xff] }
 0x784   : > { %6283 = vst.msk [vmem:[#allocation2 + $0x69] sm:$0xff] %vm719_vm1, %v6242_v12  ;;  %v6241_v52 = vsel %vm13137_vm12, %v6160_v17, 0.0  ;;  %v6142_v50 = vadd.f32 %v13048_v22, %v6115_v30  ;;  %v10556_v55 = vadd.f32 %v6039_v18, %v12834_v29  ;;  %v13170_v56 = vld [vmem:[#allocation2 + $0x31] sm:$0xff]  ;;  %vm6192_vm11 = vcmp.ge.s32.totalorder %v6182_v6, 0 }
 0x785   : > { %6282 = vst.msk [vmem:[#allocation2 + $0x61] sm:$0xff] %vm719_vm1, %v6241_v52  ;;  %v6163_v58 = vmax.f32 %v6143_v13, 0.0  ;;  %v6118_v46 = vmul.f32 %v10555_v62, %v13042_v19  ;;  %10309 = vmatprep.mubr.msk.f32.mxu1 %vm719_vm1, %v13170_v56  ;;  %vm6202_vm12 = vcmp.lt.s32.totalorder %v6182_v6, 16  ;;  %v13304_v44 = vld [vmem:[#allocation2 + $0x38] sm:$0xff] }
 0x786   : > { %v6162_v48 = vmax.f32 %v6142_v50, 0.0  ;;  %v6117_v45 = vmul.f32 %v10556_v55, %v13042_v19  ;;  %v10294_v16 = vpop.f32.mrb[14].mxu0  ;;  %10310 = vmatmul.mubr.msk.f32.gmra.mrb[32].mxu1 %vm719_vm1, %v13177_v41  ;;  %vm6212_vm13 = vmand %vm6192_vm11, %vm6202_vm12 }
 0x787   : > { %v6244_v29 = vsel %vm13164_vm15, %v6163_v58, 0.0  ;;  %v6145_v10 = vadd.f32 %v13048_v22, %v6118_v46  ;;  %v10557_v11 = vadd.f32 %v10294_v16, %v12838_v31  ;;  %v6049_v39 = vpop.f32.mrb[15].mxu0  ;;  %v13203_v53 = vld [vmem:[#allocation2 + $0x51] sm:$0xff]  ;;  %v6294_v16 = vld [vmem:[#allocation2] sm:$0xff] }
 0x788   : > { %6285 = vst.msk [vmem:[#allocation2 + $0x81] sm:$0xff] %vm719_vm1, %v6244_v29  ;;  %v6243_v37 = vsel %vm13164_vm15, %v6162_v48, 0.0  ;;  %v6144_v14 = vadd.f32 %v13048_v22, %v6117_v45  ;;  %v10558_v20 = vadd.f32 %v6049_v39, %v12841_v63  ;;  %v13196_v3 = vld [vmem:[#allocation2 + $0x49] sm:$0xff]  ;;  %v13296_v39 = vld [vmem:[#allocation2 + $0x20] sm:$0xff] }
 0x789   : > { %6284 = vst.msk [vmem:[#allocation2 + $0x79] sm:$0xff] %vm719_vm1, %v6243_v37  ;;  %v6165_v31 = vmax.f32 %v6145_v10, 0.0  ;;  %v6120_v33 = vmul.f32 %v10557_v11, %v13042_v19  ;;  %10312 = vmatprep.mubr.msk.f32.mxu1 %vm719_vm1, %v13196_v3  ;;  %v6295_v29 = vld [vmem:[#allocation2 + $0x8] sm:$0xff]  ;;  %v13289_v11 = vld [vmem:[#allocation2 + $0x18] sm:$0xff]  ;;  %v13300_v37 = vld [vmem:[#allocation2 + $0x30] sm:$0xff] }
 0x78a   : > { %v6164_v2 = vmax.f32 %v6144_v14, 0.0  ;;  %v6119_v47 = vmul.f32 %v10558_v20, %v13042_v19  ;;  %v10297_v63 = vpop.f32.mrb[16].mxu0  ;;  %10313 = vmatmul.mubr.msk.f32.gmra.mrb[34].mxu1 %vm719_vm1, %v13203_v53  ;;  %v9037_v10 = vld [vmem:[%s13716_s9 + $0xc] sm:$0xf]  ;;  %v13312_v14 = vld [vmem:[#allocation2 + $0x50] sm:$0xff] }
 0x78b   : > { %v6246_v8 = vsel %vm13190_vm3, %v6165_v31, 0.0  ;;  %v6147_v38 = vadd.f32 %v13048_v22, %v6120_v33  ;;  %v10559_v26 = vadd.f32 %v10297_v63, %v12848_v32  ;;  %v6059_v35 = vpop.f32.mrb[17].mxu0  ;;  %v13228_v49 = vld [vmem:[#allocation2 + $0x69] sm:$0xff] }
 0x78c   : > { %6287 = vst.msk [vmem:[#allocation2 + $0x99] sm:$0xff] %vm719_vm1, %v6246_v8  ;;  %v6245_v1 = vsel %vm13190_vm3, %v6164_v2, 0.0  ;;  %v6146_v28 = vadd.f32 %v13048_v22, %v6119_v47  ;;  %v10560_v23 = vadd.f32 %v6059_v35, %v12853_v61  ;;  %v13221_v34 = vld [vmem:[#allocation2 + $0x61] sm:$0xff]  ;;  %v9055_v35 = vld [vmem:[%s13716_s9 + $0x10] sm:$0xf] }
 0x78d   : > { %6286 = vst.msk [vmem:[#allocation2 + $0x91] sm:$0xff] %vm719_vm1, %v6245_v1  ;;  %v6167_v32 = vmax.f32 %v6147_v38, 0.0  ;;  %v6122_v42 = vmul.f32 %v10559_v26, %v13042_v19  ;;  %10315 = vmatprep.mubr.msk.f32.mxu1 %vm719_vm1, %v13221_v34  ;;  %v13316_v20 = vld [vmem:[#allocation2 + $0x60] sm:$0xff]  ;;  %v13320_v4 = vld [vmem:[#allocation2 + $0x68] sm:$0xff] }
 0x78e   : > { %v6166_v57 = vmax.f32 %v6146_v28, 0.0  ;;  %v6121_v54 = vmul.f32 %v10560_v23, %v13042_v19  ;;  %v10300_v36 = vpop.f32.mrb[18].mxu0  ;;  %10316 = vmatmul.mubr.msk.f32.gmra.mrb[36].mxu1 %vm719_vm1, %v13228_v49  ;;  %v6721_v38 = vld [vmem:[#allocation2 + $0x2] sm:$0xff]  ;;  %v6722_v26 = vld [vmem:[#allocation2 + $0xa] sm:$0xff]  ;;  %v13353_v1 = vld [vmem:[#allocation2 + $0x1a] sm:$0xff] }
 0x78f   : > { %v6248_v61 = vsel %vm13215_vm6, %v6167_v32, 0.0  ;;  %v6149_v40 = vadd.f32 %v13048_v22, %v6122_v42  ;;  %v10561_v15 = vadd.f32 %v10300_v36, %v12866_v25  ;;  %v6069_v0 = vpop.f32.mrb[19].mxu0  ;;  %v13253_v13 = vld [vmem:[#allocation2 + $0x81] sm:$0xff]  ;;  %v13363_v28 = vld [vmem:[#allocation2 + $0x32] sm:$0xff]  ;;  %v13371_v32 = vld [vmem:[#allocation2 + $0x4a] sm:$0xff] }
 0x790   : > { %6289 = vst.msk [vmem:[#allocation2 + $0xb1] sm:$0xff] %vm719_vm1, %v6248_v61  ;;  %v6247_v60 = vsel %vm13215_vm6, %v6166_v57, 0.0  ;;  %v6148_v17 = vadd.f32 %v13048_v22, %v6121_v54  ;;  %v10562_v30 = vadd.f32 %v6069_v0, %v12870_v43  ;;  %v13247_v27 = vld [vmem:[#allocation2 + $0x79] sm:$0xff]  ;;  %v13379_v6 = vld [vmem:[#allocation2 + $0x62] sm:$0xff]  ;;  %v13383_v57 = vld [vmem:[#allocation2 + $0x6a] sm:$0xff] }
 0x791   : > { %6288 = vst.msk [vmem:[#allocation2 + $0xa9] sm:$0xff] %vm719_vm1, %v6247_v60  ;;  %v6169_v25 = vmax.f32 %v6149_v40, 0.0  ;;  %v6124_v12 = vmul.f32 %v10561_v15, %v13042_v19  ;;  %10318 = vmatprep.mubr.msk.f32.mxu1 %vm719_vm1, %v13247_v27  ;;  %v13324_v31 = vld [vmem:[#allocation2 + $0x78] sm:$0xff]  ;;  %v13328_v33 = vld [vmem:[#allocation2 + $0x80] sm:$0xff]  ;;  %v9073_v60 = vld [vmem:[%s13716_s9 + $0x14] sm:$0xf] }
 0x792   : > { %v6168_v62 = vmax.f32 %v6148_v17, 0.0  ;;  %v6123_v18 = vmul.f32 %v10562_v30, %v13042_v19  ;;  %10319 = vmatmul.mubr.msk.f32.gmra.mrb[38].mxu1 %vm719_vm1, %v13253_v13  ;;  %v13367_v23 = vld [vmem:[#allocation2 + $0x3a] sm:$0xff]  ;;  %v13375_v42 = vld [vmem:[#allocation2 + $0x52] sm:$0xff]  ;;  %v13391_v36 = vld [vmem:[#allocation2 + $0x82] sm:$0xff] }
 0x793   : > { %v6250_v43 = vsel %vm13241_vm10, %v6169_v25, 0.0  ;;  %v6151_v52 = vadd.f32 %v13048_v22, %v6124_v12  ;;  %v13270_v58 = vld [vmem:[#allocation2 + $0x99] sm:$0xff] }
 0x794   : > { %6291 = vst.msk [vmem:[#allocation2 + $0xc9] sm:$0xff] %vm719_vm1, %v6250_v43  ;;  %v6249_v51 = vsel %vm13241_vm10, %v6168_v62, 0.0  ;;  %v6150_v50 = vadd.f32 %v13048_v22, %v6123_v18  ;;  %v13265_v55 = vld [vmem:[#allocation2 + $0x91] sm:$0xff]  ;;  %v13387_v54 = vld [vmem:[#allocation2 + $0x7a] sm:$0xff] }
 0x795   : > { %6290 = vst.msk [vmem:[#allocation2 + $0xc1] sm:$0xff] %vm719_vm1, %v6249_v51  ;;  %v6171_v19 = vmax.f32 %v6151_v52, 0.0  ;;  %10321 = vmatprep.mubr.msk.f32.mxu1 %vm719_vm1, %v13265_v55  ;;  %v13332_v2 = vld [vmem:[#allocation2 + $0x90] sm:$0xff]  ;;  %v13336_v47 = vld [vmem:[#allocation2 + $0x98] sm:$0xff]  ;;  %v9127_v18 = vld [vmem:[%s13716_s9 + $0x20] sm:$0xf] }
 0x796   : > { %v6170_v46 = vmax.f32 %v6150_v50, 0.0  ;;  %10322 = vmatmul.mubr.msk.f32.gmra.mrb[40].mxu1 %vm719_vm1, %v13270_v58  ;;  %v13395_v61 = vld [vmem:[#allocation2 + $0x92] sm:$0xff]  ;;  %v13399_v40 = vld [vmem:[#allocation2 + $0x9a] sm:$0xff] }
 0x797   : > { %v6252_v59 = vsel %vm6212_vm13, %v6171_v19, 0.0  ;;  %v13280_v22 = vld [vmem:[#allocation2 + $0xb1] sm:$0xff]  ;;  %v9109_v25 = vld [vmem:[%s13716_s9 + $0x1c] sm:$0xf] }
 0x798   : > { %6293 = vst.msk [vmem:[#allocation2 + $0xe1] sm:$0xff] %vm719_vm1, %v6252_v59  ;;  %v6251_v48 = vsel %vm6212_vm13, %v6170_v46, 0.0  ;;  %v13275_v45 = vld [vmem:[#allocation2 + $0xa9] sm:$0xff]  ;;  %v13407_v0 = vld [vmem:[#allocation2 + $0xb2] sm:$0xff] }
 0x799   : > { %6292 = vst.msk [vmem:[#allocation2 + $0xd9] sm:$0xff] %vm719_vm1, %v6251_v48  ;;  %10324 = vmatprep.mubr.msk.f32.mxu1 %vm719_vm1, %v13275_v45  ;;  %v13340_v63 = vld [vmem:[#allocation2 + $0xa8] sm:$0xff]  ;;  %v13344_v8 = vld [vmem:[#allocation2 + $0xb0] sm:$0xff]  ;;  %v9091_v30 = vld [vmem:[%s13716_s9 + $0x18] sm:$0xf] }
 0x79a   : > { %10325 = vmatmul.mubr.msk.f32.gmra.mrb[42].mxu1 %vm719_vm1, %v13280_v22  ;;  %v13403_v15 = vld [vmem:[#allocation2 + $0xaa] sm:$0xff] }
 0x79b   : > { %10329 = vmatprep.mubr.msk.f32.mxu1 %vm719_vm1, %v6294_v16  ;;  %v7427_v62 = vld [vmem:[#allocation2 + $0xca] sm:$0xff] }
 0x79c   : > { %v6966_v21 = vld [vmem:[#allocation2 + $0xc0] sm:$0xff]  ;;  %v6967_v17 = vld [vmem:[#allocation2 + $0xc8] sm:$0xff] }
 0x79d   : > { %v7426_v12 = vld [vmem:[#allocation2 + $0xc2] sm:$0xff] }
 0x79e   : > { %10330 = vmatmul.mubr.msk.f32.vlgmr.msra.gmra.mrb[28].mxu1 %vm719_vm1, %v6295_v29 }
 0x79f   : > { %10354 = vmatpush3.msk.msra.mxu1 %vm2179_vm8, %v13122_v24  ;;  %10332 = vmatprep.mubr.msk.f32.mxu1 %vm719_vm1, %v13289_v11  ;;  %v13308_v24 = vld [vmem:[#allocation2 + $0x48] sm:$0xff] }
 0x7a0   : > { %10379 = vmatprep.subr.msk.mxu1 %vm2179_vm8, %v9037_v10  ;;  %v7657_v43 = vld [vmem:[#allocation2 + $0xd8] sm:$0xff]  ;;  %v7658_v52 = vld [vmem:[#allocation2 + $0xe0] sm:$0xff] }
 0x7a2   : > { %10333 = vmatmul.mubr.msk.f32.gmra.mrb[30].mxu1 %vm719_vm1, %v13296_v39 }
 0x7a3   : > { %10335 = vmatprep.mubr.msk.f32.mxu1 %vm719_vm1, %v13300_v37 }
 0x7a6   : > { %10336 = vmatmul.mubr.msk.f32.gmra.mrb[32].mxu1 %vm719_vm1, %v13304_v44 }
 0x7a7   : > { %10338 = vmatprep.mubr.msk.f32.mxu1 %vm719_vm1, %v13308_v24 }
 0x7aa   : > { %10339 = vmatmul.mubr.msk.f32.gmra.mrb[34].mxu1 %vm719_vm1, %v13312_v14 }
 0x7ab   : > { %10341 = vmatprep.mubr.msk.f32.mxu1 %vm719_vm1, %v13316_v20 }
 0x7ae   : > { %10342 = vmatmul.mubr.msk.f32.gmra.mrb[36].mxu1 %vm719_vm1, %v13320_v4 }
 0x7af   : > { %10344 = vmatprep.mubr.msk.f32.mxu1 %vm719_vm1, %v13324_v31 }
 0x7b2   : > { %10345 = vmatmul.mubr.msk.f32.gmra.mrb[38].mxu1 %vm719_vm1, %v13328_v33 }
 0x7b3   : > { %10347 = vmatprep.mubr.msk.f32.mxu1 %vm719_vm1, %v13332_v2 }
 0x7b6   : > { %10348 = vmatmul.mubr.msk.f32.gmra.mrb[40].mxu1 %vm719_vm1, %v13336_v47 }
 0x7b7   : > { %10350 = vmatprep.mubr.msk.f32.mxu1 %vm719_vm1, %v13340_v63 }
 0x7ba   : > { %10351 = vmatmul.mubr.msk.f32.gmra.mrb[42].mxu1 %vm719_vm1, %v13344_v8 }
 0x7bb   : > { %10355 = vmatprep.mubr.msk.f32.mxu1 %vm719_vm1, %v6721_v38 }
 0x7be   : > { %10356 = vmatmul.mubr.msk.f32.vlgmr.msra.gmra.mrb[28].mxu1 %vm719_vm1, %v6722_v26 }
 0x7bf   : > { %10380 = vmatpush3.msk.msra.mxu1 %vm2179_vm8, %v9037_v10  ;;  %10358 = vmatprep.mubr.msk.f32.mxu1 %vm719_vm1, %v13353_v1 }
 0x7c0   : > { %10405 = vmatprep.subr.msk.mxu1 %vm2179_vm8, %v9055_v35 }
 0x7c2   : > { %10359 = vmatmul.mubr.msk.f32.gmra.mrb[30].mxu1 %vm719_vm1, %v13359_v9 }
 0x7c3   : > { %10361 = vmatprep.mubr.msk.f32.mxu1 %vm719_vm1, %v13363_v28 }
 0x7c6   : > { %10362 = vmatmul.mubr.msk.f32.gmra.mrb[32].mxu1 %vm719_vm1, %v13367_v23 }
 0x7c7   : > { %10364 = vmatprep.mubr.msk.f32.mxu1 %vm719_vm1, %v13371_v32 }
 0x7ca   : > { %10365 = vmatmul.mubr.msk.f32.gmra.mrb[34].mxu1 %vm719_vm1, %v13375_v42 }
 0x7cb   : > { %10367 = vmatprep.mubr.msk.f32.mxu1 %vm719_vm1, %v13379_v6 }
 0x7ce   : > { %10368 = vmatmul.mubr.msk.f32.gmra.mrb[36].mxu1 %vm719_vm1, %v13383_v57 }
 0x7cf   : > { %10370 = vmatprep.mubr.msk.f32.mxu1 %vm719_vm1, %v13387_v54 }
 0x7d2   : > { %10371 = vmatmul.mubr.msk.f32.gmra.mrb[38].mxu1 %vm719_vm1, %v13391_v36 }
 0x7d3   : > { %10373 = vmatprep.mubr.msk.f32.mxu1 %vm719_vm1, %v13395_v61 }
 0x7d6   : > { %10374 = vmatmul.mubr.msk.f32.gmra.mrb[40].mxu1 %vm719_vm1, %v13399_v40 }
 0x7d7   : > { %10376 = vmatprep.mubr.msk.f32.mxu1 %vm719_vm1, %v13403_v15 }
 0x7da   : > { %10377 = vmatmul.mubr.msk.f32.gmra.mrb[42].mxu1 %vm719_vm1, %v13407_v0 }
 0x7db   : > { %10381 = vmatprep.mubr.msk.f32.mxu1 %vm719_vm1, %v13289_v11 }
 0x7de   : > { %10382 = vmatmul.mubr.msk.f32.vlgmr.msra.gmra.mrb[28].mxu1 %vm719_vm1, %v13296_v39 }
 0x7df   : > { %10406 = vmatpush3.msk.msra.mxu1 %vm2179_vm8, %v9055_v35  ;;  %10384 = vmatprep.mubr.msk.f32.mxu1 %vm719_vm1, %v13300_v37 }
 0x7e0   : > { %10431 = vmatprep.subr.msk.mxu1 %vm2179_vm8, %v9073_v60 }
 0x7e2   : > { %10385 = vmatmul.mubr.msk.f32.gmra.mrb[30].mxu1 %vm719_vm1, %v13304_v44 }
 0x7e3   : > { %10387 = vmatprep.mubr.msk.f32.mxu1 %vm719_vm1, %v13308_v24 }
 0x7e6   : > { %10388 = vmatmul.mubr.msk.f32.gmra.mrb[32].mxu1 %vm719_vm1, %v13312_v14 }
 0x7e7   : > { %10390 = vmatprep.mubr.msk.f32.mxu1 %vm719_vm1, %v13316_v20 }
 0x7ea   : > { %10391 = vmatmul.mubr.msk.f32.gmra.mrb[34].mxu1 %vm719_vm1, %v13320_v4 }
 0x7eb   : > { %10393 = vmatprep.mubr.msk.f32.mxu1 %vm719_vm1, %v13324_v31 }
 0x7ee   : > { %10394 = vmatmul.mubr.msk.f32.gmra.mrb[36].mxu1 %vm719_vm1, %v13328_v33 }
 0x7ef   : > { %10396 = vmatprep.mubr.msk.f32.mxu1 %vm719_vm1, %v13332_v2 }
 0x7f2   : > { %10397 = vmatmul.mubr.msk.f32.gmra.mrb[38].mxu1 %vm719_vm1, %v13336_v47 }
 0x7f3   : > { %10399 = vmatprep.mubr.msk.f32.mxu1 %vm719_vm1, %v13340_v63 }
 0x7f6   : > { %10400 = vmatmul.mubr.msk.f32.gmra.mrb[40].mxu1 %vm719_vm1, %v13344_v8 }
 0x7f7   : > { %10402 = vmatprep.mubr.msk.f32.mxu1 %vm719_vm1, %v6966_v21 }
 0x7fa   : > { %10403 = vmatmul.mubr.msk.f32.gmra.mrb[42].mxu1 %vm719_vm1, %v6967_v17 }
 0x7fb   : > { %10407 = vmatprep.mubr.msk.f32.mxu1 %vm719_vm1, %v13143_v5  ;;  %v7196_v5 = vld [vmem:[#allocation2 + $0xc1] sm:$0xff] }
 0x7fe   : > { %10408 = vmatmul.mubr.msk.f32.vlgmr.msra.gmra.mrb[28].mxu1 %vm719_vm1, %v13152_v7  ;;  %v7197_v7 = vld [vmem:[#allocation2 + $0xc9] sm:$0xff] }
 0x7ff   : > { %10432 = vmatpush3.msk.msra.mxu1 %vm2179_vm8, %v9073_v60  ;;  %10410 = vmatprep.mubr.msk.f32.mxu1 %vm719_vm1, %v13170_v56 }
 0x800   : > { %10457 = vmatprep.subr.msk.mxu1 %vm2179_vm8, %v9091_v30 }
 0x802   : > { %10411 = vmatmul.mubr.msk.f32.gmra.mrb[30].mxu1 %vm719_vm1, %v13177_v41 }
 0x803   : > { %10413 = vmatprep.mubr.msk.f32.mxu1 %vm719_vm1, %v13196_v3 }
 0x806   : > { %10414 = vmatmul.mubr.msk.f32.gmra.mrb[32].mxu1 %vm719_vm1, %v13203_v53 }
 0x807   : > { %10416 = vmatprep.mubr.msk.f32.mxu1 %vm719_vm1, %v13221_v34 }
 0x80a   : > { %10417 = vmatmul.mubr.msk.f32.gmra.mrb[34].mxu1 %vm719_vm1, %v13228_v49 }
 0x80b   : > { %10419 = vmatprep.mubr.msk.f32.mxu1 %vm719_vm1, %v13247_v27 }
 0x80e   : > { %10420 = vmatmul.mubr.msk.f32.gmra.mrb[36].mxu1 %vm719_vm1, %v13253_v13 }
 0x80f   : > { %10422 = vmatprep.mubr.msk.f32.mxu1 %vm719_vm1, %v13265_v55 }
 0x812   : > { %10423 = vmatmul.mubr.msk.f32.gmra.mrb[38].mxu1 %vm719_vm1, %v13270_v58 }
 0x813   : > { %10425 = vmatprep.mubr.msk.f32.mxu1 %vm719_vm1, %v13275_v45 }
 0x816   : > { %10426 = vmatmul.mubr.msk.f32.gmra.mrb[40].mxu1 %vm719_vm1, %v13280_v22 }
 0x817   : > { %10428 = vmatprep.mubr.msk.f32.mxu1 %vm719_vm1, %v7196_v5 }
 0x81a   : > { %10429 = vmatmul.mubr.msk.f32.gmra.mrb[42].mxu1 %vm719_vm1, %v7197_v7 }
 0x81b   : > { %10433 = vmatprep.mubr.msk.f32.mxu1 %vm719_vm1, %v13353_v1 }
 0x81e   : > { %10434 = vmatmul.mubr.msk.f32.vlgmr.msra.gmra.mrb[28].mxu1 %vm719_vm1, %v13359_v9 }
 0x81f   : > { %10458 = vmatpush3.msk.msra.mxu1 %vm2179_vm8, %v9091_v30  ;;  %10436 = vmatprep.mubr.msk.f32.mxu1 %vm719_vm1, %v13363_v28 }
 0x820   : > { %10483 = vmatprep.subr.msk.mxu1 %vm2179_vm8, %v9109_v25 }
 0x822   : > { %10437 = vmatmul.mubr.msk.f32.gmra.mrb[30].mxu1 %vm719_vm1, %v13367_v23 }
 0x823   : > { %10439 = vmatprep.mubr.msk.f32.mxu1 %vm719_vm1, %v13371_v32 }
 0x826   : > { %10440 = vmatmul.mubr.msk.f32.gmra.mrb[32].mxu1 %vm719_vm1, %v13375_v42 }
 0x827   : > { %10442 = vmatprep.mubr.msk.f32.mxu1 %vm719_vm1, %v13379_v6 }
 0x82a   : > { %10443 = vmatmul.mubr.msk.f32.gmra.mrb[34].mxu1 %vm719_vm1, %v13383_v57 }
 0x82b   : > { %10445 = vmatprep.mubr.msk.f32.mxu1 %vm719_vm1, %v13387_v54 }
 0x82e   : > { %10446 = vmatmul.mubr.msk.f32.gmra.mrb[36].mxu1 %vm719_vm1, %v13391_v36 }
 0x82f   : > { %10448 = vmatprep.mubr.msk.f32.mxu1 %vm719_vm1, %v13395_v61 }
 0x832   : > { %10449 = vmatmul.mubr.msk.f32.gmra.mrb[38].mxu1 %vm719_vm1, %v13399_v40 }
 0x833   : > { %10451 = vmatprep.mubr.msk.f32.mxu1 %vm719_vm1, %v13403_v15 }
 0x836   : > { %10452 = vmatmul.mubr.msk.f32.gmra.mrb[40].mxu1 %vm719_vm1, %v13407_v0 }
 0x837   : > { %10454 = vmatprep.mubr.msk.f32.mxu1 %vm719_vm1, %v7426_v12 }
 0x83a   : > { %10455 = vmatmul.mubr.msk.f32.gmra.mrb[42].mxu1 %vm719_vm1, %v7427_v62 }
 0x83b   : > { %10459 = vmatprep.mubr.msk.f32.mxu1 %vm719_vm1, %v13300_v37 }
 0x83e   : > { %10460 = vmatmul.mubr.msk.f32.vlgmr.msra.gmra.mrb[28].mxu1 %vm719_vm1, %v13304_v44 }
 0x83f   : > { %10484 = vmatpush3.msk.msra.mxu1 %vm2179_vm8, %v9109_v25  ;;  %10462 = vmatprep.mubr.msk.f32.mxu1 %vm719_vm1, %v13308_v24 }
 0x840   : > { %10509 = vmatprep.subr.msk.mxu1 %vm2179_vm8, %v9127_v18 }
 0x842   : > { %10463 = vmatmul.mubr.msk.f32.gmra.mrb[30].mxu1 %vm719_vm1, %v13312_v14 }
 0x843   : > { %10465 = vmatprep.mubr.msk.f32.mxu1 %vm719_vm1, %v13316_v20 }
 0x846   : > { %10466 = vmatmul.mubr.msk.f32.gmra.mrb[32].mxu1 %vm719_vm1, %v13320_v4 }
 0x847   : > { %10468 = vmatprep.mubr.msk.f32.mxu1 %vm719_vm1, %v13324_v31 }
 0x84a   : > { %10469 = vmatmul.mubr.msk.f32.gmra.mrb[34].mxu1 %vm719_vm1, %v13328_v33 }
 0x84b   : > { %10471 = vmatprep.mubr.msk.f32.mxu1 %vm719_vm1, %v13332_v2 }
 0x84e   : > { %10472 = vmatmul.mubr.msk.f32.gmra.mrb[36].mxu1 %vm719_vm1, %v13336_v47 }
 0x84f   : > { %10474 = vmatprep.mubr.msk.f32.mxu1 %vm719_vm1, %v13340_v63 }
 0x852   : > { %10475 = vmatmul.mubr.msk.f32.gmra.mrb[38].mxu1 %vm719_vm1, %v13344_v8 }
 0x853   : > { %10477 = vmatprep.mubr.msk.f32.mxu1 %vm719_vm1, %v6966_v21 }
 0x856   : > { %10478 = vmatmul.mubr.msk.f32.gmra.mrb[40].mxu1 %vm719_vm1, %v6967_v17 }
 0x857   : > { %10480 = vmatprep.mubr.msk.f32.mxu1 %vm719_vm1, %v7657_v43 }
 0x85a   : > { %10481 = vmatmul.mubr.msk.f32.gmra.mrb[42].mxu1 %vm719_vm1, %v7658_v52 }
 0x85b   : > { %10485 = vmatprep.mubr.msk.f32.mxu1 %vm719_vm1, %v13170_v56  ;;  %v7887_v56 = vld [vmem:[#allocation2 + $0xd9] sm:$0xff] }
 0x85e   : > { %10486 = vmatmul.mubr.msk.f32.vlgmr.msra.gmra.mrb[28].mxu1 %vm719_vm1, %v13177_v41  ;;  %v7888_v41 = vld [vmem:[#allocation2 + $0xe1] sm:$0xff] }
 0x85f   : > { %10510 = vmatpush3.msk.msra.mxu1 %vm2179_vm8, %v9127_v18  ;;  %10488 = vmatprep.mubr.msk.f32.mxu1 %vm719_vm1, %v13196_v3  ;;  %v8117_v3 = vld [vmem:[#allocation2 + $0xda] sm:$0xff] }
 0x862   : > { %10489 = vmatmul.mubr.msk.f32.gmra.mrb[30].mxu1 %vm719_vm1, %v13203_v53  ;;  %v8118_v53 = vld [vmem:[#allocation2 + $0xe2] sm:$0xff] }
 0x863   : > { %10491 = vmatprep.mubr.msk.f32.mxu1 %vm719_vm1, %v13221_v34  ;;  %v13609_v34 = vld [vmem:[%s13717_s10] ss:$0 sm:$0xff] }
 0x866   : > { %10492 = vmatmul.mubr.msk.f32.gmra.mrb[32].mxu1 %vm719_vm1, %v13228_v49 }
 0x867   : > { %10494 = vmatprep.mubr.msk.f32.mxu1 %vm719_vm1, %v13247_v27  ;;  %v13614_v27 = vld [vmem:[%s13718_s11] ss:$0 sm:$0xff] }
 0x86a   : > { %10495 = vmatmul.mubr.msk.f32.gmra.mrb[34].mxu1 %vm719_vm1, %v13253_v13 }
 0x86b   : > { %10497 = vmatprep.mubr.msk.f32.mxu1 %vm719_vm1, %v13265_v55 }
 0x86e   : > { %10498 = vmatmul.mubr.msk.f32.gmra.mrb[36].mxu1 %vm719_vm1, %v13270_v58 }
 0x86f   : > { %10500 = vmatprep.mubr.msk.f32.mxu1 %vm719_vm1, %v13275_v45 }
 0x872   : > { %10501 = vmatmul.mubr.msk.f32.gmra.mrb[38].mxu1 %vm719_vm1, %v13280_v22 }
 0x873   : > { %10503 = vmatprep.mubr.msk.f32.mxu1 %vm719_vm1, %v7196_v5 }
 0x876   : > { %10504 = vmatmul.mubr.msk.f32.gmra.mrb[40].mxu1 %vm719_vm1, %v7197_v7 }
 0x877   : > { %10506 = vmatprep.mubr.msk.f32.mxu1 %vm719_vm1, %v7887_v56 }
 0x87a   : > { %10507 = vmatmul.mubr.msk.f32.gmra.mrb[42].mxu1 %vm719_vm1, %v7888_v41 }
 0x87b   : > { %10511 = vmatprep.mubr.msk.f32.mxu1 %vm719_vm1, %v13363_v28 }
 0x87e   : > { %10512 = vmatmul.mubr.msk.f32.vlgmr.msra.gmra.mrb[28].mxu1 %vm719_vm1, %v13367_v23 }
 0x87f   : > { %10514 = vmatprep.mubr.msk.f32.mxu1 %vm719_vm1, %v13371_v32 }
 0x882   : > { %10515 = vmatmul.mubr.msk.f32.gmra.mrb[30].mxu1 %vm719_vm1, %v13375_v42 }
 0x883   : > { %10517 = vmatprep.mubr.msk.f32.mxu1 %vm719_vm1, %v13379_v6 }
 0x886   : > { %10518 = vmatmul.mubr.msk.f32.gmra.mrb[32].mxu1 %vm719_vm1, %v13383_v57 }
 0x887   : > { %10520 = vmatprep.mubr.msk.f32.mxu1 %vm719_vm1, %v13387_v54 }
 0x88a   : > { %10521 = vmatmul.mubr.msk.f32.gmra.mrb[34].mxu1 %vm719_vm1, %v13391_v36 }
 0x88b   : > { %10523 = vmatprep.mubr.msk.f32.mxu1 %vm719_vm1, %v13395_v61 }
 0x88e   : > { %10524 = vmatmul.mubr.msk.f32.gmra.mrb[36].mxu1 %vm719_vm1, %v13399_v40 }
 0x88f   : > { %10526 = vmatprep.mubr.msk.f32.mxu1 %vm719_vm1, %v13403_v15 }
 0x892   : > { %10527 = vmatmul.mubr.msk.f32.gmra.mrb[38].mxu1 %vm719_vm1, %v13407_v0 }
 0x893   : > { %10529 = vmatprep.mubr.msk.f32.mxu1 %vm719_vm1, %v7426_v12 }
 0x896   : > { %10530 = vmatmul.mubr.msk.f32.gmra.mrb[40].mxu1 %vm719_vm1, %v7427_v62 }
 0x897   : > { %10532 = vmatprep.mubr.msk.f32.mxu1 %vm719_vm1, %v8117_v3 }
 0x89a   : > { %10533 = vmatmul.mubr.msk.f32.gmra.mrb[42].mxu1 %vm719_vm1, %v8118_v53 }
 0x951   : > { %v10513_v49 = vpop.f32.mrb[28].mxu1 }
 0x952   : > { %v8238_v13 = vpop.f32.mrb[29].mxu1  ;;  %v8341_v51 = vmul.f32 %v10513_v49, %v13609_v34 }
 0x953   : > { %v8340_v50 = vmul.f32 %v13609_v34, %v8238_v13 }
 0x954   : > { %v8364_v46 = vadd.f32 %v13614_v27, %v8341_v51 }
 0x955   : > { %v10516_v55 = vpop.f32.mrb[30].mxu1  ;;  %v8363_v19 = vadd.f32 %v13614_v27, %v8340_v50 }
 0x956   : > { %v8248_v58 = vpop.f32.mrb[31].mxu1  ;;  %v8380_v16 = vmax.f32 %v8364_v46, 0.0  ;;  %v8343_v29 = vmul.f32 %v10516_v55, %v13609_v34 }
 0x957   : > { %v8342_v59 = vmul.f32 %v13609_v34, %v8248_v58  ;;  %v8379_v48 = vmax.f32 %v8363_v19, 0.0 }
 0x958   : > { %v8366_v37 = vadd.f32 %v13614_v27, %v8343_v29 }
 0x959   : > { %8395 = vxpose.xlu1.b32.start [1/16] (narrow) %v8379_v48, 8  ;;  %v10519_v45 = vpop.f32.mrb[32].mxu1  ;;  %v8365_v10 = vadd.f32 %v13614_v27, %v8342_v59 }
 0x95a   : > { %v8258_v22 = vpop.f32.mrb[33].mxu1  ;;  %v8382_v4 = vmax.f32 %v8366_v37, 0.0  ;;  %v8345_v31 = vmul.f32 %v10519_v45, %v13609_v34 }
 0x95b   : > { %v8381_v44 = vmax.f32 %v8365_v10, 0.0  ;;  %v8344_v24 = vmul.f32 %v13609_v34, %v8258_v22 }
 0x95c   : > { %v8368_v63 = vadd.f32 %v13614_v27, %v8345_v31 }
 0x95d   : > { %8396 = vxpose.xlu1.b32.cont [2/16] (narrow) %v8380_v16, 8  ;;  %v10522_v11 = vpop.f32.mrb[34].mxu1  ;;  %v8367_v33 = vadd.f32 %v13614_v27, %v8344_v24 }
 0x95e   : > { %v8268_v39 = vpop.f32.mrb[35].mxu1  ;;  %v8384_v1 = vmax.f32 %v8368_v63, 0.0  ;;  %v8347_v9 = vmul.f32 %v10522_v11, %v13609_v34 }
 0x95f   : > { %v8383_v8 = vmax.f32 %v8367_v33, 0.0  ;;  %v8346_v38 = vmul.f32 %v13609_v34, %v8268_v39 }
 0x960   : > { %v8370_v42 = vadd.f32 %v13614_v27, %v8347_v9 }
 0x961   : > { %8397 = vxpose.xlu1.b32.cont [3/16] (narrow) %v8381_v44, 8  ;;  %v10525_v14 = vpop.f32.mrb[36].mxu1  ;;  %v8369_v28 = vadd.f32 %v13614_v27, %v8346_v38 }
 0x962   : > { %v8278_v20 = vpop.f32.mrb[37].mxu1  ;;  %v8386_v54 = vmax.f32 %v8370_v42, 0.0  ;;  %v8349_v36 = vmul.f32 %v10525_v14, %v13609_v34 }
 0x963   : > { %v8385_v6 = vmax.f32 %v8369_v28, 0.0  ;;  %v8348_v57 = vmul.f32 %v13609_v34, %v8278_v20 }
 0x964   : > { %v8372_v40 = vadd.f32 %v13614_v27, %v8349_v36 }
 0x965   : > { %8398 = vxpose.xlu1.b32.cont [4/16] (narrow) %v8382_v4, 8  ;;  %v10528_v2 = vpop.f32.mrb[38].mxu1  ;;  %v8371_v61 = vadd.f32 %v13614_v27, %v8348_v57 }
 0x966   : > { %v8288_v47 = vpop.f32.mrb[39].mxu1  ;;  %v8388_v60 = vmax.f32 %v8372_v40, 0.0  ;;  %v8351_v21 = vmul.f32 %v10528_v2, %v13609_v34 }
 0x967   : > { %v8387_v15 = vmax.f32 %v8371_v61, 0.0  ;;  %v8350_v0 = vmul.f32 %v13609_v34, %v8288_v47 }
 0x968   : > { %v8374_v30 = vadd.f32 %v13614_v27, %v8351_v21 }
 0x969   : > { %8399 = vxpose.xlu1.b32.cont [5/16] (narrow) %v8383_v8, 8  ;;  %v10531_v26 = vpop.f32.mrb[40].mxu1  ;;  %v8373_v17 = vadd.f32 %v13614_v27, %v8350_v0 }
 0x96a   : > { %v8298_v35 = vpop.f32.mrb[41].mxu1  ;;  %v8390_v25 = vmax.f32 %v8374_v30, 0.0  ;;  %v8353_v12 = vmul.f32 %v10531_v26, %v13609_v34 }
 0x96b   : > { %v8389_v5 = vmax.f32 %v8373_v17, 0.0  ;;  %v8352_v7 = vmul.f32 %v13609_v34, %v8298_v35 }
 0x96c   : > { %v8376_v18 = vadd.f32 %v13614_v27, %v8353_v12 }
 0x96d   : > { %8400 = vxpose.xlu1.b32.cont [6/16] (narrow) %v8384_v1, 8  ;;  %v10534_v23 = vpop.f32.mrb[42].mxu1  ;;  %v8375_v62 = vadd.f32 %v13614_v27, %v8352_v7 }
 0x96e   : > { %v8308_v32 = vpop.f32.mrb[43].mxu1  ;;  %v8392_v56 = vmax.f32 %v8376_v18, 0.0  ;;  %v8355_v41 = vmul.f32 %v10534_v23, %v13609_v34 }
 0x96f   : > { %v8391_v43 = vmax.f32 %v8375_v62, 0.0  ;;  %v8354_v52 = vmul.f32 %v13609_v34, %v8308_v32 }
 0x970   : > { %v8378_v53 = vadd.f32 %v13614_v27, %v8355_v41 }
 0x971   : > { %8401 = vxpose.xlu1.b32.cont [7/16] (narrow) %v8385_v6, 8  ;;  %v8377_v3 = vadd.f32 %v13614_v27, %v8354_v52 }
 0x972   : > { %v8394_v13 = vmax.f32 %v8378_v53, 0.0 }
 0x973   : > { %v8393_v49 = vmax.f32 %v8377_v3, 0.0 }
 0x975   : > { %8402 = vxpose.xlu1.b32.cont [8/16] (narrow) %v8386_v54, 8 }
 0x979   : > { %8403 = vxpose.xlu1.b32.cont [9/16] (narrow) %v8387_v15, 8 }
 0x97d   : > { %8404 = vxpose.xlu1.b32.cont [10/16] (narrow) %v8388_v60, 8 }
 0x981   : > { %8405 = vxpose.xlu1.b32.cont [11/16] (narrow) %v8389_v5, 8 }
 0x985   : > { %8406 = vxpose.xlu1.b32.cont [12/16] (narrow) %v8390_v25, 8 }
 0x989   : > { %8407 = vxpose.xlu1.b32.cont [13/16] (narrow) %v8391_v43, 8 }
 0x98d   : > { %8408 = vxpose.xlu1.b32.cont [14/16] (narrow) %v8392_v56, 8 }
 0x991   : > { %8409 = vxpose.xlu1.b32.cont [15/16] (narrow) %v8393_v49, 8 }
 0x995   : > { %8410 = vxpose.xlu1.b32.end [16/16] (narrow) %v8394_v13, 8 }
 0x9d9   : > { %v8411_v34 = vpop.trf.xlu1 }
 0x9da   : > { %8427 = vst [vmem:[%s501_s18] sm:$0xf] %v8411_v34 }
 0x9db   : > { %11127 = shalt.err (!%p11124_p9)
}
 0x9dc   : > { %s11128_s15 = scalar_lea.hbm %s13656_s19, 64  ;;  %s11132_s18 = scalar_lea.hbm %s13719_s12, 256 }
 0x9dd   : > { %p11129_p10 = scmp.ne.s32.totalorder %s13656_s19, %s11128_s15  ;;  %p11133_p13 = scmp.lt.u32.totalorder %s13656_s19, %s13719_s12 }
 0x9de   : > { %p11134_p0 = scmp.lt.u32.totalorder %s11132_s18, %s11128_s15  ;;  %p11136_p2 = scmp.lt.u32.totalorder %s11128_s15, %s13656_s19 }
 0x9df   : > { %p11130_p11 = pnand %p11129_p10, %p11344_p3 }
 0x9e0   : > { %p11135_p1 = por %p11134_p0, %p11133_p13 }
 0x9e1   : > { %p11131_p12 = pneg %p11130_p11 }
 0x9e2   : > { %p11137_p4 = por %p11136_p2, %p11135_p1 }
 0x9e4   : > { %p11138_p5 = pnand %p11137_p4, %p11131_p12 }
 0x9e6   : > { %11141 = shalt.err (!%p11138_p5)
}
 0x9e7   : > { %11014 = dma.vmem_to_hbm [thread:$0]  (%p11344_p3), %s13651_s0, 64, %s13656_s19, %s8429_s1  }
 0x9e8 PF: > { %p11020_p6 = scmp.ge.s32.totalorder %s11208_s28, 2  ;;  %s8456_s2 = sand.u32 1, %s11180_s21  }
 0x9e9   : > { %s8457_s30 = scalar_lea.sflag [#allocation4], %s8456_s2 }
 0x9ea   : > { %p11017_p7 = pnand %p11020_p6, %p11353_p8 }
 0x9ec   : > { %11175 = dma.done.wait (!%p11017_p7), %s8457_s30, 64  }
 0x9ed   : > { %11177 = vsyncadd (!%p11017_p7), %s8457_s30, 4294967232  ;;  %s25_s28 = sadd.s32 1, %s11208_s28   ;;  %s14046_s25 = sld [smem:[#allocation6_spill]] }
 0x9ee   : > { %p22_p9 = scmp.ge.s32.totalorder %s25_s28, 6   ;;  %s14047_s1 = sld [smem:[#allocation7_spill]] }
 0x9ef   : > { %s14048_s27 = sld [smem:[#allocation8_spill]]  ;;  %s14049_s21 = smov %s11184_s22 }
 0x9f0   : > { %s14050_s22 = smov %s11188_s23  ;;  %s14051_s23 = smov %s11362_s29 }
 0x9f1   : > { %s14052_s24 = smov %s11200_s26  ;;  %24 = sbr.rel (!%p22_p9) target bundleno = 10 (0xa), region = 136 }
 0x9f4   : > { %s14053_s26 = smov %s14047_s1 }
 0x9f8   :  { %8462 = vsyncpa [#allocation4], 1 }
 0x9f9   :  { %8464 = vsyncpa [#allocation4 + $0x1], 1 }

</bundles_post_ra>
